<compile_context>
chip_gen: v7x
topology: tpu7x:2x2x1
jax: 0.10.0
libtpu: 0.0.40
codegen_flags: <defaults>
</compile_context>

<pallas_src>
import jax
import jax.numpy as jnp
from jax.experimental import pallas as pl
from jax.experimental.pallas import tpu as pltpu

F_PAD = 128            # lane width per DGI pass
F_TOT = 2 * F_PAD      # positive + corrupted passes lane-concatenated


def encoder_kernel(adj_ref, h0_ref, w_ref, vec_ref, o_ref,
                   hw_ref, z_ref, sum_ref, sq_ref, s_ref, t_ref):
    """Grid = (layer, phase, row_block).
    phase 0: z[r] = A[r,:] @ hw + (1+eps)*hw[r] + b; accumulate BN1 stats.
    phase 1: y[r] = ReLU(BN1(z[r]))  (ApplyNodeFunc BN+ReLU); accumulate BN2 stats.
    phase 2: h[r] = ReLU(BN2(y[r])); produce next layer's hw[r] or final output."""
    l = pl.program_id(0)
    ph = pl.program_id(1)
    r = pl.program_id(2)
    num_layers = pl.num_programs(0)

    n_total = hw_ref.shape[0]
    tn = adj_ref.shape[0]
    row0 = pl.multiple_of(r * tn, tn)
    inv_n = 1.0 / n_total

    vec = vec_ref[0]                       # (8, F_TOT) f32: [b, g1, be1, g2, be2, eps, 0, 0]
    b, g1, be1 = vec[0:1], vec[1:2], vec[2:3]
    g2, be2 = vec[3:4], vec[4:5]
    one_plus_eps = 1.0 + vec[5:6]

    # One-time init: hw = h0 @ W0 for all rows (h0 only ever enters through hw).
    @pl.when((l == 0) & (ph == 0) & (r == 0))
    def _():
        hw_ref[...] = jnp.dot(h0_ref[...], w_ref[0],
                              preferred_element_type=jnp.float32).astype(jnp.bfloat16)

    # ---- phase 0: GIN sum-aggregation + BN1 statistics --------------------
    @pl.when(ph == 0)
    def _():
        @pl.when(r == 0)
        def _():
            sum_ref[...] = jnp.zeros_like(sum_ref)
            sq_ref[...] = jnp.zeros_like(sq_ref)

        hw_blk = hw_ref[pl.ds(row0, tn), :].astype(jnp.float32)
        z = jnp.dot(adj_ref[...], hw_ref[...], preferred_element_type=jnp.float32)
        z = z + one_plus_eps * hw_blk + b
        z_ref[pl.ds(row0, tn), :] = z
        sum_ref[...] += jnp.sum(z, axis=0, keepdims=True)
        sq_ref[...] += jnp.sum(z * z, axis=0, keepdims=True)

    # ---- phase 1: ApplyNodeFunc's BN + ReLU, accumulate BN2 statistics ----
    @pl.when(ph == 1)
    def _():
        @pl.when(r == 0)
        def _():
            mean = sum_ref[...] * inv_n
            var = jnp.maximum(sq_ref[...] * inv_n - mean * mean, 0.0)
            s = jax.lax.rsqrt(var + 1e-5) * g1
            s_ref[...] = s
            t_ref[...] = be1 - mean * s
            sum_ref[...] = jnp.zeros_like(sum_ref)
            sq_ref[...] = jnp.zeros_like(sq_ref)

        y = jnp.maximum(z_ref[pl.ds(row0, tn), :] * s_ref[...] + t_ref[...], 0.0)
        z_ref[pl.ds(row0, tn), :] = y
        sum_ref[...] += jnp.sum(y, axis=0, keepdims=True)
        sq_ref[...] += jnp.sum(y * y, axis=0, keepdims=True)

    # ---- phase 2: GIN's outer BN + ReLU, then next hw or final output -----
    @pl.when(ph == 2)
    def _():
        @pl.when(r == 0)
        def _():
            mean = sum_ref[...] * inv_n
            var = jnp.maximum(sq_ref[...] * inv_n - mean * mean, 0.0)
            s = jax.lax.rsqrt(var + 1e-5) * g2
            s_ref[...] = s
            t_ref[...] = be2 - mean * s

        h_new = jnp.maximum(z_ref[pl.ds(row0, tn), :] * s_ref[...] + t_ref[...], 0.0)

        @pl.when(l + 1 < num_layers)
        def _():
            # w_ref holds W_{l+1} during phase 2 (see index_map).
            hw_ref[pl.ds(row0, tn), :] = jnp.dot(
                h_new.astype(jnp.bfloat16), w_ref[0],
                preferred_element_type=jnp.float32).astype(jnp.bfloat16)

        @pl.when(l + 1 == num_layers)
        def _():
            o_ref[pl.ds(row0, tn), :] = h_new.astype(o_ref.dtype)


def init_encoder_params(key, in_feats, n_hidden, n_layers):
    """Per-layer params with the shapes PyTorch's GIN/ApplyNodeFunc create."""
    num_gin_layers = n_layers + 1
    params = []
    keys = jax.random.split(key, num_gin_layers)
    for i in range(num_gin_layers):
        fin = in_feats if i == 0 else n_hidden
        fout = n_hidden
        kw, kb = jax.random.split(keys[i])
        bound = 1.0 / (fin ** 0.5)                       # nn.Linear default init
        w = jax.random.uniform(kw, (fin, fout), jnp.float32, -bound, bound)
        b = jax.random.uniform(kb, (1, fout), jnp.float32, -bound, bound)
        gamma1 = jnp.ones((1, fout), jnp.float32)
        beta1 = jnp.zeros((1, fout), jnp.float32)
        gamma2 = jnp.ones((1, fout), jnp.float32)
        beta2 = jnp.zeros((1, fout), jnp.float32)
        eps = jnp.zeros((1, 1), jnp.float32)             # GINConv learn_eps init 0
        params.append((w, b, gamma1, beta1, gamma2, beta2, eps))
    return params


def pack_params(params, f_pad=F_PAD):
    """Pad to 128 lanes, duplicate into a block-diagonal 256-lane layout (so the
    positive and corrupted DGI passes share one call), and pack the per-layer
    vectors [bias, gamma1, beta1, gamma2, beta2, eps] into one (8, 256) slab.
    Padded lanes MUST stay exactly zero (keeps padded output columns at 0)."""
    f_tot = 2 * f_pad
    w_stack, vec_stack = [], []
    for (w, b, g1, b1, g2, b2, eps) in params:
        fin, fout = w.shape
        w_p = jnp.zeros((f_pad, f_pad), jnp.float32).at[:fin, :fout].set(w)
        w_bd = (jnp.zeros((f_tot, f_tot), jnp.float32)
                .at[:f_pad, :f_pad].set(w_p)
                .at[f_pad:, f_pad:].set(w_p))

        def lane2(v, fout=fout):          # (1, fout) -> (256,), both slabs
            vp = jnp.zeros((f_pad,), jnp.float32).at[:fout].set(v[0])
            return jnp.concatenate([vp, vp])

        eps_row = jnp.full((f_tot,), eps[0, 0], jnp.float32)
        zero = jnp.zeros((f_tot,), jnp.float32)
        vec = jnp.stack([lane2(b), lane2(g1), lane2(b1), lane2(g2), lane2(b2),
                         eps_row, zero, zero])
        w_stack.append(w_bd.astype(jnp.bfloat16))
        vec_stack.append(vec)
    return jnp.stack(w_stack), jnp.stack(vec_stack)


def encoder_forward(adj_bf16, feats_pos, feats_neg, packed, n_hidden, tn=128):
    """Whole GIN/DGI encoder (positive + corrupted passes) in one pallas_call."""
    w_stack, vec_stack = packed
    n, in_feats = feats_pos.shape
    num_layers = w_stack.shape[0]
    f_tot = w_stack.shape[-1]
    tn = min(tn, n)
    # TODO(synk): mask padded rows out of the BN statistics to support N % tn != 0.
    assert n % tn == 0 and tn % 8 == 0, "node count must tile evenly into row blocks"
    num_blocks = n // tn
    last = num_layers - 1

    # Lane-fused input: [:, :128] positive features, [:, 128:] corrupted features.
    h0 = jnp.zeros((n, f_tot), jnp.bfloat16)
    h0 = h0.at[:, :in_feats].set(feats_pos.astype(jnp.bfloat16))
    h0 = h0.at[:, F_PAD:F_PAD + in_feats].set(feats_neg.astype(jnp.bfloat16))

    # VMEM budget: adj row blocks (multi-buffered) + resident activations/scratch.
    est = (3 * tn * n * 2                       # adjacency row block, buffered, bf16
           + n * f_tot * (2 + 2 + 2 + 4)        # h0 + out + hw(bf16) + z(f32)
           + 2 * (f_tot * f_tot * 2 + 8 * f_tot * 4)   # W + vec blocks, double-buffered
           + 6 * f_tot * 4                      # BN stats / affine scratch
           + (4 << 20))                         # headroom for Mosaic internals
    # 48 MiB cap keeps v7x (64 MiB physical VMEM) happy; can be raised toward
    # ~100 MiB on the 128-MiB v5e/v6e parts for very large graphs.
    vmem_limit = int(min(max(est, 8 << 20), 48 << 20))

    out = pl.pallas_call(
        encoder_kernel,
        out_shape=jax.ShapeDtypeStruct((n, f_tot), jnp.bfloat16),
        grid_spec=pltpu.PrefetchScalarGridSpec(
            num_scalar_prefetch=0,
            grid=(num_layers, 3, num_blocks),
            in_specs=[
                # adjacency row block; only consumed in phase 0 -> map the other
                # phases to block 0 so the pipeline skips redundant re-fetches.
                pl.BlockSpec((tn, n),
                             lambda l, ph, r: (jnp.where(ph == 0, r, 0), 0)),
                # padded input features (resident; consumed once to build hw0)
                pl.BlockSpec((n, f_tot), lambda l, ph, r: (0, 0)),
                # per-layer weight: W_l, except phase 2 prefetches W_{l+1}
                pl.BlockSpec((1, f_tot, f_tot),
                             lambda l, ph, r: (
                                 jnp.where(ph == 2, jnp.minimum(l + 1, last), l), 0, 0)),
                # per-layer packed vectors [b, g1, be1, g2, be2, eps, 0, 0]
                pl.BlockSpec((1, 8, f_tot), lambda l, ph, r: (l, 0, 0)),
            ],
            out_specs=pl.BlockSpec((n, f_tot), lambda l, ph, r: (0, 0)),
            scratch_shapes=[
                pltpu.VMEM((n, f_tot), jnp.bfloat16),  # hw = h @ W (bf16 carrier)
                pltpu.VMEM((n, f_tot), jnp.float32),   # z / y (pre-BN activations)
                pltpu.VMEM((1, f_tot), jnp.float32),   # sum(z)
                pltpu.VMEM((1, f_tot), jnp.float32),   # sum(z^2)
                pltpu.VMEM((1, f_tot), jnp.float32),   # BN scale s = rsqrt(var+eps)*gamma
                pltpu.VMEM((1, f_tot), jnp.float32),   # BN shift t = beta - mean*s
            ]),
        compiler_params=pltpu.CompilerParams(
            # TODO(synk): split the row axis across both v7x TensorCores
            # ("parallel") with a cross-core BN-stats combine.
            dimension_semantics=("arbitrary", "arbitrary", "arbitrary"),
            vmem_limit_bytes=vmem_limit),
    )(adj_bf16, h0, w_stack, vec_stack)

    return out[:, :n_hidden], out[:, F_PAD:F_PAD + n_hidden]


def encoder_reference(adj, features, params):
    """Pure-JAX f32 reference (two-pass BN, original op order)."""
    h = features
    for (w, b, g1, b1, g2, b2, eps) in params:
        h_agg = (1.0 + eps[0, 0]) * h + adj @ h
        z = h_agg @ w + b
        m = jnp.mean(z, axis=0, keepdims=True)
        v = jnp.mean((z - m) ** 2, axis=0, keepdims=True)
        z = (z - m) * jax.lax.rsqrt(v + 1e-5) * g1 + b1
        z = jnp.maximum(z, 0.0)
        m = jnp.mean(z, axis=0, keepdims=True)
        v = jnp.mean((z - m) ** 2, axis=0, keepdims=True)
        z = (z - m) * jax.lax.rsqrt(v + 1e-5) * g2 + b2
        h = jnp.maximum(z, 0.0)
    return h


if __name__ == "__main__":
    key = jax.random.PRNGKey(0)
    N, in_feats, n_hidden, n_layers = 256, 32, 32, 2

    k_feat, k_adj, k_params, k_perm = jax.random.split(key, 4)
    features = jax.random.normal(k_feat, (N, in_feats), jnp.float32)

    # deterministic synthetic graph: symmetric, no self-loops, ~10% density
    a = (jax.random.uniform(k_adj, (N, N)) < 0.1).astype(jnp.float32)
    adj = jnp.maximum(a, a.T) * (1.0 - jnp.eye(N, dtype=jnp.float32))

    # DGI corruption = feature row permutation (plain-JAX glue)
    perm = jax.random.permutation(k_perm, N)
    feats_neg = features[perm]

    params = init_encoder_params(k_params, in_feats, n_hidden, n_layers)
    packed = pack_params(params)

    # Hoisted one-time cast (adjacency is exactly 0/1, so bf16 is bit-exact);
    # reused across every encoder call / training step.
    adj_bf16 = adj.astype(jnp.bfloat16)

    h_pos, h_neg = encoder_forward(adj_bf16, features, feats_neg, packed,
                                   n_hidden, tn=128)
    jax.block_until_ready((h_pos, h_neg))
    assert h_pos.shape == (N, n_hidden) and h_neg.shape == (N, n_hidden)

    ref_pos = encoder_reference(adj, features, params)
    ref_neg = encoder_reference(adj, feats_neg, params)
    err = max(float(jnp.max(jnp.abs(h_pos.astype(jnp.float32) - ref_pos))),
              float(jnp.max(jnp.abs(h_neg.astype(jnp.float32) - ref_neg))))
    assert bool(jnp.all(jnp.isfinite(h_pos))) and bool(jnp.all(jnp.isfinite(h_neg)))
    # generous tolerance: bf16 MXU operands / bf16 hw carrier across 3 layers
    assert err < 0.5, f"max abs error vs f32 reference too large: {err}"

    print("KERNEL_OK")
</pallas_src>

<mosaic_0001>
module attributes {stable_mosaic.version = 11 : i64} {
  func.func @encoder_kernel(%arg0: i32, %arg1: i32, %arg2: i32, %arg3: memref<128x256xbf16, #tpu.memory_space<vmem>>, %arg4: memref<256x256xbf16, #tpu.memory_space<vmem>>, %arg5: memref<1x256x256xbf16, #tpu.memory_space<vmem>>, %arg6: memref<1x8x256xf32, #tpu.memory_space<vmem>>, %arg7: memref<256x256xbf16, #tpu.memory_space<vmem>>, %arg8: memref<256x256xbf16, #tpu.memory_space<vmem>>, %arg9: memref<256x256xf32, #tpu.memory_space<vmem>>, %arg10: memref<1x256xf32, #tpu.memory_space<vmem>>, %arg11: memref<1x256xf32, #tpu.memory_space<vmem>>, %arg12: memref<1x256xf32, #tpu.memory_space<vmem>>, %arg13: memref<1x256xf32, #tpu.memory_space<vmem>>) attributes {dimension_semantics = [#tpu.dimension_semantics<arbitrary>, #tpu.dimension_semantics<arbitrary>, #tpu.dimension_semantics<arbitrary>], iteration_bounds = array<i64: 3, 3, 2>, scalar_prefetch = 0 : i64, scratch_operands = 6 : i64, tpu.core_type = #tpu.core_type<tc>, window_params = [{transform_indices = @transform_0, window_bounds = array<i64: 128, 256>}, {pipeline_mode = #tpu.pipeline_mode<synchronous>, transform_indices = @transform_1, window_bounds = array<i64: 256, 256>}, {transform_indices = @transform_2, window_bounds = array<i64: 1, 256, 256>}, {transform_indices = @transform_3, window_bounds = array<i64: 1, 8, 256>}, {pipeline_mode = #tpu.pipeline_mode<synchronous>, transform_indices = @transform_4, window_bounds = array<i64: 256, 256>}]} {
    %c128_i32 = arith.constant 128 : i32
    %0 = arith.muli %arg2, %c128_i32 : i32
    %1 = tpu.assume_multiple %0, 128 : i32
    %c0 = arith.constant 0 : index
    %c0_0 = arith.constant 0 : index
    %c0_1 = arith.constant 0 : index
    %2 = vector.load %arg6[%c0, %c0_0, %c0_1] : memref<1x8x256xf32, #tpu.memory_space<vmem>>, vector<1x8x256xf32>
    %3 = vector.shape_cast %2 : vector<1x8x256xf32> to vector<8x256xf32>
    %4 = vector.extract_strided_slice %3 {offsets = [0, 0], sizes = [1, 256], strides = [1, 1]} : vector<8x256xf32> to vector<1x256xf32>
    %5 = vector.extract_strided_slice %3 {offsets = [1, 0], sizes = [1, 256], strides = [1, 1]} : vector<8x256xf32> to vector<1x256xf32>
    %6 = vector.extract_strided_slice %3 {offsets = [2, 0], sizes = [1, 256], strides = [1, 1]} : vector<8x256xf32> to vector<1x256xf32>
    %7 = vector.extract_strided_slice %3 {offsets = [3, 0], sizes = [1, 256], strides = [1, 1]} : vector<8x256xf32> to vector<1x256xf32>
    %8 = vector.extract_strided_slice %3 {offsets = [4, 0], sizes = [1, 256], strides = [1, 1]} : vector<8x256xf32> to vector<1x256xf32>
    %9 = vector.extract_strided_slice %3 {offsets = [5, 0], sizes = [1, 256], strides = [1, 1]} : vector<8x256xf32> to vector<1x256xf32>
    %cst = arith.constant 1.000000e+00 : f32
    %10 = vector.broadcast %cst : f32 to vector<1x256xf32>
    %11 = arith.addf %10, %9 : vector<1x256xf32>
    %c0_i32 = arith.constant 0 : i32
    %12 = arith.cmpi eq, %arg0, %c0_i32 : i32
    %c0_i32_2 = arith.constant 0 : i32
    %13 = arith.cmpi eq, %arg1, %c0_i32_2 : i32
    %14 = arith.andi %12, %13 : i1
    %c0_i32_3 = arith.constant 0 : i32
    %15 = arith.cmpi eq, %arg2, %c0_i32_3 : i32
    %16 = arith.andi %14, %15 : i1
    %17 = arith.extui %16 : i1 to i32
    %c0_i32_4 = arith.constant 0 : i32
    %18 = arith.cmpi ne, %17, %c0_i32_4 : i32
    scf.if %18 {
      %c0_9 = arith.constant 0 : index
      %c0_10 = arith.constant 0 : index
      %28 = vector.load %arg4[%c0_9, %c0_10] : memref<256x256xbf16, #tpu.memory_space<vmem>>, vector<256x256xbf16>
      %c0_11 = arith.constant 0 : index
      %c0_12 = arith.constant 0 : index
      %c0_13 = arith.constant 0 : index
      %29 = vector.load %arg5[%c0_11, %c0_12, %c0_13] : memref<1x256x256xbf16, #tpu.memory_space<vmem>>, vector<1x256x256xbf16>
      %30 = vector.shape_cast %29 : vector<1x256x256xbf16> to vector<256x256xbf16>
      %cst_14 = arith.constant dense<0.000000e+00> : vector<256x256xf32>
      %31 = tpu.matmul %28, %30, %cst_14 {dimension_numbers = #tpu.dot_dimension_numbers<[1], [0], [0], [1], [0, 0, 1, 1], [], []>} : vector<256x256xbf16>, vector<256x256xbf16>, vector<256x256xf32> -> vector<256x256xf32>
      %32 = arith.truncf %31 : vector<256x256xf32> to vector<256x256xbf16>
      %c0_15 = arith.constant 0 : index
      %c0_16 = arith.constant 0 : index
      %33 = vector.load %arg8[%c0_15, %c0_16] : memref<256x256xbf16, #tpu.memory_space<vmem>>, vector<256x256xbf16>
      tpu.vector_store %arg8[%c0_15, %c0_16], %32 {strides = array<i32>} : memref<256x256xbf16, #tpu.memory_space<vmem>>, vector<256x256xbf16>,
    } else {
    }
    %c0_i32_5 = arith.constant 0 : i32
    %19 = arith.cmpi eq, %arg1, %c0_i32_5 : i32
    %20 = arith.extui %19 : i1 to i32
    %c0_i32_6 = arith.constant 0 : i32
    %21 = arith.cmpi ne, %20, %c0_i32_6 : i32
    scf.if %21 {
      %c0_i32_9 = arith.constant 0 : i32
      %28 = arith.cmpi eq, %arg2, %c0_i32_9 : i32
      %29 = arith.extui %28 : i1 to i32
      %c0_i32_10 = arith.constant 0 : i32
      %30 = arith.cmpi ne, %29, %c0_i32_10 : i32
      scf.if %30 {
        %cst_28 = arith.constant 0.000000e+00 : f32
        %55 = vector.broadcast %cst_28 : f32 to vector<1x256xf32>
        %c0_29 = arith.constant 0 : index
        %c0_30 = arith.constant 0 : index
        %56 = vector.load %arg10[%c0_29, %c0_30] : memref<1x256xf32, #tpu.memory_space<vmem>>, vector<1x256xf32>
        tpu.vector_store %arg10[%c0_29, %c0_30], %55 {strides = array<i32>} : memref<1x256xf32, #tpu.memory_space<vmem>>, vector<1x256xf32>,
        %cst_31 = arith.constant 0.000000e+00 : f32
        %57 = vector.broadcast %cst_31 : f32 to vector<1x256xf32>
        %c0_32 = arith.constant 0 : index
        %c0_33 = arith.constant 0 : index
        %58 = vector.load %arg11[%c0_32, %c0_33] : memref<1x256xf32, #tpu.memory_space<vmem>>, vector<1x256xf32>
        tpu.vector_store %arg11[%c0_32, %c0_33], %57 {strides = array<i32>} : memref<1x256xf32, #tpu.memory_space<vmem>>, vector<1x256xf32>,
      } else {
      }
      %31 = arith.index_cast %1 : i32 to index
      %c0_11 = arith.constant 0 : index
      %32 = vector.load %arg8[%31, %c0_11] : memref<256x256xbf16, #tpu.memory_space<vmem>>, vector<128x256xbf16>
      %33 = arith.extf %32 : vector<128x256xbf16> to vector<128x256xf32>
      %c0_12 = arith.constant 0 : index
      %c0_13 = arith.constant 0 : index
      %34 = vector.load %arg3[%c0_12, %c0_13] : memref<128x256xbf16, #tpu.memory_space<vmem>>, vector<128x256xbf16>
      %c0_14 = arith.constant 0 : index
      %c0_15 = arith.constant 0 : index
      %35 = vector.load %arg8[%c0_14, %c0_15] : memref<256x256xbf16, #tpu.memory_space<vmem>>, vector<256x256xbf16>
      %cst_16 = arith.constant dense<0.000000e+00> : vector<128x256xf32>
      %36 = tpu.matmul %34, %35, %cst_16 {dimension_numbers = #tpu.dot_dimension_numbers<[1], [0], [0], [1], [0, 0, 1, 1], [], []>} : vector<128x256xbf16>, vector<256x256xbf16>, vector<128x256xf32> -> vector<128x256xf32>
      %37 = vector.broadcast %11 : vector<1x256xf32> to vector<128x256xf32>
      %38 = arith.mulf %37, %33 : vector<128x256xf32>
      %39 = arith.addf %36, %38 : vector<128x256xf32>
      %40 = vector.broadcast %4 : vector<1x256xf32> to vector<128x256xf32>
      %41 = arith.addf %39, %40 : vector<128x256xf32>
      %42 = arith.index_cast %1 : i32 to index
      %c0_17 = arith.constant 0 : index
      %43 = vector.load %arg9[%42, %c0_17] : memref<256x256xf32, #tpu.memory_space<vmem>>, vector<128x256xf32>
      tpu.vector_store %arg9[%42, %c0_17], %41 {strides = array<i32>} : memref<256x256xf32, #tpu.memory_space<vmem>>, vector<128x256xf32>,
      %c0_18 = arith.constant 0 : index
      %c0_19 = arith.constant 0 : index
      %44 = vector.load %arg10[%c0_18, %c0_19] : memref<1x256xf32, #tpu.memory_space<vmem>>, vector<1x256xf32>
      %cst_20 = arith.constant dense<0.000000e+00> : vector<256xf32>
      %45 = vector.multi_reduction <add>, %41, %cst_20 [0] : vector<128x256xf32> to vector<256xf32>
      %46 = vector.shape_cast %45 : vector<256xf32> to vector<1x256xf32>
      %47 = arith.addf %44, %46 : vector<1x256xf32>
      %c0_21 = arith.constant 0 : index
      %c0_22 = arith.constant 0 : index
      %48 = vector.load %arg10[%c0_21, %c0_22] : memref<1x256xf32, #tpu.memory_space<vmem>>, vector<1x256xf32>
      tpu.vector_store %arg10[%c0_21, %c0_22], %47 {strides = array<i32>} : memref<1x256xf32, #tpu.memory_space<vmem>>, vector<1x256xf32>,
      %c0_23 = arith.constant 0 : index
      %c0_24 = arith.constant 0 : index
      %49 = vector.load %arg11[%c0_23, %c0_24] : memref<1x256xf32, #tpu.memory_space<vmem>>, vector<1x256xf32>
      %50 = arith.mulf %41, %41 : vector<128x256xf32>
      %cst_25 = arith.constant dense<0.000000e+00> : vector<256xf32>
      %51 = vector.multi_reduction <add>, %50, %cst_25 [0] : vector<128x256xf32> to vector<256xf32>
      %52 = vector.shape_cast %51 : vector<256xf32> to vector<1x256xf32>
      %53 = arith.addf %49, %52 : vector<1x256xf32>
      %c0_26 = arith.constant 0 : index
      %c0_27 = arith.constant 0 : index
      %54 = vector.load %arg11[%c0_26, %c0_27] : memref<1x256xf32, #tpu.memory_space<vmem>>, vector<1x256xf32>
      tpu.vector_store %arg11[%c0_26, %c0_27], %53 {strides = array<i32>} : memref<1x256xf32, #tpu.memory_space<vmem>>, vector<1x256xf32>,
    } else {
    }
    %c1_i32 = arith.constant 1 : i32
    %22 = arith.cmpi eq, %arg1, %c1_i32 : i32
    %23 = arith.extui %22 : i1 to i32
    %c0_i32_7 = arith.constant 0 : i32
    %24 = arith.cmpi ne, %23, %c0_i32_7 : i32
    scf.if %24 {
      %c0_i32_9 = arith.constant 0 : i32
      %28 = arith.cmpi eq, %arg2, %c0_i32_9 : i32
      %29 = arith.extui %28 : i1 to i32
      %c0_i32_10 = arith.constant 0 : i32
      %30 = arith.cmpi ne, %29, %c0_i32_10 : i32
      scf.if %30 {
        %c0_28 = arith.constant 0 : index
        %c0_29 = arith.constant 0 : index
        %54 = vector.load %arg10[%c0_28, %c0_29] : memref<1x256xf32, #tpu.memory_space<vmem>>, vector<1x256xf32>
        %cst_30 = arith.constant 3.906250e-03 : f32
        %55 = vector.broadcast %cst_30 : f32 to vector<1x256xf32>
        %56 = arith.mulf %54, %55 : vector<1x256xf32>
        %c0_31 = arith.constant 0 : index
        %c0_32 = arith.constant 0 : index
        %57 = vector.load %arg11[%c0_31, %c0_32] : memref<1x256xf32, #tpu.memory_space<vmem>>, vector<1x256xf32>
        %cst_33 = arith.constant 3.906250e-03 : f32
        %58 = vector.broadcast %cst_33 : f32 to vector<1x256xf32>
        %59 = arith.mulf %57, %58 : vector<1x256xf32>
        %60 = arith.mulf %56, %56 : vector<1x256xf32>
        %61 = arith.subf %59, %60 : vector<1x256xf32>
        %cst_34 = arith.constant 0.000000e+00 : f32
        %62 = vector.broadcast %cst_34 : f32 to vector<1x256xf32>
        %63 = arith.maximumf %61, %62 : vector<1x256xf32>
        %cst_35 = arith.constant 9.99999974E-6 : f32
        %64 = vector.broadcast %cst_35 : f32 to vector<1x256xf32>
        %65 = arith.addf %63, %64 : vector<1x256xf32>
        %66 = math.rsqrt %65 : vector<1x256xf32>
        %67 = arith.mulf %66, %5 : vector<1x256xf32>
        %c0_36 = arith.constant 0 : index
        %c0_37 = arith.constant 0 : index
        %68 = vector.load %arg12[%c0_36, %c0_37] : memref<1x256xf32, #tpu.memory_space<vmem>>, vector<1x256xf32>
        tpu.vector_store %arg12[%c0_36, %c0_37], %67 {strides = array<i32>} : memref<1x256xf32, #tpu.memory_space<vmem>>, vector<1x256xf32>,
        %69 = arith.mulf %56, %67 : vector<1x256xf32>
        %70 = arith.subf %6, %69 : vector<1x256xf32>
        %c0_38 = arith.constant 0 : index
        %c0_39 = arith.constant 0 : index
        %71 = vector.load %arg13[%c0_38, %c0_39] : memref<1x256xf32, #tpu.memory_space<vmem>>, vector<1x256xf32>
        tpu.vector_store %arg13[%c0_38, %c0_39], %70 {strides = array<i32>} : memref<1x256xf32, #tpu.memory_space<vmem>>, vector<1x256xf32>,
        %cst_40 = arith.constant 0.000000e+00 : f32
        %72 = vector.broadcast %cst_40 : f32 to vector<1x256xf32>
        %c0_41 = arith.constant 0 : index
        %c0_42 = arith.constant 0 : index
        %73 = vector.load %arg10[%c0_41, %c0_42] : memref<1x256xf32, #tpu.memory_space<vmem>>, vector<1x256xf32>
        tpu.vector_store %arg10[%c0_41, %c0_42], %72 {strides = array<i32>} : memref<1x256xf32, #tpu.memory_space<vmem>>, vector<1x256xf32>,
        %cst_43 = arith.constant 0.000000e+00 : f32
        %74 = vector.broadcast %cst_43 : f32 to vector<1x256xf32>
        %c0_44 = arith.constant 0 : index
        %c0_45 = arith.constant 0 : index
        %75 = vector.load %arg11[%c0_44, %c0_45] : memref<1x256xf32, #tpu.memory_space<vmem>>, vector<1x256xf32>
        tpu.vector_store %arg11[%c0_44, %c0_45], %74 {strides = array<i32>} : memref<1x256xf32, #tpu.memory_space<vmem>>, vector<1x256xf32>,
      } else {
      }
      %31 = arith.index_cast %1 : i32 to index
      %c0_11 = arith.constant 0 : index
      %32 = vector.load %arg9[%31, %c0_11] : memref<256x256xf32, #tpu.memory_space<vmem>>, vector<128x256xf32>
      %c0_12 = arith.constant 0 : index
      %c0_13 = arith.constant 0 : index
      %33 = vector.load %arg12[%c0_12, %c0_13] : memref<1x256xf32, #tpu.memory_space<vmem>>, vector<1x256xf32>
      %34 = vector.broadcast %33 : vector<1x256xf32> to vector<128x256xf32>
      %35 = arith.mulf %32, %34 : vector<128x256xf32>
      %c0_14 = arith.constant 0 : index
      %c0_15 = arith.constant 0 : index
      %36 = vector.load %arg13[%c0_14, %c0_15] : memref<1x256xf32, #tpu.memory_space<vmem>>, vector<1x256xf32>
      %37 = vector.broadcast %36 : vector<1x256xf32> to vector<128x256xf32>
      %38 = arith.addf %35, %37 : vector<128x256xf32>
      %cst_16 = arith.constant 0.000000e+00 : f32
      %39 = vector.broadcast %cst_16 : f32 to vector<128x256xf32>
      %40 = arith.maximumf %38, %39 : vector<128x256xf32>
      %41 = arith.index_cast %1 : i32 to index
      %c0_17 = arith.constant 0 : index
      %42 = vector.load %arg9[%41, %c0_17] : memref<256x256xf32, #tpu.memory_space<vmem>>, vector<128x256xf32>
      tpu.vector_store %arg9[%41, %c0_17], %40 {strides = array<i32>} : memref<256x256xf32, #tpu.memory_space<vmem>>, vector<128x256xf32>,
      %c0_18 = arith.constant 0 : index
      %c0_19 = arith.constant 0 : index
      %43 = vector.load %arg10[%c0_18, %c0_19] : memref<1x256xf32, #tpu.memory_space<vmem>>, vector<1x256xf32>
      %cst_20 = arith.constant dense<0.000000e+00> : vector<256xf32>
      %44 = vector.multi_reduction <add>, %40, %cst_20 [0] : vector<128x256xf32> to vector<256xf32>
      %45 = vector.shape_cast %44 : vector<256xf32> to vector<1x256xf32>
      %46 = arith.addf %43, %45 : vector<1x256xf32>
      %c0_21 = arith.constant 0 : index
      %c0_22 = arith.constant 0 : index
      %47 = vector.load %arg10[%c0_21, %c0_22] : memref<1x256xf32, #tpu.memory_space<vmem>>, vector<1x256xf32>
      tpu.vector_store %arg10[%c0_21, %c0_22], %46 {strides = array<i32>} : memref<1x256xf32, #tpu.memory_space<vmem>>, vector<1x256xf32>,
      %c0_23 = arith.constant 0 : index
      %c0_24 = arith.constant 0 : index
      %48 = vector.load %arg11[%c0_23, %c0_24] : memref<1x256xf32, #tpu.memory_space<vmem>>, vector<1x256xf32>
      %49 = arith.mulf %40, %40 : vector<128x256xf32>
      %cst_25 = arith.constant dense<0.000000e+00> : vector<256xf32>
      %50 = vector.multi_reduction <add>, %49, %cst_25 [0] : vector<128x256xf32> to vector<256xf32>
      %51 = vector.shape_cast %50 : vector<256xf32> to vector<1x256xf32>
      %52 = arith.addf %48, %51 : vector<1x256xf32>
      %c0_26 = arith.constant 0 : index
      %c0_27 = arith.constant 0 : index
      %53 = vector.load %arg11[%c0_26, %c0_27] : memref<1x256xf32, #tpu.memory_space<vmem>>, vector<1x256xf32>
      tpu.vector_store %arg11[%c0_26, %c0_27], %52 {strides = array<i32>} : memref<1x256xf32, #tpu.memory_space<vmem>>, vector<1x256xf32>,
    } else {
    }
    %c2_i32 = arith.constant 2 : i32
    %25 = arith.cmpi eq, %arg1, %c2_i32 : i32
    %26 = arith.extui %25 : i1 to i32
    %c0_i32_8 = arith.constant 0 : i32
    %27 = arith.cmpi ne, %26, %c0_i32_8 : i32
    scf.if %27 {
      %c0_i32_9 = arith.constant 0 : i32
      %28 = arith.cmpi eq, %arg2, %c0_i32_9 : i32
      %29 = arith.extui %28 : i1 to i32
      %c0_i32_10 = arith.constant 0 : i32
      %30 = arith.cmpi ne, %29, %c0_i32_10 : i32
      scf.if %30 {
        %c0_22 = arith.constant 0 : index
        %c0_23 = arith.constant 0 : index
        %49 = vector.load %arg10[%c0_22, %c0_23] : memref<1x256xf32, #tpu.memory_space<vmem>>, vector<1x256xf32>
        %cst_24 = arith.constant 3.906250e-03 : f32
        %50 = vector.broadcast %cst_24 : f32 to vector<1x256xf32>
        %51 = arith.mulf %49, %50 : vector<1x256xf32>
        %c0_25 = arith.constant 0 : index
        %c0_26 = arith.constant 0 : index
        %52 = vector.load %arg11[%c0_25, %c0_26] : memref<1x256xf32, #tpu.memory_space<vmem>>, vector<1x256xf32>
        %cst_27 = arith.constant 3.906250e-03 : f32
        %53 = vector.broadcast %cst_27 : f32 to vector<1x256xf32>
        %54 = arith.mulf %52, %53 : vector<1x256xf32>
        %55 = arith.mulf %51, %51 : vector<1x256xf32>
        %56 = arith.subf %54, %55 : vector<1x256xf32>
        %cst_28 = arith.constant 0.000000e+00 : f32
        %57 = vector.broadcast %cst_28 : f32 to vector<1x256xf32>
        %58 = arith.maximumf %56, %57 : vector<1x256xf32>
        %cst_29 = arith.constant 9.99999974E-6 : f32
        %59 = vector.broadcast %cst_29 : f32 to vector<1x256xf32>
        %60 = arith.addf %58, %59 : vector<1x256xf32>
        %61 = math.rsqrt %60 : vector<1x256xf32>
        %62 = arith.mulf %61, %7 : vector<1x256xf32>
        %c0_30 = arith.constant 0 : index
        %c0_31 = arith.constant 0 : index
        %63 = vector.load %arg12[%c0_30, %c0_31] : memref<1x256xf32, #tpu.memory_space<vmem>>, vector<1x256xf32>
        tpu.vector_store %arg12[%c0_30, %c0_31], %62 {strides = array<i32>} : memref<1x256xf32, #tpu.memory_space<vmem>>, vector<1x256xf32>,
        %64 = arith.mulf %51, %62 : vector<1x256xf32>
        %65 = arith.subf %8, %64 : vector<1x256xf32>
        %c0_32 = arith.constant 0 : index
        %c0_33 = arith.constant 0 : index
        %66 = vector.load %arg13[%c0_32, %c0_33] : memref<1x256xf32, #tpu.memory_space<vmem>>, vector<1x256xf32>
        tpu.vector_store %arg13[%c0_32, %c0_33], %65 {strides = array<i32>} : memref<1x256xf32, #tpu.memory_space<vmem>>, vector<1x256xf32>,
      } else {
      }
      %31 = arith.index_cast %1 : i32 to index
      %c0_11 = arith.constant 0 : index
      %32 = vector.load %arg9[%31, %c0_11] : memref<256x256xf32, #tpu.memory_space<vmem>>, vector<128x256xf32>
      %c0_12 = arith.constant 0 : index
      %c0_13 = arith.constant 0 : index
      %33 = vector.load %arg12[%c0_12, %c0_13] : memref<1x256xf32, #tpu.memory_space<vmem>>, vector<1x256xf32>
      %34 = vector.broadcast %33 : vector<1x256xf32> to vector<128x256xf32>
      %35 = arith.mulf %32, %34 : vector<128x256xf32>
      %c0_14 = arith.constant 0 : index
      %c0_15 = arith.constant 0 : index
      %36 = vector.load %arg13[%c0_14, %c0_15] : memref<1x256xf32, #tpu.memory_space<vmem>>, vector<1x256xf32>
      %37 = vector.broadcast %36 : vector<1x256xf32> to vector<128x256xf32>
      %38 = arith.addf %35, %37 : vector<128x256xf32>
      %cst_16 = arith.constant 0.000000e+00 : f32
      %39 = vector.broadcast %cst_16 : f32 to vector<128x256xf32>
      %40 = arith.maximumf %38, %39 : vector<128x256xf32>
      %c1_i32_17 = arith.constant 1 : i32
      %41 = arith.addi %arg0, %c1_i32_17 : i32
      %c3_i32 = arith.constant 3 : i32
      %42 = arith.cmpi slt, %41, %c3_i32 : i32
      %43 = arith.extui %42 : i1 to i32
      %c0_i32_18 = arith.constant 0 : i32
      %44 = arith.cmpi ne, %43, %c0_i32_18 : i32
      scf.if %44 {
        %49 = arith.truncf %40 : vector<128x256xf32> to vector<128x256xbf16>
        %c0_22 = arith.constant 0 : index
        %c0_23 = arith.constant 0 : index
        %c0_24 = arith.constant 0 : index
        %50 = vector.load %arg5[%c0_22, %c0_23, %c0_24] : memref<1x256x256xbf16, #tpu.memory_space<vmem>>, vector<1x256x256xbf16>
        %51 = vector.shape_cast %50 : vector<1x256x256xbf16> to vector<256x256xbf16>
        %cst_25 = arith.constant dense<0.000000e+00> : vector<128x256xf32>
        %52 = tpu.matmul %49, %51, %cst_25 {dimension_numbers = #tpu.dot_dimension_numbers<[1], [0], [0], [1], [0, 0, 1, 1], [], []>} : vector<128x256xbf16>, vector<256x256xbf16>, vector<128x256xf32> -> vector<128x256xf32>
        %53 = arith.truncf %52 : vector<128x256xf32> to vector<128x256xbf16>
        %54 = arith.index_cast %1 : i32 to index
        %c0_26 = arith.constant 0 : index
        %55 = vector.load %arg8[%54, %c0_26] : memref<256x256xbf16, #tpu.memory_space<vmem>>, vector<128x256xbf16>
        tpu.vector_store %arg8[%54, %c0_26], %53 {strides = array<i32>} : memref<256x256xbf16, #tpu.memory_space<vmem>>, vector<128x256xbf16>,
      } else {
      }
      %c1_i32_19 = arith.constant 1 : i32
      %45 = arith.addi %arg0, %c1_i32_19 : i32
      %c3_i32_20 = arith.constant 3 : i32
      %46 = arith.cmpi eq, %45, %c3_i32_20 : i32
      %47 = arith.extui %46 : i1 to i32
      %c0_i32_21 = arith.constant 0 : i32
      %48 = arith.cmpi ne, %47, %c0_i32_21 : i32
      scf.if %48 {
        %49 = arith.truncf %40 : vector<128x256xf32> to vector<128x256xbf16>
        %50 = arith.index_cast %1 : i32 to index
        %c0_22 = arith.constant 0 : index
        %51 = vector.load %arg7[%50, %c0_22] : memref<256x256xbf16, #tpu.memory_space<vmem>>, vector<128x256xbf16>
        tpu.vector_store %arg7[%50, %c0_22], %49 {strides = array<i32>} : memref<256x256xbf16, #tpu.memory_space<vmem>>, vector<128x256xbf16>,
      } else {
      }
    } else {
    }
    return
  }
  func.func @transform_0(%arg0: i32, %arg1: i32, %arg2: i32) -> (i32, i32) {
    %c0_i32 = arith.constant 0 : i32
    %0 = arith.cmpi eq, %arg1, %c0_i32 : i32
    %c0_i32_0 = arith.constant 0 : i32
    %1 = arith.select %0, %arg2, %c0_i32_0 : i32
    %c0_i32_1 = arith.constant 0 : i32
    %c0_i32_2 = arith.constant 0 : i32
    return %1, %c0_i32_1 : i32, i32
  }
  func.func @transform_1(%arg0: i32, %arg1: i32, %arg2: i32) -> (i32, i32) {
    %c0_i32 = arith.constant 0 : i32
    %c0_i32_0 = arith.constant 0 : i32
    %c0_i32_1 = arith.constant 0 : i32
    return %c0_i32, %c0_i32_0 : i32, i32
  }
  func.func @transform_2(%arg0: i32, %arg1: i32, %arg2: i32) -> (i32, i32, i32) {
    %c2_i32 = arith.constant 2 : i32
    %0 = arith.cmpi eq, %arg1, %c2_i32 : i32
    %c1_i32 = arith.constant 1 : i32
    %1 = arith.addi %arg0, %c1_i32 : i32
    %c2_i32_0 = arith.constant 2 : i32
    %2 = arith.minsi %1, %c2_i32_0 : i32
    %3 = arith.select %0, %2, %arg0 : i32
    %c0_i32 = arith.constant 0 : i32
    %c0_i32_1 = arith.constant 0 : i32
    %c0_i32_2 = arith.constant 0 : i32
    return %3, %c0_i32, %c0_i32_1 : i32, i32, i32
  }
  func.func @transform_3(%arg0: i32, %arg1: i32, %arg2: i32) -> (i32, i32, i32) {
    %c0_i32 = arith.constant 0 : i32
    %c0_i32_0 = arith.constant 0 : i32
    %c0_i32_1 = arith.constant 0 : i32
    return %arg0, %c0_i32, %c0_i32_0 : i32, i32, i32
  }
  func.func @transform_4(%arg0: i32, %arg1: i32, %arg2: i32) -> (i32, i32) {
    %c0_i32 = arith.constant 0 : i32
    %c0_i32_0 = arith.constant 0 : i32
    %c0_i32_1 = arith.constant 0 : i32
    return %c0_i32, %c0_i32_0 : i32, i32
  }
}

</mosaic_0001>

<bundles_post_ra>
// kernel: tpu_custom_call.1
= control target key start
LH: loop header
LB: loop body
LE: loop exit
PB: predicated region body
PF: predicated region fallthrough
CT: control target
= control target key end

     0   :  { %s5169_s0 = inlined_call_operand.hbm [shape: bf16[256,256], index: 0, kind: input, shape index: {}]   ;;  %s5170_s1 = inlined_call_operand.hbm [shape: bf16[256,256], index: 1, kind: input, shape index: {}]   ;;  %s5171_s2 = inlined_call_operand.hbm [shape: bf16[3,256,256], index: 2, kind: input, shape index: {}]   ;;  %s5172_s3 = inlined_call_operand.hbm [shape: f32[3,8,256], index: 3, kind: input, shape index: {}]   ;;  %s5173_s4 = inlined_call_operand.hbm [shape: bf16[256,256], index: 4, kind: output, shape index: {}]  }
   0x1   :  { %5204 = sst [smem:[#allocation30_spill]] %s5169_s0 }
   0x2   :  { %5205 = sst [smem:[#allocation31_spill]] %s5171_s2 }
   0x3   :  { %5206 = sst [smem:[#allocation32_spill]] %s5172_s3 }
   0x4   :  { %5207 = sst [smem:[#allocation33_spill]] %s5173_s4 }
   0x5   :  { %9 = vsyncpa [#allocation9], 0 }
   0x6   :  { %11 = vsyncpa [#allocation9 + $0x1], 0 }
   0x7   :  { %12 = vsyncpa [#allocation12], 0 }
   0x8   :  { %13 = vsyncpa [#allocation10], 0  ;;  %s3830_s15 = smov 0   ;;  %s3832_s16 = smov 0  }
   0x9   :  { %s3834_s17 = smov 0   ;;  %s3836_s18 = smov 0  }
   0xa   :  { %s3838_s19 = smov 0   ;;  %s3840_s20 = smov 0  }
   0xb   :  { %s3842_s21 = smov 0   ;;  %s3844_s22 = smov 0  }
   0xc   :  { %s3846_s23 = smov 0   ;;  %s3848_s24 = smov 0  }
   0xd   :  { %s3850_s25 = smov 0   ;;  %s3852_s26 = smov 0  }
   0xe   :  { %s3854_s27 = smov 0   ;;  %s3856_s28 = smov 0  }
   0xf   :  { %s3858_s29 = smov 0   ;;  %s3860_s30 = smov 0  }
  0x10 LB: > { %5208 = sst [smem:[#allocation21_spill]] %s3728_s15  ;;  %s31_s5 = sadd.s32 1, %s3776_s27  ;;  %s3788_s30 = sphi %s3860_s30, %s19_s30   ;;  %s3784_s29 = sphi %s3858_s29, %s5305_s29   ;;  %s3780_s28 = sphi %s3856_s28, %s5304_s28   ;;  %s3776_s27 = sphi %s3854_s27, %s5291_s27   ;;  %s3772_s26 = sphi %s3852_s26, %s5303_s26   ;;  %s3768_s25 = sphi %s3850_s25, %s5302_s25   ;;  %s3764_s24 = sphi %s3848_s24, %s5290_s24   ;;  %s3760_s23 = sphi %s3846_s23, %s5301_s23   ;;  %s3756_s22 = sphi %s3844_s22, %s5300_s22   ;;  %s3752_s21 = sphi %s3842_s21, %s5299_s21   ;;  %s3748_s20 = sphi %s3840_s20, %s5298_s20   ;;  %s3744_s19 = sphi %s3838_s19, %s5297_s19   ;;  %s3740_s18 = sphi %s3836_s18, %s5296_s18   ;;  %s3736_s17 = sphi %s3834_s17, %s5295_s17   ;;  %s3732_s16 = sphi %s3832_s16, %s5294_s16   ;;  %s3728_s15 = sphi %s3830_s15, %s5289_s15  }
  0x11   : > { %5209 = sst [smem:[#allocation22_spill]] %s3732_s16  ;;  %s34_s6 = sadd.s32 1, %s3780_s28 }
  0x12   : > { %5210 = sst [smem:[#allocation23_spill]] %s3764_s24  ;;  %p32_p0 = scmp.ge.s32.totalorder %s31_s5, 2 }
  0x13   : > { %5211 = sst [smem:[#allocation24_spill]] %s3768_s25  ;;  %p42_p1 = scmp.eq.s32.totalorder %s3780_s28, 0 }
  0x14   : > { %5212 = sst [smem:[#allocation25_spill]] %s3772_s26  ;;  %s49_s7 = sadd.s32 1, %s3760_s23 }
  0x15   : > { %5213 = sst [smem:[#allocation26_spill]] %s3776_s27  ;;  %p56_p2 = scmp.ne.s32.totalorder %s3760_s23, %s3756_s22 }
  0x16   : > { %s5307_s5 = smov (%p32_p0, %s31_s5), 0  ;;  %s5309_s6 = smov (!%p32_p0, %s34_s6), %s3780_s28 }
  0x17   : > { %5214 = sst [smem:[#allocation27_spill]] %s5307_s5  ;;  %p36_p3 = scmp.ge.s32.totalorder %s5309_s6, 3 }
  0x18   : > { %s43_s8 = scalar_select %p42_p1, %s3776_s27, 0 }
  0x19   : > { %p5181_p4 = scmp.eq.s32.totalorder %s3788_s30, 0  ;;  %p5180_p9 = scmp.lt.s32.totalorder %s3788_s30, 18 }
  0x1a   : > { %s3929_s9 = scalar_select %p36_p3, 0, %s5309_s6  }
  0x1b   : > { %p3933_p6 = por %p5181_p4, %p56_p2  ;;  %s203_s12 = sand.u32 1, %s3788_s30  }
  0x1c   : > { %5215 = sst [smem:[#allocation28_spill]] %s3929_s9  ;;  %p44_p7 = scmp.eq.s32.totalorder %s3929_s9, 0 }
  0x1d   : > { %s205_s13 = sand.u32 1, %s3760_s23   ;;  %s3032_s4 = sshll.u32 %s43_s8, 11 }
  0x1e   : > { %s45_s11 = scalar_select %p44_p7, %s5307_s5, 0 }
  0x1f   : > { %s2864_s27 = sshll.u32 %s205_s13, 7  ;;  %s5217_s0 = sld [smem:[#allocation30_spill]] }
  0x20   : > { %s46_s14 = ssub.s32 %s43_s8, %s45_s11  ;;  %s207_s15 = scalar_lea.vmem [#allocation8], %s2864_s27 }
  0x21   : > { %p47_p10 = scmp.eq.s32.totalorder %s46_s14, 0  ;;  %s217_s16 = sshll.u32 %s207_s15, 4  ;;  %s3951_s16 = int_to_ptr.vmem [resolvable:$true] %s217_s16 }
  0x22   : > { %p3957_p11 = pnand %p5180_p9, %p3933_p6 }
  0x23   : > { %s3944_s25 = scalar_select %p47_p10, %s3760_s23, %s49_s7  }
  0x24   : > { %s3961_s7 = scalar_lea.sflag [#allocation9], %s203_s12  ;;  %p3500_p13 = pneg %p3957_p11 }
  0x25   : > { %s3949_s3 = scalar_lea.hbm %s5217_s0, %s3032_s4  ;;  %s3503_s26 = scalar_lea.hbm %s5217_s0, 4096 }
  0x26   : > { %s3498_s4 = scalar_lea.hbm %s3949_s3, 2048  ;;  %p3504_p2 = scmp.lt.u32.totalorder %s3949_s3, %s5217_s0 }
  0x27   : > { %p3499_p12 = scmp.ne.s32.totalorder %s3949_s3, %s3498_s4  ;;  %p3505_p6 = scmp.lt.u32.totalorder %s3503_s26, %s3498_s4 }
  0x28   : > { %p3507_p10 = scmp.lt.u32.totalorder %s3498_s4, %s3949_s3 }
  0x29   : > { %p3501_p0 = pnand %p3500_p13, %p3499_p12  ;;  %p3506_p7 = por %p3505_p6, %p3504_p2 }
  0x2b   : > { %p3502_p1 = pneg %p3501_p0  ;;  %p3508_p5 = por %p3507_p10, %p3506_p7 }
  0x2d   : > { %p3509_p9 = pnand %p3508_p5, %p3502_p1 }
  0x2f   : > { %3512 = shalt.err (!%p3509_p9)
}
  0x30   : > { %s3513_s10 = scalar_lea.vmem %s3951_s16, 2048  ;;  %s3790_s12 = smov [#allocation8]  }
  0x31   : > { %p3514_p12 = scmp.ne.s32.totalorder %s3951_s16, %s3513_s10  ;;  %s3518_s13 = sshll.u32 %s3790_s12, 4  ;;  %s3519_s13 = int_to_ptr.vmem [resolvable:$false] %s3518_s13 }
  0x32   : > { %s3520_s14 = scalar_lea.vmem %s3519_s13, 4096  ;;  %p3521_p4 = scmp.lt.s32.totalorder %s3951_s16, %s3519_s13 }
  0x33   : > { %p3516_p0 = pnand %p3514_p12, %p3500_p13  ;;  %p3522_p2 = scmp.lt.s32.totalorder %s3520_s14, %s3513_s10 }
  0x35   : > { %p3517_p8 = pneg %p3516_p0  ;;  %p3523_p6 = por %p3522_p2, %p3521_p4 }
  0x37   : > { %p3524_p7 = pnand %p3523_p6, %p3517_p8 }
  0x39   : > { %3527 = shalt.err (!%p3524_p7)
}
  0x3a   : > { %s5182_s4 = smov 128   ;;  %s5184_s15 = smov 8  }
  0x3b   : > { %3174 = dma.hbm_to_vmem [thread:$0]  (!%p3957_p11), %s3949_s3, 2048, %s3951_s16, %s3961_s7, %s5182_s4, %s5182_s4, %s5184_s15  }
  0x3c   : > { %s38_s24 = sadd.s32 1, %s3784_s29  ;;  %p93_p4 = scmp.eq.s32.totalorder %s3780_s28, 2 }
  0x3d   : > { %s39_s26 = scalar_select %p36_p3, %s38_s24, %s3784_s29 }
  0x3e   : > { %p95_p5 = scmp.lt.s32.totalorder %s38_s24, 2  ;;  %s106_s27 = sadd.s32 1, %s3748_s20 }
  0x3f   : > { %p40_p8 = scmp.ge.s32.totalorder %s39_s26, 3  ;;  %p113_p9 = scmp.ne.s32.totalorder %s3748_s20, %s3744_s19 }
  0x40   : > { %s5311_s24 = smov (!%p95_p5, %s38_s24), 2  ;;  %p119_p11 = scmp.ne.s32.totalorder %s3744_s19, %s3740_s18 }
  0x41   : > { %s5313_s26 = smov (%p40_p8, %s39_s26), 0  ;;  %s5315_s24 = smov (!%p93_p4, %s5311_s24), %s3784_s29 }
  0x42   : > { %5219 = sst [smem:[#allocation29_spill]] %s5313_s26  ;;  %s99_s11 = sadd.s32 1, %s5313_s26 }
  0x43   : > { %p100_p13 = scmp.lt.s32.totalorder %s99_s11, 2  ;;  %p5220_p1 = scmp.eq.s32.totalorder %s3788_s30, 0 }
  0x44   : > { %s229_s3 = sand.u32 1, %s3748_s20   ;;  %s3033_s6 = sshll.u32 %s5315_s24, 12 }
  0x45   : > { %p115_p10 = por %p113_p9, %p5220_p1  ;;  %s5317_s11 = smov (!%p100_p13, %s99_s11), 2 }
  0x46   : > { %s2868_s16 = sshll.u32 %s229_s3, 8  ;;  %p5221_p3 = scmp.eq.s32.totalorder %s3929_s9, 2 }
  0x47   : > { %s5222_s2 = sld [smem:[#allocation31_spill]]  ;;  %s231_s14 = scalar_lea.vmem [#allocation13], %s2868_s16 }
  0x48   : > { %s5319_s11 = smov (!%p5221_p3, %s5317_s11), %s5313_s26  ;;  %s243_s4 = sshll.u32 %s231_s14, 4  ;;  %s4017_s4 = int_to_ptr.vmem [resolvable:$true] %s243_s4 }
  0x49   : > { %s103_s13 = ssub.s32 %s5315_s24, %s5319_s11  ;;  %p5223_p0 = scmp.lt.s32.totalorder %s3788_s30, 18 }
  0x4a   : > { %p104_p12 = scmp.eq.s32.totalorder %s103_s13, 0 }
  0x4b   : > { %p4021_p2 = pnand %p5223_p0, %p115_p10 }
  0x4c   : > { %s4026_s8 = scalar_select %p104_p12, %s3748_s20, %s106_s27  }
  0x4d   : > { %s4015_s12 = scalar_lea.hbm %s5222_s2, %s3033_s6  ;;  %p3530_p7 = pneg %p4021_p2 }
  0x4e   : > { %s3528_s6 = scalar_lea.hbm %s4015_s12, 4096  ;;  %s3533_s16 = scalar_lea.hbm %s5222_s2, 12288 }
  0x4f   : > { %p3529_p6 = scmp.ne.s32.totalorder %s4015_s12, %s3528_s6  ;;  %p3534_p8 = scmp.lt.u32.totalorder %s4015_s12, %s5222_s2 }
  0x50   : > { %p3535_p9 = scmp.lt.u32.totalorder %s3533_s16, %s3528_s6  ;;  %p3537_p1 = scmp.lt.u32.totalorder %s3528_s6, %s4015_s12 }
  0x51   : > { %p3531_p4 = pnand %p3530_p7, %p3529_p6 }
  0x52   : > { %p3536_p13 = por %p3535_p9, %p3534_p8 }
  0x53   : > { %p3532_p5 = pneg %p3531_p4 }
  0x54   : > { %p3538_p10 = por %p3537_p1, %p3536_p13 }
  0x56   : > { %p3539_p3 = pnand %p3538_p10, %p3532_p5 }
  0x58   : > { %3542 = shalt.err (!%p3539_p3)
}
  0x59   : > { %s3543_s27 = scalar_lea.vmem %s4017_s4, 4096  ;;  %s3793_s14 = smov [#allocation13]  }
  0x5a   : > { %p3544_p12 = scmp.ne.s32.totalorder %s4017_s4, %s3543_s27  ;;  %s3548_s24 = sshll.u32 %s3793_s14, 4  ;;  %s3549_s24 = int_to_ptr.vmem [resolvable:$false] %s3548_s24 }
  0x5b   : > { %s3550_s11 = scalar_lea.vmem %s3549_s24, 8192  ;;  %p3551_p4 = scmp.lt.s32.totalorder %s4017_s4, %s3549_s24 }
  0x5c   : > { %p3546_p0 = pnand %p3544_p12, %p3530_p7  ;;  %p3552_p8 = scmp.lt.s32.totalorder %s3550_s11, %s3543_s27 }
  0x5e   : > { %p3547_p6 = pneg %p3546_p0  ;;  %p3553_p9 = por %p3552_p8, %p3551_p4 }
  0x60   : > { %p3554_p13 = pnand %p3553_p9, %p3547_p6 }
  0x62   : > { %3557 = shalt.err (!%p3554_p13)
}
  0x63   : > { %s5225_s6 = smov 128   ;;  %s4058_s16 = sadd.s32 4294967295, %s3788_s30  }
  0x64   : > { %3177 = dma.hbm_to_vmem [thread:$0]  (!%p4021_p2), %s4015_s12, 4096, %s4017_s4, %s3961_s7, %s5225_s6, %s5225_s6, %s5184_s15  }
  0x65   : > { %p2861_p7 = scmp.ge.s32.totalorder %s3788_s30, 1  ;;  %p5185_p5 = scmp.eq.s32.totalorder %s4058_s16, 0 }
  0x66   : > { %p177_p1 = scmp.lt.s32.totalorder %s3788_s30, 19  ;;  %p5226_p10 = scmp.ne.s32.totalorder %s3756_s22, %s3752_s21 }
  0x67   : > { %p4077_p12 = por %p119_p11, %p5185_p5  ;;  %s3794_s12 = smov [#allocation11]  }
  0x68   : > { %p4068_p3 = por %p5185_p5, %p5226_p10  ;;  %p4081_p2 = pnand %p2861_p7, %p177_p1 }
  0x69   : > { %s5228_s10 = scalar_select %p4077_p12, 1, 0 }
  0x6a   : > { %s5227_s3 = scalar_select %p4068_p3, 1, 0 }
  0x6b   : > { %s5229_s4 = scalar_select %p4081_p2, 1, 0 }
  0x6c   : > { %s189_s13 = sshll.u32 %s3794_s12, 4  ;;  %p3167_p0 = pneg %p4081_p2  ;;  %s190_s13 = int_to_ptr.vmem [resolvable:$true] %s189_s13 }
  0x6d   : > { %s129_s18 = ssub.s32 %s3784_s29, %s5313_s26  ;;  %s3558_s11 = scalar_lea.hbm %s5170_s1, 4096 }
  0x6e   : > { %p4089_p6 = pnand %p3167_p0, %p5185_p5  ;;  %p4095_p11 = scmp.eq.s32.totalorder %s129_s18, 0 }
  0x6f   : > { %p3559_p4 = scmp.ne.s32.totalorder %s5170_s1, %s3558_s11  ;;  %p3565_p7 = scmp.lt.u32.totalorder %s3558_s11, %s5170_s1 }
  0x70   : > { %s5231_s27 = scalar_select %p4095_p11, 1, 0 }
  0x71   : > { %p3560_p8 = pneg %p4089_p6 }
  0x73   : > { %p3561_p9 = pnand %p3560_p8, %p3559_p4 }
  0x75   : > { %p3562_p13 = pneg %p3561_p9 }
  0x77   : > { %p3567_p1 = pnand %p3565_p7, %p3562_p13 }
  0x79   : > { %3570 = shalt.err (!%p3567_p1)
}
  0x7a   : > { %s3571_s18 = scalar_lea.vmem %s190_s13, 4096  ;;  %p3579_p12 = scmp.lt.s32.totalorder %s190_s13, %s190_s13 }
  0x7b   : > { %p3572_p10 = scmp.ne.s32.totalorder %s190_s13, %s3571_s18  ;;  %p3580_p3 = scmp.lt.s32.totalorder %s3571_s18, %s3571_s18 }
  0x7d   : > { %p3574_p0 = pnand %p3572_p10, %p3560_p8  ;;  %p3581_p2 = por %p3580_p3, %p3579_p12 }
  0x7f   : > { %p3575_p5 = pneg %p3574_p0 }
  0x81   : > { %p3582_p11 = pnand %p3581_p2, %p3575_p5 }
  0x83   : > { %3585 = shalt.err (!%p3582_p11)
}
  0x84   : > { %s5232_s15 = smov 8   ;;  %s5233_s0 = sld [smem:[#allocation22_spill]] }
  0x85   : > { %s5234_s2 = sld [smem:[#allocation21_spill]]  ;;  %s132_s21 = sadd.s32 1, %s3736_s17 }
  0x86   : > { %3170 = dma.hbm_to_vmem [thread:$0]  (!%p4089_p6), %s5170_s1, 4096, %s190_s13, [#allocation12], %s5225_s6, %s5225_s6, %s5232_s15  }
  0x87   : > { %p5235_p3 = scmp.ne.s32.totalorder %s5231_s27, 0  ;;  %p5236_p12 = scmp.eq.s32.totalorder %s3788_s30, 0 }
  0x88   : > { %s255_s12 = sand.u32 1, %s3736_s17   ;;  %s3034_s18 = sshll.u32 %s3784_s29, 8 }
  0x89   : > { %s4124_s11 = scalar_select %p5235_p3, %s3736_s17, %s132_s21  }
  0x8a   : > { %p139_p5 = scmp.ne.s32.totalorder %s3736_s17, %s5233_s0  ;;  %p5237_p4 = scmp.eq.s32.totalorder %s4058_s16, 0 }
  0x8b   : > { %p145_p11 = scmp.ne.s32.totalorder %s5233_s0, %s5234_s2  ;;  %s2871_s24 = sshll.u32 %s255_s12, 4 }
  0x8c   : > { %p141_p2 = por %p139_p5, %p5236_p12  ;;  %s5239_s5 = sld [smem:[#allocation32_spill]] }
  0x8d   : > { %p4134_p8 = por %p145_p11, %p5237_p4  ;;  %s257_s13 = scalar_lea.vmem [#allocation14], %s2871_s24 }
  0x8e   : > { %s265_s27 = sshll.u32 %s257_s13, 4  ;;  %p5240_p6 = scmp.lt.s32.totalorder %s3788_s30, 18  ;;  %s266_s27 = int_to_ptr.vmem [resolvable:$true] %s265_s27 }
  0x8f   : > { %s5238_s14 = scalar_select %p4134_p8, 1, 0 }
  0x90   : > { %p4145_p9 = pnand %p5240_p6, %p141_p2 }
  0x92   : > { %s4141_s6 = scalar_lea.hbm %s5239_s5, %s3034_s18  ;;  %p3588_p7 = pneg %p4145_p9 }
  0x93   : > { %s3586_s0 = scalar_lea.hbm %s4141_s6, 256  ;;  %s3591_s2 = scalar_lea.hbm %s5239_s5, 768 }
  0x94   : > { %p3587_p13 = scmp.ne.s32.totalorder %s4141_s6, %s3586_s0  ;;  %p3592_p0 = scmp.lt.u32.totalorder %s4141_s6, %s5239_s5 }
  0x95   : > { %p3593_p5 = scmp.lt.u32.totalorder %s3591_s2, %s3586_s0  ;;  %p3595_p12 = scmp.lt.u32.totalorder %s3586_s0, %s4141_s6 }
  0x96   : > { %p3589_p1 = pnand %p3588_p7, %p3587_p13 }
  0x97   : > { %p3594_p3 = por %p3593_p5, %p3592_p0 }
  0x98   : > { %p3590_p10 = pneg %p3589_p1 }
  0x99   : > { %p3596_p2 = por %p3595_p12, %p3594_p3 }
  0x9b   : > { %p3597_p11 = pnand %p3596_p2, %p3590_p10 }
  0x9d   : > { %3600 = shalt.err (!%p3597_p11)
}
  0x9e   : > { %s3601_s18 = scalar_lea.vmem %s266_s27, 256  ;;  %s3795_s24 = smov [#allocation14]  }
  0x9f   : > { %p3602_p4 = scmp.ne.s32.totalorder %s266_s27, %s3601_s18  ;;  %s3606_s13 = sshll.u32 %s3795_s24, 4  ;;  %s3607_s13 = int_to_ptr.vmem [resolvable:$false] %s3606_s13 }
  0xa0   : > { %s3608_s9 = scalar_lea.vmem %s3607_s13, 512  ;;  %p3609_p1 = scmp.lt.s32.totalorder %s266_s27, %s3607_s13 }
  0xa1   : > { %p3604_p6 = pnand %p3602_p4, %p3588_p7  ;;  %p3610_p8 = scmp.lt.s32.totalorder %s3608_s9, %s3601_s18 }
  0xa3   : > { %p3605_p13 = pneg %p3604_p6  ;;  %p3611_p0 = por %p3610_p8, %p3609_p1 }
  0xa5   : > { %p3612_p5 = pnand %p3611_p0, %p3605_p13 }
  0xa7   : > { %3615 = shalt.err (!%p3612_p5)
}
  0xa8   : > { %3180 = dma.hbm_to_vmem [thread:$0]  (!%p4145_p9), %s4141_s6, 256, %s266_s27, %s3961_s7  }
  0xa9   : > { %p5242_p10 = scmp.ne.s32.totalorder %s5229_s4, 0 }
  0xaa   : > { %s276_s0 = sand.u32 (!%p5242_p10), 1, %s4058_s16   ;;  %s278_s26 = sand.u32 (!%p5242_p10), 1, %s3756_s22  }
  0xab   : > { %274 = sbr.rel (%p5242_p10) target bundleno = 1483 (0x5cb), region = 36  ;;  %s2875_s2 = sshll.u32 (!%p5242_p10), %s278_s26, 7 }
  0xac   : > { %s277_s21 = scalar_lea.sflag (!%p5242_p10), [#allocation9], %s276_s0  ;;  %s4175_s12 = scalar_lea.vmem (!%p5242_p10), [#allocation8], %s2875_s2 }
  0xad   : > { %p5243_p8 = scmp.ne.s32.totalorder (!%p5242_p10), %s5227_s3, 0 }
  0xb2   : > { %3707 = dma.done.wait (%p5243_p8), %s277_s21, 2048  }
  0xb3   : > { %3709 = vsyncadd (%p5243_p8), %s277_s21, 4294965248  ;;  %p5244_p7 = scmp.eq.s32.totalorder %s4058_s16, 0 }
  0xb5   : > { %3711 = dma.done.wait (%p5244_p7), [#allocation12], 4096   ;;  %p5245_p9 = pmov %p5244_p7 }
  0xb6   : > { %s291_s7 = sand.u32 1, %s3744_s19   ;;  %p5246_p3 = scmp.ne.s32.totalorder %s5228_s10, 0 }
  0xb7   : > { %3713 = vsyncadd (%p5245_p9), [#allocation12], 4294963200  ;;  %s2877_s4 = sshll.u32 %s291_s7, 8 }
  0xb8   : > { %s4186_s6 = scalar_lea.vmem [#allocation13], %s2877_s4 }
  0xb9   : > { %3715 = dma.done.wait (%p5246_p3), %s277_s21, 4096  }
  0xba   : > { %3717 = vsyncadd (%p5246_p3), %s277_s21, 4294963200  ;;  %s5247_s27 = sld [smem:[#allocation22_spill]]  ;;  %p5248_p12 = scmp.ne.s32.totalorder %s5238_s14, 0 }
  0xc0   : > { %s300_s3 = sand.u32 1, %s5247_s27  }
  0xc1   : > { %s2878_s15 = sshll.u32 %s300_s3, 4 }
  0xc2   : > { %s302_s18 = scalar_lea.vmem [#allocation14], %s2878_s15 }
  0xc3   : > { %3719 = dma.done.wait (%p5248_p12), %s277_s21, 256  }
  0xc4   : > { %3721 = vsyncadd (%p5248_p12), %s277_s21, 4294967040  ;;  %s5249_s24 = sld [smem:[#allocation23_spill]]  ;;  %s5250_s13 = sld [smem:[#allocation25_spill]]  ;;  %v4203_v0 = vld [vmem:[%s302_s18] sm:$0xff]  ;;  %v4205_v1 = vld [vmem:[%s302_s18 + $0x8] sm:$0xff] }
  0xc5   : > { %s5251_s9 = sld [smem:[#allocation24_spill]]  ;;  %v4208_v2 = vadd.f32 1.0, %v4203_v0  ;;  %v4211_v3 = vadd.f32 1.0, %v4205_v1 }
  0xca   : > { %s4198_s0 = sshll.u32 %s5249_s24, 7  ;;  %p345_p2 = scmp.eq.s32.totalorder %s5250_s13, 0 }
  0xcb   : > { %p346_p11 = scmp.eq.s32.totalorder %s5251_s9, 0  ;;  %p349_p6 = scmp.eq.s32.totalorder %s5249_s24, 0 }
  0xcd   : > { %p347_p4 = pnand %p346_p11, %p345_p2 }
  0xcf   : > { %p348_p13 = pneg %p347_p4 }
  0xd1   : > { %p350_p1 = pnand %p349_p6, %p348_p13 }
  0xd2   : > { %v3326_v4 = vld [vmem:[%s4186_s6 + $0x4] ss:$8 sps:$4 sm:$0xff] (!%p350_p1)   ;;  %v3328_v5 = vld [vmem:[%s4186_s6] ss:$8 sps:$4 sm:$0xff] (!%p350_p1)   ;;  %v3329_v6 = vld [vmem:[%s4186_s6 + $0x14] ss:$8 sps:$4 sm:$0xff] (!%p350_p1)  }
  0xd3   : > { %353 = sbr.rel (%p350_p1) target bundleno = 549 (0x225), region = 56  ;;  %738 = vmatprep.subr.bf16.mxu0 (!%p350_p1), %v3326_v4  ;;  %3057 = vmatprep.subr.bf16.mxu1 (!%p350_p1), %v3326_v4  ;;  %v3331_v7 = vld [vmem:[%s4186_s6 + $0x10] ss:$8 sps:$4 sm:$0xff] (!%p350_p1)   ;;  %v3332_v8 = vld [vmem:[%s4186_s6 + $0x24] ss:$8 sps:$4 sm:$0xff] (!%p350_p1)  }
  0xd4   : > { %739 = vmatpush1.bf16.msra.mxu0 (!%p350_p1), %v3328_v5  ;;  %3073 = vmatpush1.bf16.msra.mxu1 (!%p350_p1), %v3328_v5  ;;  %v3334_v9 = vld [vmem:[%s4186_s6 + $0x20] ss:$8 sps:$4 sm:$0xff] (!%p350_p1)   ;;  %v3335_v10 = vld [vmem:[%s4186_s6 + $0x34] ss:$8 sps:$4 sm:$0xff] (!%p350_p1)   ;;  %v3337_v11 = vld [vmem:[%s4186_s6 + $0x30] ss:$8 sps:$4 sm:$0xff] (!%p350_p1)  }
  0xd5   : > { %740 = vmatprep.subr.bf16.mxu0 (!%p350_p1), %v3329_v6  ;;  %3058 = vmatprep.subr.bf16.mxu1 (!%p350_p1), %v3329_v6  ;;  %v3338_v12 = vld [vmem:[%s4186_s6 + $0x44] ss:$8 sps:$4 sm:$0xff] (!%p350_p1)   ;;  %v3340_v13 = vld [vmem:[%s4186_s6 + $0x40] ss:$8 sps:$4 sm:$0xff] (!%p350_p1)   ;;  %v3341_v14 = vld [vmem:[%s4186_s6 + $0x54] ss:$8 sps:$4 sm:$0xff] (!%p350_p1)  }
  0xd6   : > { %v3343_v15 = vld [vmem:[%s4186_s6 + $0x50] ss:$8 sps:$4 sm:$0xff] (!%p350_p1)   ;;  %v3344_v16 = vld [vmem:[%s4186_s6 + $0x64] ss:$8 sps:$4 sm:$0xff] (!%p350_p1)   ;;  %v3346_v18 = vld [vmem:[%s4186_s6 + $0x60] ss:$8 sps:$4 sm:$0xff] (!%p350_p1)  }
  0xd7   : > { %v3376_v17 = vld [vmem:[#allocation11 + $0x4] ss:$8 sps:$4 sm:$0xff] (!%p350_p1)   ;;  %v3347_v20 = vld [vmem:[%s4186_s6 + $0x74] ss:$8 sps:$4 sm:$0xff] (!%p350_p1)   ;;  %v3349_v21 = vld [vmem:[%s4186_s6 + $0x70] ss:$8 sps:$4 sm:$0xff] (!%p350_p1)  }
  0xd8   : > { %741 = vmatpush1.bf16.msra.mxu0 (!%p350_p1), %v3331_v7  ;;  %3074 = vmatpush1.bf16.msra.mxu1 (!%p350_p1), %v3331_v7  ;;  %v3379_v19 = vld [vmem:[#allocation11 + $0x84] ss:$8 sps:$4 sm:$0xff] (!%p350_p1)   ;;  %v3352_v23 = vld [vmem:[%s4186_s6 + $0x80] ss:$8 sps:$4 sm:$0xff] (!%p350_p1)   ;;  %v3353_v24 = vld [vmem:[%s4186_s6 + $0x94] ss:$8 sps:$4 sm:$0xff] (!%p350_p1)  }
  0xd9   : > { %742 = vmatprep.subr.bf16.mxu0 (!%p350_p1), %v3332_v8  ;;  %3059 = vmatprep.subr.bf16.mxu1 (!%p350_p1), %v3332_v8  ;;  %v3350_v22 = vld [vmem:[%s4186_s6 + $0x84] ss:$8 sps:$4 sm:$0xff] (!%p350_p1)   ;;  %v3355_v25 = vld [vmem:[%s4186_s6 + $0x90] ss:$8 sps:$4 sm:$0xff] (!%p350_p1)   ;;  %v3358_v27 = vld [vmem:[%s4186_s6 + $0xa0] ss:$8 sps:$4 sm:$0xff] (!%p350_p1)  }
  0xda   : > { %770 = vmatprep.mubr.bf16.mxu0 %v3376_v17  ;;  %850 = vmatprep.mubr.bf16.mxu1 %v3379_v19  ;;  %v3356_v26 = vld [vmem:[%s4186_s6 + $0xa4] ss:$8 sps:$4 sm:$0xff]   ;;  %v3359_v28 = vld [vmem:[%s4186_s6 + $0xb4] ss:$8 sps:$4 sm:$0xff]   ;;  %v3361_v29 = vld [vmem:[%s4186_s6 + $0xb0] ss:$8 sps:$4 sm:$0xff]  }
  0xdb   : > { %v3362_v30 = vld [vmem:[%s4186_s6 + $0xc4] ss:$8 sps:$4 sm:$0xff]   ;;  %v3364_v31 = vld [vmem:[%s4186_s6 + $0xc0] ss:$8 sps:$4 sm:$0xff]   ;;  %v3365_v32 = vld [vmem:[%s4186_s6 + $0xd4] ss:$8 sps:$4 sm:$0xff]  }
  0xdc   : > { %743 = vmatpush1.bf16.msra.mxu0 %v3334_v9  ;;  %3075 = vmatpush1.bf16.msra.mxu1 %v3334_v9  ;;  %v3367_v33 = vld [vmem:[%s4186_s6 + $0xd0] ss:$8 sps:$4 sm:$0xff]   ;;  %v3368_v34 = vld [vmem:[%s4186_s6 + $0xe4] ss:$8 sps:$4 sm:$0xff]   ;;  %v3370_v35 = vld [vmem:[%s4186_s6 + $0xe0] ss:$8 sps:$4 sm:$0xff]  }
  0xdd   : > { %744 = vmatprep.subr.bf16.mxu0 %v3335_v10  ;;  %3060 = vmatprep.subr.bf16.mxu1 %v3335_v10  ;;  %v3371_v36 = vld [vmem:[%s4186_s6 + $0xf4] ss:$8 sps:$4 sm:$0xff]   ;;  %v3373_v37 = vld [vmem:[%s4186_s6 + $0xf0] ss:$8 sps:$4 sm:$0xff]   ;;  %v3374_v38 = vld [vmem:[#allocation11] ss:$8 sps:$4 sm:$0xff]  }
  0xde   : > { %v3377_v39 = vld [vmem:[#allocation11 + $0x80] ss:$8 sps:$4 sm:$0xff]   ;;  %v3380_v40 = vld [vmem:[#allocation11 + $0x14] ss:$8 sps:$4 sm:$0xff]   ;;  %v3384_v42 = vld [vmem:[#allocation11 + $0x10] ss:$8 sps:$4 sm:$0xff]  }
  0xdf   : > { %v3382_v41 = vld [vmem:[#allocation11 + $0x94] ss:$8 sps:$4 sm:$0xff]   ;;  %v3385_v43 = vld [vmem:[#allocation11 + $0x90] ss:$8 sps:$4 sm:$0xff]   ;;  %v3386_v44 = vld [vmem:[#allocation11 + $0x24] ss:$8 sps:$4 sm:$0xff]  }
  0xe0   : > { %745 = vmatpush1.bf16.msra.mxu0 %v3337_v11  ;;  %3076 = vmatpush1.bf16.msra.mxu1 %v3337_v11  ;;  %v3388_v45 = vld [vmem:[#allocation11 + $0xa4] ss:$8 sps:$4 sm:$0xff]   ;;  %v3390_v46 = vld [vmem:[#allocation11 + $0x20] ss:$8 sps:$4 sm:$0xff]   ;;  %v3392_v48 = vld [vmem:[#allocation11 + $0x34] ss:$8 sps:$4 sm:$0xff]  }
  0xe1   : > { %746 = vmatprep.subr.bf16.mxu0 %v3338_v12  ;;  %3061 = vmatprep.subr.bf16.mxu1 %v3338_v12  ;;  %v3391_v47 = vld [vmem:[#allocation11 + $0xa0] ss:$8 sps:$4 sm:$0xff]   ;;  %v3394_v49 = vld [vmem:[#allocation11 + $0xb4] ss:$8 sps:$4 sm:$0xff]   ;;  %v3396_v50 = vld [vmem:[#allocation11 + $0x30] ss:$8 sps:$4 sm:$0xff]  }
  0xe2   : > { %v3397_v51 = vld [vmem:[#allocation11 + $0xb0] ss:$8 sps:$4 sm:$0xff]   ;;  %v3398_v52 = vld [vmem:[#allocation11 + $0x44] ss:$8 sps:$4 sm:$0xff]   ;;  %v3402_v54 = vld [vmem:[#allocation11 + $0x40] ss:$8 sps:$4 sm:$0xff]  }
  0xe3   : > { %v3400_v53 = vld [vmem:[#allocation11 + $0xc4] ss:$8 sps:$4 sm:$0xff]   ;;  %v3403_v55 = vld [vmem:[#allocation11 + $0xc0] ss:$8 sps:$4 sm:$0xff]   ;;  %v3404_v56 = vld [vmem:[#allocation11 + $0x54] ss:$8 sps:$4 sm:$0xff]  }
  0xe4   : > { %747 = vmatpush1.bf16.msra.mxu0 %v3340_v13  ;;  %3077 = vmatpush1.bf16.msra.mxu1 %v3340_v13  ;;  %v3406_v57 = vld [vmem:[#allocation11 + $0xd4] ss:$8 sps:$4 sm:$0xff]   ;;  %v3408_v58 = vld [vmem:[#allocation11 + $0x50] ss:$8 sps:$4 sm:$0xff]   ;;  %v3410_v60 = vld [vmem:[#allocation11 + $0x64] ss:$8 sps:$4 sm:$0xff]  }
  0xe5   : > { %748 = vmatprep.subr.bf16.mxu0 %v3341_v14  ;;  %3062 = vmatprep.subr.bf16.mxu1 %v3341_v14  ;;  %v3409_v59 = vld [vmem:[#allocation11 + $0xd0] ss:$8 sps:$4 sm:$0xff]   ;;  %v3412_v61 = vld [vmem:[#allocation11 + $0xe4] ss:$8 sps:$4 sm:$0xff]   ;;  %v3414_v62 = vld [vmem:[#allocation11 + $0x60] ss:$8 sps:$4 sm:$0xff]  }
  0xe6   : > { %v3415_v63 = vld [vmem:[#allocation11 + $0xe0] ss:$8 sps:$4 sm:$0xff]   ;;  %v3416_v4 = vld [vmem:[#allocation11 + $0x74] ss:$8 sps:$4 sm:$0xff]   ;;  %v3420_v6 = vld [vmem:[#allocation11 + $0x70] ss:$8 sps:$4 sm:$0xff]  }
  0xe7   : > { %v3418_v5 = vld [vmem:[#allocation11 + $0xf4] ss:$8 sps:$4 sm:$0xff]   ;;  %v3421_v7 = vld [vmem:[#allocation11 + $0xf0] ss:$8 sps:$4 sm:$0xff]  }
  0xe8   : > { %749 = vmatpush1.bf16.msra.mxu0 %v3343_v15  ;;  %3078 = vmatpush1.bf16.msra.mxu1 %v3343_v15 }
  0xe9   : > { %750 = vmatprep.subr.bf16.mxu0 %v3344_v16  ;;  %3063 = vmatprep.subr.bf16.mxu1 %v3344_v16 }
  0xec   : > { %751 = vmatpush1.bf16.msra.mxu0 %v3346_v18  ;;  %3079 = vmatpush1.bf16.msra.mxu1 %v3346_v18 }
  0xed   : > { %752 = vmatprep.subr.bf16.mxu0 %v3347_v20  ;;  %3064 = vmatprep.subr.bf16.mxu1 %v3347_v20 }
  0xf0   : > { %753 = vmatpush1.bf16.msra.mxu0 %v3349_v21  ;;  %3080 = vmatpush1.bf16.msra.mxu1 %v3349_v21 }
  0xf1   : > { %754 = vmatprep.subr.bf16.mxu0 %v3350_v22  ;;  %3065 = vmatprep.subr.bf16.mxu1 %v3350_v22 }
  0xf4   : > { %755 = vmatpush1.bf16.msra.mxu0 %v3352_v23  ;;  %3081 = vmatpush1.bf16.msra.mxu1 %v3352_v23 }
  0xf5   : > { %756 = vmatprep.subr.bf16.mxu0 %v3353_v24  ;;  %3066 = vmatprep.subr.bf16.mxu1 %v3353_v24 }
  0xf8   : > { %757 = vmatpush1.bf16.msra.mxu0 %v3355_v25  ;;  %3082 = vmatpush1.bf16.msra.mxu1 %v3355_v25 }
  0xf9   : > { %758 = vmatprep.subr.bf16.mxu0 %v3356_v26  ;;  %3067 = vmatprep.subr.bf16.mxu1 %v3356_v26 }
  0xfc   : > { %759 = vmatpush1.bf16.msra.mxu0 %v3358_v27  ;;  %3083 = vmatpush1.bf16.msra.mxu1 %v3358_v27 }
  0xfd   : > { %760 = vmatprep.subr.bf16.mxu0 %v3359_v28  ;;  %3068 = vmatprep.subr.bf16.mxu1 %v3359_v28 }
 0x100   : > { %761 = vmatpush1.bf16.msra.mxu0 %v3361_v29  ;;  %3084 = vmatpush1.bf16.msra.mxu1 %v3361_v29 }
 0x101   : > { %762 = vmatprep.subr.bf16.mxu0 %v3362_v30  ;;  %3069 = vmatprep.subr.bf16.mxu1 %v3362_v30 }
 0x104   : > { %763 = vmatpush1.bf16.msra.mxu0 %v3364_v31  ;;  %3085 = vmatpush1.bf16.msra.mxu1 %v3364_v31 }
 0x105   : > { %764 = vmatprep.subr.bf16.mxu0 %v3365_v32  ;;  %3070 = vmatprep.subr.bf16.mxu1 %v3365_v32 }
 0x108   : > { %765 = vmatpush1.bf16.msra.mxu0 %v3367_v33  ;;  %3086 = vmatpush1.bf16.msra.mxu1 %v3367_v33 }
 0x109   : > { %766 = vmatprep.subr.bf16.mxu0 %v3368_v34  ;;  %3071 = vmatprep.subr.bf16.mxu1 %v3368_v34 }
 0x10c   : > { %767 = vmatpush1.bf16.msra.mxu0 %v3370_v35  ;;  %3087 = vmatpush1.bf16.msra.mxu1 %v3370_v35 }
 0x10d   : > { %768 = vmatprep.subr.bf16.mxu0 %v3371_v36  ;;  %3072 = vmatprep.subr.bf16.mxu1 %v3371_v36 }
 0x110   : > { %769 = vmatpush1.bf16.msra.mxu0 %v3373_v37  ;;  %3088 = vmatpush1.bf16.msra.mxu1 %v3373_v37 }
 0x113   : > { %771 = vmatmul.mubr.bf16.vlgmr.msra.gmra.mrb[0].mxu0 %v3374_v38  ;;  %851 = vmatmul.mubr.bf16.vlgmr.msra.gmra.mrb[0].mxu1 %v3377_v39 }
 0x114   : > { %780 = vmatprep.mubr.bf16.mxu0 %v3380_v40  ;;  %860 = vmatprep.mubr.bf16.mxu1 %v3382_v41 }
 0x11b   : > { %781 = vmatmul.mubr.bf16.gmra.mrb[4].mxu0 %v3384_v42  ;;  %861 = vmatmul.mubr.bf16.gmra.mrb[4].mxu1 %v3385_v43 }
 0x11c   : > { %790 = vmatprep.mubr.bf16.mxu0 %v3386_v44  ;;  %870 = vmatprep.mubr.bf16.mxu1 %v3388_v45 }
 0x123   : > { %791 = vmatmul.mubr.bf16.gmra.mrb[8].mxu0 %v3390_v46  ;;  %871 = vmatmul.mubr.bf16.gmra.mrb[8].mxu1 %v3391_v47 }
 0x124   : > { %800 = vmatprep.mubr.bf16.mxu0 %v3392_v48  ;;  %880 = vmatprep.mubr.bf16.mxu1 %v3394_v49 }
 0x12b   : > { %801 = vmatmul.mubr.bf16.gmra.mrb[12].mxu0 %v3396_v50  ;;  %881 = vmatmul.mubr.bf16.gmra.mrb[12].mxu1 %v3397_v51 }
 0x12c   : > { %810 = vmatprep.mubr.bf16.mxu0 %v3398_v52  ;;  %890 = vmatprep.mubr.bf16.mxu1 %v3400_v53 }
 0x133   : > { %811 = vmatmul.mubr.bf16.gmra.mrb[16].mxu0 %v3402_v54  ;;  %891 = vmatmul.mubr.bf16.gmra.mrb[16].mxu1 %v3403_v55 }
 0x134   : > { %820 = vmatprep.mubr.bf16.mxu0 %v3404_v56  ;;  %900 = vmatprep.mubr.bf16.mxu1 %v3406_v57 }
 0x13b   : > { %821 = vmatmul.mubr.bf16.gmra.mrb[20].mxu0 %v3408_v58  ;;  %901 = vmatmul.mubr.bf16.gmra.mrb[20].mxu1 %v3409_v59 }
 0x13c   : > { %830 = vmatprep.mubr.bf16.mxu0 %v3410_v60  ;;  %910 = vmatprep.mubr.bf16.mxu1 %v3412_v61 }
 0x143   : > { %831 = vmatmul.mubr.bf16.gmra.mrb[24].mxu0 %v3414_v62  ;;  %911 = vmatmul.mubr.bf16.gmra.mrb[24].mxu1 %v3415_v63 }
 0x144   : > { %840 = vmatprep.mubr.bf16.mxu0 %v3416_v4  ;;  %920 = vmatprep.mubr.bf16.mxu1 %v3418_v5 }
 0x14b   : > { %841 = vmatmul.mubr.bf16.gmra.mrb[28].mxu0 %v3420_v6  ;;  %921 = vmatmul.mubr.bf16.gmra.mrb[28].mxu1 %v3421_v7 }
 0x1e6   : > { %v772_v8 = vpop.f32.mrb[0].mxu0  ;;  %v852_v9 = vpop.f32.mrb[0].mxu1 }
 0x1e7   : > { %v774_v10 = vpop.f32.mrb[1].mxu0  ;;  %v854_v11 = vpop.f32.mrb[1].mxu1 }
 0x1e8   : > { %v776_v12 = vpop.f32.mrb[2].mxu0  ;;  %v856_v13 = vpop.f32.mrb[2].mxu1 }
 0x1e9   : > { %v931_v14 = vpack.c.bf16 %v776_v12, %v772_v8  ;;  %v947_v15 = vpack.c.bf16 %v856_v13, %v852_v9  ;;  %v778_v16 = vpop.f32.mrb[3].mxu0  ;;  %v858_v17 = vpop.f32.mrb[3].mxu1 }
 0x1ea   : > { %v932_v18 = vpack.c.bf16 %v778_v16, %v774_v10  ;;  %v948_v19 = vpack.c.bf16 %v858_v17, %v854_v11 }
 0x1eb   : > { %963 = vst [vmem:[#allocation2] sm:$0xff] %v931_v14  ;;  %979 = vst [vmem:[#allocation2 + $0x80] sm:$0xff] %v947_v15 }
 0x1ec   : > { %964 = vst [vmem:[#allocation2 + $0x8] sm:$0xff] %v932_v18  ;;  %980 = vst [vmem:[#allocation2 + $0x88] sm:$0xff] %v948_v19 }
 0x1ee   : > { %v782_v20 = vpop.f32.mrb[4].mxu0  ;;  %v862_v21 = vpop.f32.mrb[4].mxu1 }
 0x1ef   : > { %v784_v22 = vpop.f32.mrb[5].mxu0  ;;  %v864_v23 = vpop.f32.mrb[5].mxu1 }
 0x1f0   : > { %v786_v24 = vpop.f32.mrb[6].mxu0  ;;  %v866_v25 = vpop.f32.mrb[6].mxu1 }
 0x1f1   : > { %v933_v26 = vpack.c.bf16 %v786_v24, %v782_v20  ;;  %v949_v27 = vpack.c.bf16 %v866_v25, %v862_v21  ;;  %v788_v28 = vpop.f32.mrb[7].mxu0  ;;  %v868_v29 = vpop.f32.mrb[7].mxu1 }
 0x1f2   : > { %v934_v30 = vpack.c.bf16 %v788_v28, %v784_v22  ;;  %v950_v31 = vpack.c.bf16 %v868_v29, %v864_v23 }
 0x1f3   : > { %965 = vst [vmem:[#allocation2 + $0x10] sm:$0xff] %v933_v26  ;;  %981 = vst [vmem:[#allocation2 + $0x90] sm:$0xff] %v949_v27 }
 0x1f4   : > { %966 = vst [vmem:[#allocation2 + $0x18] sm:$0xff] %v934_v30  ;;  %982 = vst [vmem:[#allocation2 + $0x98] sm:$0xff] %v950_v31 }
 0x1f6   : > { %v792_v32 = vpop.f32.mrb[8].mxu0  ;;  %v872_v33 = vpop.f32.mrb[8].mxu1 }
 0x1f7   : > { %v794_v34 = vpop.f32.mrb[9].mxu0  ;;  %v874_v35 = vpop.f32.mrb[9].mxu1 }
 0x1f8   : > { %v796_v36 = vpop.f32.mrb[10].mxu0  ;;  %v876_v37 = vpop.f32.mrb[10].mxu1 }
 0x1f9   : > { %v935_v38 = vpack.c.bf16 %v796_v36, %v792_v32  ;;  %v951_v39 = vpack.c.bf16 %v876_v37, %v872_v33  ;;  %v798_v40 = vpop.f32.mrb[11].mxu0  ;;  %v878_v41 = vpop.f32.mrb[11].mxu1 }
 0x1fa   : > { %v936_v42 = vpack.c.bf16 %v798_v40, %v794_v34  ;;  %v952_v43 = vpack.c.bf16 %v878_v41, %v874_v35 }
 0x1fb   : > { %967 = vst [vmem:[#allocation2 + $0x20] sm:$0xff] %v935_v38  ;;  %983 = vst [vmem:[#allocation2 + $0xa0] sm:$0xff] %v951_v39 }
 0x1fc   : > { %968 = vst [vmem:[#allocation2 + $0x28] sm:$0xff] %v936_v42  ;;  %984 = vst [vmem:[#allocation2 + $0xa8] sm:$0xff] %v952_v43 }
 0x1fe   : > { %v802_v44 = vpop.f32.mrb[12].mxu0  ;;  %v882_v45 = vpop.f32.mrb[12].mxu1 }
 0x1ff   : > { %v804_v46 = vpop.f32.mrb[13].mxu0  ;;  %v884_v47 = vpop.f32.mrb[13].mxu1 }
 0x200   : > { %v806_v48 = vpop.f32.mrb[14].mxu0  ;;  %v886_v49 = vpop.f32.mrb[14].mxu1 }
 0x201   : > { %v937_v50 = vpack.c.bf16 %v806_v48, %v802_v44  ;;  %v953_v51 = vpack.c.bf16 %v886_v49, %v882_v45  ;;  %v808_v52 = vpop.f32.mrb[15].mxu0  ;;  %v888_v53 = vpop.f32.mrb[15].mxu1 }
 0x202   : > { %v938_v54 = vpack.c.bf16 %v808_v52, %v804_v46  ;;  %v954_v55 = vpack.c.bf16 %v888_v53, %v884_v47 }
 0x203   : > { %969 = vst [vmem:[#allocation2 + $0x30] sm:$0xff] %v937_v50  ;;  %985 = vst [vmem:[#allocation2 + $0xb0] sm:$0xff] %v953_v51 }
 0x204   : > { %970 = vst [vmem:[#allocation2 + $0x38] sm:$0xff] %v938_v54  ;;  %986 = vst [vmem:[#allocation2 + $0xb8] sm:$0xff] %v954_v55 }
 0x206   : > { %v812_v56 = vpop.f32.mrb[16].mxu0  ;;  %v892_v57 = vpop.f32.mrb[16].mxu1 }
 0x207   : > { %v814_v58 = vpop.f32.mrb[17].mxu0  ;;  %v894_v59 = vpop.f32.mrb[17].mxu1 }
 0x208   : > { %v816_v60 = vpop.f32.mrb[18].mxu0  ;;  %v896_v61 = vpop.f32.mrb[18].mxu1 }
 0x209   : > { %v939_v62 = vpack.c.bf16 %v816_v60, %v812_v56  ;;  %v955_v63 = vpack.c.bf16 %v896_v61, %v892_v57  ;;  %v818_v4 = vpop.f32.mrb[19].mxu0  ;;  %v898_v5 = vpop.f32.mrb[19].mxu1 }
 0x20a   : > { %v940_v6 = vpack.c.bf16 %v818_v4, %v814_v58  ;;  %v956_v7 = vpack.c.bf16 %v898_v5, %v894_v59 }
 0x20b   : > { %971 = vst [vmem:[#allocation2 + $0x40] sm:$0xff] %v939_v62  ;;  %987 = vst [vmem:[#allocation2 + $0xc0] sm:$0xff] %v955_v63 }
 0x20c   : > { %972 = vst [vmem:[#allocation2 + $0x48] sm:$0xff] %v940_v6  ;;  %988 = vst [vmem:[#allocation2 + $0xc8] sm:$0xff] %v956_v7 }
 0x20e   : > { %v822_v8 = vpop.f32.mrb[20].mxu0  ;;  %v902_v9 = vpop.f32.mrb[20].mxu1 }
 0x20f   : > { %v824_v10 = vpop.f32.mrb[21].mxu0  ;;  %v904_v11 = vpop.f32.mrb[21].mxu1 }
 0x210   : > { %v826_v12 = vpop.f32.mrb[22].mxu0  ;;  %v906_v13 = vpop.f32.mrb[22].mxu1 }
 0x211   : > { %v941_v14 = vpack.c.bf16 %v826_v12, %v822_v8  ;;  %v957_v15 = vpack.c.bf16 %v906_v13, %v902_v9  ;;  %v828_v16 = vpop.f32.mrb[23].mxu0  ;;  %v908_v17 = vpop.f32.mrb[23].mxu1 }
 0x212   : > { %v942_v18 = vpack.c.bf16 %v828_v16, %v824_v10  ;;  %v958_v19 = vpack.c.bf16 %v908_v17, %v904_v11 }
 0x213   : > { %973 = vst [vmem:[#allocation2 + $0x50] sm:$0xff] %v941_v14  ;;  %989 = vst [vmem:[#allocation2 + $0xd0] sm:$0xff] %v957_v15 }
 0x214   : > { %974 = vst [vmem:[#allocation2 + $0x58] sm:$0xff] %v942_v18  ;;  %990 = vst [vmem:[#allocation2 + $0xd8] sm:$0xff] %v958_v19 }
 0x216   : > { %v832_v20 = vpop.f32.mrb[24].mxu0  ;;  %v912_v21 = vpop.f32.mrb[24].mxu1 }
 0x217   : > { %v834_v22 = vpop.f32.mrb[25].mxu0  ;;  %v914_v23 = vpop.f32.mrb[25].mxu1 }
 0x218   : > { %v836_v24 = vpop.f32.mrb[26].mxu0  ;;  %v916_v25 = vpop.f32.mrb[26].mxu1 }
 0x219   : > { %v943_v26 = vpack.c.bf16 %v836_v24, %v832_v20  ;;  %v959_v27 = vpack.c.bf16 %v916_v25, %v912_v21  ;;  %v838_v28 = vpop.f32.mrb[27].mxu0  ;;  %v918_v29 = vpop.f32.mrb[27].mxu1 }
 0x21a   : > { %v944_v30 = vpack.c.bf16 %v838_v28, %v834_v22  ;;  %v960_v31 = vpack.c.bf16 %v918_v29, %v914_v23 }
 0x21b   : > { %975 = vst [vmem:[#allocation2 + $0x60] sm:$0xff] %v943_v26  ;;  %991 = vst [vmem:[#allocation2 + $0xe0] sm:$0xff] %v959_v27 }
 0x21c   : > { %976 = vst [vmem:[#allocation2 + $0x68] sm:$0xff] %v944_v30  ;;  %992 = vst [vmem:[#allocation2 + $0xe8] sm:$0xff] %v960_v31 }
 0x21e   : > { %v842_v32 = vpop.f32.mrb[28].mxu0  ;;  %v922_v33 = vpop.f32.mrb[28].mxu1 }
 0x21f   : > { %v844_v34 = vpop.f32.mrb[29].mxu0  ;;  %v924_v35 = vpop.f32.mrb[29].mxu1 }
 0x220   : > { %v846_v36 = vpop.f32.mrb[30].mxu0  ;;  %v926_v37 = vpop.f32.mrb[30].mxu1 }
 0x221   : > { %v945_v38 = vpack.c.bf16 %v846_v36, %v842_v32  ;;  %v961_v39 = vpack.c.bf16 %v926_v37, %v922_v33  ;;  %v848_v40 = vpop.f32.mrb[31].mxu0  ;;  %v928_v41 = vpop.f32.mrb[31].mxu1 }
 0x222   : > { %v946_v42 = vpack.c.bf16 %v848_v40, %v844_v34  ;;  %v962_v43 = vpack.c.bf16 %v928_v41, %v924_v35 }
 0x223   : > { %977 = vst [vmem:[#allocation2 + $0x70] sm:$0xff] %v945_v38  ;;  %993 = vst [vmem:[#allocation2 + $0xf0] sm:$0xff] %v961_v39 }
 0x224   : > { %978 = vst [vmem:[#allocation2 + $0x78] sm:$0xff] %v946_v42  ;;  %994 = vst [vmem:[#allocation2 + $0xf8] sm:$0xff] %v962_v43 }
 0x225 PF: > { %s5252_s10 = sld [smem:[#allocation24_spill]] }
 0x22b   : > { %p2944_p0 = scmp.ne.s32.totalorder %s5252_s10, 0 }
 0x22c   : > { %s5253_s14 = sld [smem:[#allocation23_spill]] (!%p2944_p0) }
 0x22d   : > { %997 = sbr.rel (%p2944_p0) target bundleno = 920 (0x398), region = 60 }
 0x232   : > { %p2945_p5 = scmp.ne.s32.totalorder (!%p2944_p0), %s5253_s14, 0 }
 0x234   : > { %1000 = sbr.rel (%p2945_p5) target bundleno = 571 (0x23b), region = 64  ;;  %v1001_v44 = vlaneseq (!%p2945_p5)  ;;  %v3796_v45 = vmov (!%p2945_p5), 0.0  }
 0x236   : > { %vm1003_vm0 = vcmp.lt.s32.totalorder (!%p2945_p5), %v1001_v44, 256 }
 0x237   : > { %1005 = vst.msk [vmem:[#allocation4] sm:$0x3] (!%p2945_p5), %vm1003_vm0, %v3796_v45  ;;  %1006 = vst.msk [vmem:[#allocation5] sm:$0x3] (!%p2945_p5), %vm1003_vm0, %v3796_v45 }
 0x23b PF: > { %v1077_v46 = vld [vmem:[#allocation2 + $0x8] sm:$0xff]  ;;  %v1076_v47 = vld [vmem:[#allocation2] sm:$0xff]  ;;  %v1079_v48 = vld [vmem:[#allocation2 + $0x18] sm:$0xff]  ;;  %v1108_v34 = vlaneseq  ;;  %s4268_s26 = scalar_lea.vmem [#allocation2], %s4198_s0  ;;  %s1381_s2 = sshra.s32 %s4198_s0, 3 }
 0x23c   : > { %1228 = vmatprep.subr.bf16.mxu0 %v1077_v46  ;;  %3089 = vmatprep.subr.bf16.mxu1 %v1077_v46  ;;  %v1078_v49 = vld [vmem:[#allocation2 + $0x10] sm:$0xff]  ;;  %v1081_v50 = vld [vmem:[#allocation2 + $0x28] sm:$0xff]  ;;  %v1080_v51 = vld [vmem:[#allocation2 + $0x20] sm:$0xff]  ;;  %s4340_s21 = sshll.u32 %s1381_s2, 4 }
 0x23d   : > { %1229 = vmatpush1.bf16.msra.mxu0 %v1076_v47  ;;  %3105 = vmatpush1.bf16.msra.mxu1 %v1076_v47  ;;  %v1083_v52 = vld [vmem:[#allocation2 + $0x38] sm:$0xff]  ;;  %v1082_v53 = vld [vmem:[#allocation2 + $0x30] sm:$0xff]  ;;  %v1085_v55 = vld [vmem:[#allocation2 + $0x48] sm:$0xff]  ;;  %v4264_v35 = vshrl.u32 %v1108_v34, 7  ;;  %vm1482_vm1 = vcmp.lt.s32.totalorder %v1108_v34, 256 }
 0x23e   : > { %1230 = vmatprep.subr.bf16.mxu0 %v1079_v48  ;;  %3090 = vmatprep.subr.bf16.mxu1 %v1079_v48  ;;  %v3424_v54 = vld [vmem:[%s4175_s12 + $0x4] ss:$8 sps:$4 sm:$0xff]   ;;  %v1084_v57 = vld [vmem:[#allocation2 + $0x40] sm:$0xff]  ;;  %v1087_v58 = vld [vmem:[#allocation2 + $0x58] sm:$0xff] }
 0x23f   : > { %1260 = vmatprep.mubr.bf16.mxu0 %v3424_v54  ;;  %v3430_v56 = vld [vmem:[%s4175_s12 + $0x44] ss:$8 sps:$4 sm:$0xff]   ;;  %v1088_v61 = vld [vmem:[#allocation2 + $0x60] sm:$0xff]  ;;  %v1091_v62 = vld [vmem:[#allocation2 + $0x78] sm:$0xff]  ;;  %v1110_v36 = vsub.s32 5, %v4264_v35  ;;  %v1343_v45 = vsub.s32 0, %v4264_v35 }
 0x240   : > { %1300 = vmatprep.mubr.bf16.mxu1 %v3430_v56  ;;  %v1086_v59 = vld [vmem:[#allocation2 + $0x50] sm:$0xff]  ;;  %v1089_v60 = vld [vmem:[#allocation2 + $0x68] sm:$0xff]  ;;  %v1092_v5 = vld [vmem:[#allocation2 + $0x80] sm:$0xff] }
 0x241   : > { %1231 = vmatpush1.bf16.msra.mxu0 %v1078_v49  ;;  %3106 = vmatpush1.bf16.msra.mxu1 %v1078_v49  ;;  %v1090_v63 = vld [vmem:[#allocation2 + $0x70] sm:$0xff]  ;;  %v1093_v4 = vld [vmem:[#allocation2 + $0x88] sm:$0xff]  ;;  %v1095_v6 = vld [vmem:[#allocation2 + $0x98] sm:$0xff]  ;;  %v4275_v42 = vrot.slane %v4208_v2, %v1110_v36  ;;  %v4278_v44 = vrot.slane %v4211_v3, %v1110_v36  ;;  %v4287_v54 = vrot.slane %v4203_v0, %v1343_v45 }
 0x242   : > { %1232 = vmatprep.subr.bf16.mxu0 %v1081_v50  ;;  %3091 = vmatprep.subr.bf16.mxu1 %v1081_v50  ;;  %v1094_v7 = vld [vmem:[#allocation2 + $0x90] sm:$0xff]  ;;  %v1097_v8 = vld [vmem:[#allocation2 + $0xa8] sm:$0xff]  ;;  %v1096_v9 = vld [vmem:[#allocation2 + $0xa0] sm:$0xff]  ;;  %v4290_v3 = vrot.slane %v4205_v1, %v1343_v45 }
 0x243   : > { %v1099_v10 = vld [vmem:[#allocation2 + $0xb8] sm:$0xff]  ;;  %v1098_v11 = vld [vmem:[#allocation2 + $0xb0] sm:$0xff]  ;;  %v1101_v12 = vld [vmem:[#allocation2 + $0xc8] sm:$0xff] }
 0x244   : > { %v1100_v13 = vld [vmem:[#allocation2 + $0xc0] sm:$0xff]  ;;  %v1103_v14 = vld [vmem:[#allocation2 + $0xd8] sm:$0xff]  ;;  %v1102_v15 = vld [vmem:[#allocation2 + $0xd0] sm:$0xff] }
 0x245   : > { %1233 = vmatpush1.bf16.msra.mxu0 %v1080_v51  ;;  %3107 = vmatpush1.bf16.msra.mxu1 %v1080_v51  ;;  %v1105_v16 = vld [vmem:[#allocation2 + $0xe8] sm:$0xff]  ;;  %v1104_v17 = vld [vmem:[#allocation2 + $0xe0] sm:$0xff]  ;;  %v1107_v18 = vld [vmem:[#allocation2 + $0xf8] sm:$0xff] }
 0x246   : > { %1234 = vmatprep.subr.bf16.mxu0 %v1083_v52  ;;  %3092 = vmatprep.subr.bf16.mxu1 %v1083_v52  ;;  %v1106_v19 = vld [vmem:[#allocation2 + $0xf0] sm:$0xff]  ;;  %v3425_v22 = vld [vmem:[%s4175_s12 + $0x14] ss:$8 sps:$4 sm:$0xff]   ;;  %v3427_v24 = vld [vmem:[%s4175_s12 + $0x10] ss:$8 sps:$4 sm:$0xff]  }
 0x247   : > { %v3422_v20 = vld [vmem:[%s4175_s12] ss:$8 sps:$4 sm:$0xff]   ;;  %v3434_v23 = vld [vmem:[%s4175_s12 + $0x54] ss:$8 sps:$4 sm:$0xff]   ;;  %v3436_v25 = vld [vmem:[%s4175_s12 + $0x50] ss:$8 sps:$4 sm:$0xff]  }
 0x248   : > { %v3428_v21 = vld [vmem:[%s4175_s12 + $0x40] ss:$8 sps:$4 sm:$0xff]   ;;  %v3431_v26 = vld [vmem:[%s4175_s12 + $0x24] ss:$8 sps:$4 sm:$0xff]   ;;  %v3437_v30 = vld [vmem:[%s4175_s12 + $0x34] ss:$8 sps:$4 sm:$0xff]  }
 0x249   : > { %1235 = vmatpush1.bf16.msra.mxu0 %v1082_v53  ;;  %3108 = vmatpush1.bf16.msra.mxu1 %v1082_v53  ;;  %v3440_v27 = vld [vmem:[%s4175_s12 + $0x64] ss:$8 sps:$4 sm:$0xff]   ;;  %v3433_v28 = vld [vmem:[%s4175_s12 + $0x20] ss:$8 sps:$4 sm:$0xff]   ;;  %v3443_v31 = vld [vmem:[%s4175_s12 + $0x74] ss:$8 sps:$4 sm:$0xff]  }
 0x24a   : > { %1236 = vmatprep.subr.bf16.mxu0 %v1085_v55  ;;  %3093 = vmatprep.subr.bf16.mxu1 %v1085_v55  ;;  %v3442_v29 = vld [vmem:[%s4175_s12 + $0x60] ss:$8 sps:$4 sm:$0xff]   ;;  %v3439_v32 = vld [vmem:[%s4175_s12 + $0x30] ss:$8 sps:$4 sm:$0xff]  }
 0x24b   : > { %v3445_v33 = vld [vmem:[%s4175_s12 + $0x70] ss:$8 sps:$4 sm:$0xff]   ;;  %v1013_v38 = vld [vmem:[%s4268_s26 + $0x8] sm:$0xff]  ;;  %v1014_v39 = vld [vmem:[%s4268_s26 + $0x10] sm:$0xff]  ;;  %s4374_s12 = scalar_lea.vmem [#allocation3], %s4340_s21 }
 0x24c   : > { %v1012_v37 = vld [vmem:[%s4268_s26] sm:$0xff]  ;;  %v1015_v40 = vld [vmem:[%s4268_s26 + $0x18] sm:$0xff]  ;;  %v1029_v43 = vunpack.c.l.bf16 %v1013_v38  ;;  %v1031_v47 = vunpack.c.h.bf16 %v1013_v38  ;;  %v1032_v48 = vunpack.c.l.bf16 %v1014_v39  ;;  %v1021_v52 = vld [vmem:[%s4268_s26 + $0x48] sm:$0xff] }
 0x24d   : > { %1237 = vmatpush1.bf16.msra.mxu0 %v1084_v57  ;;  %3109 = vmatpush1.bf16.msra.mxu1 %v1084_v57  ;;  %v1028_v41 = vunpack.c.l.bf16 %v1012_v37  ;;  %v1030_v46 = vunpack.c.h.bf16 %v1012_v37  ;;  %v1033_v49 = vunpack.c.l.bf16 %v1015_v40  ;;  %v1020_v2 = vld [vmem:[%s4268_s26 + $0x40] sm:$0xff]  ;;  %v1017_v57 = vld [vmem:[%s4268_s26 + $0x28] sm:$0xff] }
 0x24e   : > { %1238 = vmatprep.subr.bf16.mxu0 %v1087_v58  ;;  %3094 = vmatprep.subr.bf16.mxu1 %v1087_v58  ;;  %v1117_v51 = vmul.f32 %v4278_v44, %v1029_v43  ;;  %v1016_v53 = vld [vmem:[%s4268_s26 + $0x20] sm:$0xff]  ;;  %v4294_v56 = vmul.f32 %v4278_v44, %v1031_v47  ;;  %v4298_v58 = vmul.f32 %v4275_v42, %v1032_v48 }
 0x24f   : > { %v1116_v50 = vmul.f32 %v4275_v42, %v1028_v41  ;;  %v1118_v55 = vmul.f32 %v4275_v42, %v1030_v46 }
 0x251   : > { %1239 = vmatpush1.bf16.msra.mxu0 %v1086_v59  ;;  %3110 = vmatpush1.bf16.msra.mxu1 %v1086_v59  ;;  %v4301_v59 = vmul.f32 %v4278_v44, %v1033_v49 }
 0x252   : > { %1240 = vmatprep.subr.bf16.mxu0 %v1089_v60  ;;  %3095 = vmatprep.subr.bf16.mxu1 %v1089_v60  ;;  %v1034_v60 = vunpack.c.h.bf16 %v1014_v39 }
 0x255   : > { %1241 = vmatpush1.bf16.msra.mxu0 %v1088_v61  ;;  %3111 = vmatpush1.bf16.msra.mxu1 %v1088_v61  ;;  %v1035_v61 = vunpack.c.h.bf16 %v1015_v40 }
 0x256   : > { %1242 = vmatprep.subr.bf16.mxu0 %v1091_v62  ;;  %3096 = vmatprep.subr.bf16.mxu1 %v1091_v62  ;;  %v1022_v62 = vld [vmem:[%s4268_s26 + $0x50] sm:$0xff] }
 0x259   : > { %1243 = vmatpush1.bf16.msra.mxu0 %v1090_v63  ;;  %3112 = vmatpush1.bf16.msra.mxu1 %v1090_v63  ;;  %v1023_v63 = vld [vmem:[%s4268_s26 + $0x58] sm:$0xff] }
 0x25a   : > { %1244 = vmatprep.subr.bf16.mxu0 %v1093_v4  ;;  %3097 = vmatprep.subr.bf16.mxu1 %v1093_v4  ;;  %v4306_v4 = vld [vmem:[%s4268_s26 + $0x30] sm:$0xff] }
 0x25b   : > { %v1042_v43 = vunpack.c.h.bf16 %v4306_v4 }
 0x25d   : > { %1245 = vmatpush1.bf16.msra.mxu0 %v1092_v5  ;;  %3113 = vmatpush1.bf16.msra.mxu1 %v1092_v5  ;;  %v1044_v5 = vunpack.c.l.bf16 %v1020_v2 }
 0x25e   : > { %1246 = vmatprep.subr.bf16.mxu0 %v1095_v6  ;;  %3098 = vmatprep.subr.bf16.mxu1 %v1095_v6  ;;  %v1045_v6 = vunpack.c.l.bf16 %v1021_v52 }
 0x261   : > { %1247 = vmatpush1.bf16.msra.mxu0 %v1094_v7  ;;  %3114 = vmatpush1.bf16.msra.mxu1 %v1094_v7  ;;  %v1046_v7 = vunpack.c.h.bf16 %v1020_v2 }
 0x262   : > { %1248 = vmatprep.subr.bf16.mxu0 %v1097_v8  ;;  %3099 = vmatprep.subr.bf16.mxu1 %v1097_v8  ;;  %v1036_v8 = vunpack.c.l.bf16 %v1016_v53 }
 0x265   : > { %1249 = vmatpush1.bf16.msra.mxu0 %v1096_v9  ;;  %3115 = vmatpush1.bf16.msra.mxu1 %v1096_v9  ;;  %v4309_v9 = vld [vmem:[%s4268_s26 + $0x38] sm:$0xff] }
 0x266   : > { %1250 = vmatprep.subr.bf16.mxu0 %v1099_v10  ;;  %3100 = vmatprep.subr.bf16.mxu1 %v1099_v10  ;;  %v1047_v10 = vunpack.c.h.bf16 %v1021_v52  ;;  %v1043_v45 = vunpack.c.h.bf16 %v4309_v9 }
 0x269   : > { %1251 = vmatpush1.bf16.msra.mxu0 %v1098_v11  ;;  %3116 = vmatpush1.bf16.msra.mxu1 %v1098_v11  ;;  %v1037_v11 = vunpack.c.l.bf16 %v1017_v57 }
 0x26a   : > { %1252 = vmatprep.subr.bf16.mxu0 %v1101_v12  ;;  %3101 = vmatprep.subr.bf16.mxu1 %v1101_v12  ;;  %v1038_v12 = vunpack.c.h.bf16 %v1016_v53 }
 0x26d   : > { %1253 = vmatpush1.bf16.msra.mxu0 %v1100_v13  ;;  %3117 = vmatpush1.bf16.msra.mxu1 %v1100_v13  ;;  %v1039_v13 = vunpack.c.h.bf16 %v1017_v57 }
 0x26e   : > { %1254 = vmatprep.subr.bf16.mxu0 %v1103_v14  ;;  %3102 = vmatprep.subr.bf16.mxu1 %v1103_v14  ;;  %v1048_v14 = vunpack.c.l.bf16 %v1022_v62 }
 0x271   : > { %1255 = vmatpush1.bf16.msra.mxu0 %v1102_v15  ;;  %3118 = vmatpush1.bf16.msra.mxu1 %v1102_v15  ;;  %v1049_v15 = vunpack.c.l.bf16 %v1023_v63 }
 0x272   : > { %1256 = vmatprep.subr.bf16.mxu0 %v1105_v16  ;;  %3103 = vmatprep.subr.bf16.mxu1 %v1105_v16  ;;  %v1050_v16 = vunpack.c.h.bf16 %v1022_v62 }
 0x274   : > { %v4349_v36 = vmul.f32 %v4275_v42, %v1050_v16 }
 0x275   : > { %1257 = vmatpush1.bf16.msra.mxu0 %v1104_v17  ;;  %3119 = vmatpush1.bf16.msra.mxu1 %v1104_v17  ;;  %v1040_v17 = vunpack.c.l.bf16 %v4306_v4 }
 0x276   : > { %1258 = vmatprep.subr.bf16.mxu0 %v1107_v18  ;;  %3104 = vmatprep.subr.bf16.mxu1 %v1107_v18  ;;  %v4314_v18 = vmul.f32 %v4275_v42, %v1034_v60 }
 0x277   : > { %v4352_v37 = vmul.f32 %v4275_v42, %v1040_v17 }
 0x279   : > { %1259 = vmatpush1.bf16.msra.mxu0 %v1106_v19  ;;  %3120 = vmatpush1.bf16.msra.mxu1 %v1106_v19  ;;  %v4317_v19 = vmul.f32 %v4278_v44, %v1035_v61 }
 0x27c   : > { %1261 = vmatmul.mubr.bf16.vlgmr.msra.gmra.mrb[0].mxu0 %v3422_v20  ;;  %1301 = vmatmul.mubr.bf16.vlgmr.msra.gmra.mrb[0].mxu1 %v3428_v21  ;;  %v1051_v20 = vunpack.c.h.bf16 %v1023_v63  ;;  %v1041_v21 = vunpack.c.l.bf16 %v4309_v9 }
 0x27d   : > { %1270 = vmatprep.mubr.bf16.mxu0 %v3425_v22  ;;  %1310 = vmatprep.mubr.bf16.mxu1 %v3434_v23  ;;  %v1132_v22 = vmul.f32 %v4275_v42, %v1044_v5  ;;  %v1133_v23 = vmul.f32 %v4278_v44, %v1045_v6 }
 0x27e   : > { %v4355_v40 = vmul.f32 %v4278_v44, %v1051_v20  ;;  %v4358_v41 = vmul.f32 %v4278_v44, %v1041_v21  ;;  %v4403_v20 = vld [vmem:[%s4268_s26 + $0x70] sm:$0xff] }
 0x284   : > { %1271 = vmatmul.mubr.bf16.gmra.mrb[4].mxu0 %v3427_v24  ;;  %1311 = vmatmul.mubr.bf16.gmra.mrb[4].mxu1 %v3436_v25  ;;  %v1134_v24 = vmul.f32 %v4275_v42, %v1046_v7  ;;  %v4324_v25 = vmul.f32 %v4275_v42, %v1036_v8 }
 0x285   : > { %1280 = vmatprep.mubr.bf16.mxu0 %v3431_v26  ;;  %1320 = vmatprep.mubr.bf16.mxu1 %v3440_v27  ;;  %v1135_v26 = vmul.f32 %v4278_v44, %v1047_v10  ;;  %v4328_v27 = vmul.f32 %v4278_v44, %v1037_v11 }
 0x28c   : > { %1281 = vmatmul.mubr.bf16.gmra.mrb[8].mxu0 %v3433_v28  ;;  %1321 = vmatmul.mubr.bf16.gmra.mrb[8].mxu1 %v3442_v29  ;;  %v4331_v28 = vmul.f32 %v4275_v42, %v1038_v12  ;;  %v4334_v29 = vmul.f32 %v4278_v44, %v1039_v13  ;;  %v4384_v12 = vmul.f32 %v4275_v42, %v1042_v43 }
 0x28d   : > { %1290 = vmatprep.mubr.bf16.mxu0 %v3437_v30  ;;  %1330 = vmatprep.mubr.bf16.mxu1 %v3443_v31  ;;  %v1024_v30 = vld [vmem:[%s4268_s26 + $0x60] sm:$0xff]  ;;  %v4338_v31 = vld [vmem:[%s4268_s26 + $0x68] sm:$0xff]  ;;  %v4387_v13 = vmul.f32 %v4278_v44, %v1043_v45 }
 0x28e   : > { %v1052_v2 = vunpack.c.l.bf16 %v1024_v30  ;;  %v1053_v52 = vunpack.c.l.bf16 %v4338_v31  ;;  %v1054_v62 = vunpack.c.h.bf16 %v1024_v30  ;;  %v1055_v63 = vunpack.c.h.bf16 %v4338_v31 }
 0x290   : > { %v4397_v16 = vmul.f32 %v4275_v42, %v1052_v2  ;;  %v4400_v17 = vmul.f32 %v4278_v44, %v1053_v52  ;;  %v4418_v45 = vmul.f32 %v4278_v44, %v1055_v63  ;;  %v1056_v52 = vunpack.c.l.bf16 %v4403_v20 }
 0x294   : > { %1291 = vmatmul.mubr.bf16.gmra.mrb[12].mxu0 %v3439_v32  ;;  %1331 = vmatmul.mubr.bf16.gmra.mrb[12].mxu1 %v3445_v33  ;;  %v4343_v32 = vmul.f32 %v4275_v42, %v1048_v14  ;;  %v4346_v33 = vmul.f32 %v4278_v44, %v1049_v15 }
 0x34f   : > { %v1262_v38 = vpop.f32.mrb[0].mxu0  ;;  %v1302_v39 = vpop.f32.mrb[0].mxu1 }
 0x350   : > { %v1263_v46 = vadd.f32 %v1262_v38, %v1116_v50  ;;  %v1264_v47 = vpop.f32.mrb[1].mxu0  ;;  %v1303_v48 = vadd.f32 %v1302_v39, %v1132_v22  ;;  %v1304_v49 = vpop.f32.mrb[1].mxu1 }
 0x351   : > { %v1265_v53 = vadd.f32 %v1264_v47, %v1117_v51  ;;  %v1266_v57 = vpop.f32.mrb[2].mxu0  ;;  %v1305_v60 = vadd.f32 %v1304_v49, %v1133_v23  ;;  %v1306_v61 = vpop.f32.mrb[2].mxu1 }
 0x352   : > { %v1349_v5 = vadd.f32 %v4287_v54, %v1263_v46  ;;  %v1267_v4 = vadd.f32 %v1266_v57, %v1118_v55  ;;  %v1268_v6 = vpop.f32.mrb[3].mxu0  ;;  %v4366_v50 = vadd.f32 %v4287_v54, %v1303_v48  ;;  %v1307_v7 = vadd.f32 %v1306_v61, %v1134_v24  ;;  %v1308_v8 = vpop.f32.mrb[3].mxu1 }
 0x353   : > { %v1350_v9 = vadd.f32 %v4290_v3, %v1265_v53  ;;  %v1269_v51 = vadd.f32 %v1268_v6, %v4294_v56  ;;  %v4371_v10 = vadd.f32 %v4290_v3, %v1305_v60  ;;  %v1309_v11 = vadd.f32 %v1308_v8, %v1135_v26  ;;  %v4412_v26 = vld [vmem:[%s4268_s26 + $0x78] sm:$0xff] }
 0x354   : > { %1386 = vst [vmem:[%s4374_s12] sm:$0xff] %v1349_v5  ;;  %v1351_v55 = vadd.f32 %v4287_v54, %v1267_v4  ;;  %1402 = vst [vmem:[%s4374_s12 + $0x80] sm:$0xff] %v4366_v50  ;;  %v4381_v56 = vadd.f32 %v4287_v54, %v1307_v7  ;;  %v1486_v21 = vmul.f32 %v1349_v5, %v1349_v5  ;;  %v1057_v63 = vunpack.c.l.bf16 %v4412_v26 }
 0x355   : > { %1387 = vst [vmem:[%s4374_s12 + $0x8] sm:$0xff] %v1350_v9  ;;  %v1352_v14 = vadd.f32 %v4290_v3, %v1269_v51  ;;  %1403 = vst [vmem:[%s4374_s12 + $0x88] sm:$0xff] %v4371_v10  ;;  %v4394_v15 = vadd.f32 %v4290_v3, %v1309_v11  ;;  %v4409_v24 = vmul.f32 %v4275_v42, %v1054_v62 }
 0x356   : > { %1388 = vst [vmem:[%s4374_s12 + $0x10] sm:$0xff] %v1351_v55  ;;  %v1419_v22 = vadd.f32 %v1351_v55, %v1349_v5  ;;  %v1488_v23 = vmul.f32 %v1351_v55, %v1351_v55  ;;  %1404 = vst [vmem:[%s4374_s12 + $0x90] sm:$0xff] %v4381_v56  ;;  %v1487_v30 = vmul.f32 %v1350_v9, %v1350_v9 }
 0x357   : > { %1389 = vst [vmem:[%s4374_s12 + $0x18] sm:$0xff] %v1352_v14  ;;  %v1440_v31 = vadd.f32 %v1352_v14, %v1350_v9  ;;  %v1489_v38 = vmul.f32 %v1352_v14, %v1352_v14  ;;  %v1272_v39 = vpop.f32.mrb[4].mxu0  ;;  %1405 = vst [vmem:[%s4374_s12 + $0x98] sm:$0xff] %v4394_v15  ;;  %v1312_v43 = vpop.f32.mrb[4].mxu1 }
 0x358   : > { %v1518_v46 = vadd.f32 %v1488_v23, %v1486_v21  ;;  %v1273_v47 = vadd.f32 %v1272_v39, %v4298_v58  ;;  %v1274_v48 = vpop.f32.mrb[5].mxu0  ;;  %v1313_v49 = vadd.f32 %v1312_v43, %v4343_v32  ;;  %v1314_v2 = vpop.f32.mrb[5].mxu1  ;;  %v1059_v21 = vunpack.c.h.bf16 %v4412_v26 }
 0x359   : > { %v1539_v53 = vadd.f32 %v1489_v38, %v1487_v30  ;;  %v1275_v57 = vadd.f32 %v1274_v48, %v4301_v59  ;;  %v1276_v60 = vpop.f32.mrb[6].mxu0  ;;  %v1315_v61 = vadd.f32 %v1314_v2, %v4346_v33  ;;  %v1316_v62 = vpop.f32.mrb[6].mxu1 }
 0x35a   : > { %v1353_v5 = vadd.f32 %v4287_v54, %v1273_v47  ;;  %v1277_v58 = vadd.f32 %v1276_v60, %v4314_v18  ;;  %v1278_v32 = vpop.f32.mrb[7].mxu0  ;;  %v4429_v4 = vadd.f32 %v4287_v54, %v1313_v49  ;;  %v1317_v6 = vadd.f32 %v1316_v62, %v4349_v36  ;;  %v1318_v59 = vpop.f32.mrb[7].mxu1 }
 0x35b   : > { %v1354_v7 = vadd.f32 %v4290_v3, %v1275_v57  ;;  %v1279_v33 = vadd.f32 %v1278_v32, %v4317_v19  ;;  %v4435_v8 = vadd.f32 %v4290_v3, %v1315_v61  ;;  %v1319_v9 = vadd.f32 %v1318_v59, %v4355_v40 }
 0x35c   : > { %1390 = vst [vmem:[%s4374_s12 + $0x20] sm:$0xff] %v1353_v5  ;;  %v1420_v18 = vadd.f32 %v1419_v22, %v1353_v5  ;;  %v1490_v51 = vmul.f32 %v1353_v5, %v1353_v5  ;;  %v1355_v11 = vadd.f32 %v4287_v54, %v1277_v58  ;;  %1406 = vst [vmem:[%s4374_s12 + $0xa0] sm:$0xff] %v4429_v4  ;;  %v1058_v36 = vunpack.c.h.bf16 %v4403_v20 }
 0x35d   : > { %1391 = vst [vmem:[%s4374_s12 + $0x28] sm:$0xff] %v1354_v7  ;;  %v1441_v55 = vadd.f32 %v1440_v31, %v1354_v7  ;;  %v1491_v14 = vmul.f32 %v1354_v7, %v1354_v7  ;;  %v1356_v19 = vadd.f32 %v4290_v3, %v1279_v33  ;;  %1407 = vst [vmem:[%s4374_s12 + $0xa8] sm:$0xff] %v4435_v8 }
 0x35e   : > { %v1519_v40 = vadd.f32 %v1518_v46, %v1490_v51  ;;  %1392 = vst [vmem:[%s4374_s12 + $0x30] sm:$0xff] %v1355_v11  ;;  %v1421_v22 = vadd.f32 %v1420_v18, %v1355_v11  ;;  %v1492_v23 = vmul.f32 %v1355_v11, %v1355_v11  ;;  %v4450_v30 = vadd.f32 %v4287_v54, %v1317_v6 }
 0x35f   : > { %v1540_v38 = vadd.f32 %v1539_v53, %v1491_v14  ;;  %1393 = vst [vmem:[%s4374_s12 + $0x38] sm:$0xff] %v1356_v19  ;;  %v1442_v20 = vadd.f32 %v1441_v55, %v1356_v19  ;;  %v1493_v31 = vmul.f32 %v1356_v19, %v1356_v19  ;;  %v1282_v39 = vpop.f32.mrb[8].mxu0  ;;  %v4454_v43 = vadd.f32 %v4290_v3, %v1319_v9  ;;  %v1322_v47 = vpop.f32.mrb[8].mxu1 }
 0x360   : > { %v1520_v48 = vadd.f32 %v1519_v40, %v1492_v23  ;;  %v1283_v26 = vadd.f32 %v1282_v39, %v4324_v25  ;;  %v1284_v46 = vpop.f32.mrb[9].mxu0  ;;  %1408 = vst [vmem:[%s4374_s12 + $0xb0] sm:$0xff] %v4450_v30  ;;  %v1323_v49 = vadd.f32 %v1322_v47, %v4397_v16  ;;  %v1324_v2 = vpop.f32.mrb[9].mxu1  ;;  %v1144_v53 = vmul.f32 %v4275_v42, %v1056_v52 }
 0x361   : > { %v1541_v57 = vadd.f32 %v1540_v38, %v1493_v31  ;;  %v1285_v60 = vadd.f32 %v1284_v46, %v4328_v27  ;;  %v1286_v61 = vpop.f32.mrb[10].mxu0  ;;  %1409 = vst [vmem:[%s4374_s12 + $0xb8] sm:$0xff] %v4454_v43  ;;  %v1325_v62 = vadd.f32 %v1324_v2, %v4400_v17  ;;  %v1326_v5 = vpop.f32.mrb[10].mxu1  ;;  %v1145_v25 = vmul.f32 %v4278_v44, %v1057_v63 }
 0x362   : > { %v1357_v58 = vadd.f32 %v4287_v54, %v1283_v26  ;;  %v1287_v16 = vadd.f32 %v1286_v61, %v4331_v28  ;;  %v1288_v32 = vpop.f32.mrb[11].mxu0  ;;  %v4469_v52 = vadd.f32 %v4287_v54, %v1323_v49  ;;  %v1327_v27 = vadd.f32 %v1326_v5, %v4409_v24  ;;  %v1328_v6 = vpop.f32.mrb[11].mxu1 }
 0x363   : > { %v1358_v59 = vadd.f32 %v4290_v3, %v1285_v60  ;;  %v1289_v17 = vadd.f32 %v1288_v32, %v4334_v29  ;;  %v4475_v63 = vadd.f32 %v4290_v3, %v1325_v62  ;;  %v1329_v7 = vadd.f32 %v1328_v6, %v4418_v45 }
 0x364   : > { %1394 = vst [vmem:[%s4374_s12 + $0x40] sm:$0xff] %v1357_v58  ;;  %v1422_v28 = vadd.f32 %v1421_v22, %v1357_v58  ;;  %v1494_v33 = vmul.f32 %v1357_v58, %v1357_v58  ;;  %v1359_v9 = vadd.f32 %v4287_v54, %v1287_v16  ;;  %1410 = vst [vmem:[%s4374_s12 + $0xc0] sm:$0xff] %v4469_v52 }
 0x365   : > { %v1146_v24 = vmul.f32 %v4275_v42, %v1058_v36  ;;  %1395 = vst [vmem:[%s4374_s12 + $0x48] sm:$0xff] %v1358_v59  ;;  %v1443_v18 = vadd.f32 %v1442_v20, %v1358_v59  ;;  %v1495_v51 = vmul.f32 %v1358_v59, %v1358_v59  ;;  %v1360_v29 = vadd.f32 %v4290_v3, %v1289_v17 }
 0x366   : > { %1411 = vst [vmem:[%s4374_s12 + $0xc8] sm:$0xff] %v4475_v63  ;;  %v1147_v11 = vmul.f32 %v4278_v44, %v1059_v21  ;;  %v1521_v45 = vadd.f32 %v1520_v48, %v1494_v33  ;;  %1396 = vst [vmem:[%s4374_s12 + $0x50] sm:$0xff] %v1359_v9  ;;  %v1423_v55 = vadd.f32 %v1422_v28, %v1359_v9 }
 0x367   : > { %v1496_v14 = vmul.f32 %v1359_v9, %v1359_v9  ;;  %v4490_v19 = vadd.f32 %v4287_v54, %v1327_v27  ;;  %v1542_v40 = vadd.f32 %v1541_v57, %v1495_v51  ;;  %1397 = vst [vmem:[%s4374_s12 + $0x58] sm:$0xff] %v1360_v29  ;;  %v1444_v42 = vadd.f32 %v1443_v18, %v1360_v29  ;;  %v1292_v22 = vpop.f32.mrb[12].mxu0  ;;  %v1332_v38 = vpop.f32.mrb[12].mxu1 }
 0x368   : > { %v1497_v36 = vmul.f32 %v1360_v29, %v1360_v29  ;;  %v4494_v23 = vadd.f32 %v4290_v3, %v1329_v7  ;;  %v1293_v44 = vadd.f32 %v1292_v22, %v4352_v37  ;;  %v1294_v21 = vpop.f32.mrb[13].mxu0  ;;  %v1333_v31 = vadd.f32 %v1332_v38, %v1144_v53  ;;  %v1334_v39 = vpop.f32.mrb[13].mxu1 }
 0x369   : > { %v1522_v20 = vadd.f32 %v1521_v45, %v1496_v14  ;;  %1412 = vst [vmem:[%s4374_s12 + $0xd0] sm:$0xff] %v4490_v19  ;;  %v1295_v48 = vadd.f32 %v1294_v21, %v4358_v41  ;;  %v1296_v26 = vpop.f32.mrb[14].mxu0  ;;  %v1335_v46 = vadd.f32 %v1334_v39, %v1145_v25  ;;  %v1336_v49 = vpop.f32.mrb[14].mxu1  ;;  %v1502_v18 = vmul.f32 %v4366_v50, %v4366_v50 }
 0x36a   : > { %v1543_v47 = vadd.f32 %v1542_v40, %v1497_v36  ;;  %1413 = vst [vmem:[%s4374_s12 + $0xd8] sm:$0xff] %v4494_v23  ;;  %v1361_v2 = vadd.f32 %v4287_v54, %v1293_v44  ;;  %v1297_v37 = vadd.f32 %v1296_v26, %v4384_v12  ;;  %v1298_v57 = vpop.f32.mrb[15].mxu0  ;;  %v4505_v60 = vadd.f32 %v4287_v54, %v1333_v31  ;;  %v1338_v61 = vpop.f32.mrb[15].mxu1 }
 0x36b   : > { %v1337_v53 = vadd.f32 %v1336_v49, %v1146_v24  ;;  %v1362_v41 = vadd.f32 %v4290_v3, %v1295_v48  ;;  %v1299_v62 = vadd.f32 %v1298_v57, %v4387_v13  ;;  %v4510_v5 = vadd.f32 %v4290_v3, %v1335_v46 }
 0x36c   : > { %v1339_v25 = vadd.f32 %v1338_v61, %v1147_v11  ;;  %1398 = vst [vmem:[%s4374_s12 + $0x60] sm:$0xff] %v1361_v2  ;;  %v1424_v58 = vadd.f32 %v1423_v55, %v1361_v2  ;;  %v1498_v12 = vmul.f32 %v1361_v2, %v1361_v2  ;;  %v1363_v16 = vadd.f32 %v4287_v54, %v1297_v37 }
 0x36d   : > { %1414 = vst [vmem:[%s4374_s12 + $0xe0] sm:$0xff] %v4505_v60  ;;  %1399 = vst [vmem:[%s4374_s12 + $0x68] sm:$0xff] %v1362_v41  ;;  %v1445_v32 = vadd.f32 %v1444_v42, %v1362_v41  ;;  %v1499_v27 = vmul.f32 %v1362_v41, %v1362_v41  ;;  %v1364_v6 = vadd.f32 %v4290_v3, %v1299_v62 }
 0x36e   : > { %1415 = vst [vmem:[%s4374_s12 + $0xe8] sm:$0xff] %v4510_v5  ;;  %v1523_v13 = vadd.f32 %v1522_v20, %v1498_v12  ;;  %1400 = vst [vmem:[%s4374_s12 + $0x70] sm:$0xff] %v1363_v16  ;;  %v1425_v59 = vadd.f32 %v1424_v58, %v1363_v16  ;;  %v1500_v17 = vmul.f32 %v1363_v16, %v1363_v16 }
 0x36f   : > { %v1379_v7 = vadd.f32 %v4287_v54, %v1337_v53  ;;  %v1544_v28 = vadd.f32 %v1543_v47, %v1499_v27  ;;  %1401 = vst [vmem:[%s4374_s12 + $0x78] sm:$0xff] %v1364_v6  ;;  %v1446_v33 = vadd.f32 %v1445_v32, %v1364_v6  ;;  %v1501_v9 = vmul.f32 %v1364_v6, %v1364_v6 }
 0x370   : > { %v1380_v24 = vadd.f32 %v4290_v3, %v1339_v25  ;;  %v1426_v51 = vadd.f32 %v1425_v59, %v4366_v50  ;;  %v1524_v29 = vadd.f32 %v1523_v13, %v1500_v17  ;;  %v1503_v11 = vmul.f32 %v4371_v10, %v4371_v10 }
 0x371   : > { %1416 = vst [vmem:[%s4374_s12 + $0xf0] sm:$0xff] %v1379_v7  ;;  %v1447_v45 = vadd.f32 %v1446_v33, %v4371_v10  ;;  %v1545_v55 = vadd.f32 %v1544_v28, %v1501_v9  ;;  %v1504_v54 = vmul.f32 %v4381_v56, %v4381_v56  ;;  %v1505_v40 = vmul.f32 %v4394_v15, %v4394_v15 }
 0x372   : > { %1417 = vst [vmem:[%s4374_s12 + $0xf8] sm:$0xff] %v1380_v24  ;;  %v1427_v14 = vadd.f32 %v1426_v51, %v4381_v56  ;;  %v1525_v3 = vadd.f32 %v1524_v29, %v1502_v18  ;;  %v1506_v36 = vmul.f32 %v4429_v4, %v4429_v4  ;;  %v1507_v38 = vmul.f32 %v4435_v8, %v4435_v8 }
 0x373   : > { %v1448_v50 = vadd.f32 %v1447_v45, %v4394_v15  ;;  %v1546_v42 = vadd.f32 %v1545_v55, %v1503_v11  ;;  %v1508_v56 = vmul.f32 %v4450_v30, %v4450_v30  ;;  %v1509_v15 = vmul.f32 %v4454_v43, %v4454_v43 }
 0x374   : > { %v1526_v22 = vadd.f32 %v1525_v3, %v1504_v54  ;;  %v1428_v10 = vadd.f32 %v1427_v14, %v4429_v4  ;;  %v1510_v48 = vmul.f32 %v4469_v52, %v4469_v52  ;;  %v1511_v46 = vmul.f32 %v4475_v63, %v4475_v63 }
 0x375   : > { %v1547_v20 = vadd.f32 %v1546_v42, %v1505_v40  ;;  %v1449_v44 = vadd.f32 %v1448_v50, %v4435_v8  ;;  %v1512_v37 = vmul.f32 %v4490_v19, %v4490_v19  ;;  %v1515_v61 = vmul.f32 %v4510_v5, %v4510_v5 }
 0x376   : > { %v1429_v21 = vadd.f32 %v1428_v10, %v4450_v30  ;;  %v1527_v31 = vadd.f32 %v1526_v22, %v1506_v36  ;;  %v1516_v12 = vmul.f32 %v1379_v7, %v1379_v7  ;;  %v1517_v27 = vmul.f32 %v1380_v24, %v1380_v24 }
 0x377   : > { %v1450_v39 = vadd.f32 %v1449_v44, %v4454_v43  ;;  %v1548_v47 = vadd.f32 %v1547_v20, %v1507_v38  ;;  %v1514_v43 = vmul.f32 %v4505_v60, %v4505_v60  ;;  %v3797_v9 = vmov 1966171168  }
 0x378   : > { %v1430_v4 = vadd.f32 %v1429_v21, %v4469_v52  ;;  %v1528_v26 = vadd.f32 %v1527_v31, %v1508_v56  ;;  %v1513_v52 = vmul.f32 %v4494_v23, %v4494_v23  ;;  %v1465_v18 = vunpack.c.l.s4 %v3797_v9 }
 0x379   : > { %v1451_v8 = vadd.f32 %v1450_v39, %v4475_v63  ;;  %v1549_v49 = vadd.f32 %v1548_v47, %v1509_v15  ;;  %v1418_v15 = vld [vmem:[#allocation4] sm:$0x3] }
 0x37a   : > { %v1529_v30 = vadd.f32 %v1528_v26, %v1510_v48  ;;  %v1431_v2 = vadd.f32 %v1430_v4, %v4490_v19  ;;  %v1466_v54 = vunpack.c.0.s8 %v1465_v18  ;;  %v1485_v4 = vld [vmem:[#allocation5] sm:$0x3] }
 0x37b   : > { %v1550_v57 = vadd.f32 %v1549_v49, %v1511_v46  ;;  %v1452_v53 = vadd.f32 %v1451_v8, %v4494_v23 }
 0x37c   : > { %v1530_v63 = vadd.f32 %v1529_v30, %v1512_v37  ;;  %v1432_v41 = vadd.f32 %v1431_v2, %v4505_v60  ;;  %v1469_v10 = vsub.s32 %v1466_v54, %v4264_v35 }
 0x37d   : > { %v1551_v62 = vadd.f32 %v1550_v57, %v1513_v52  ;;  %v1453_v25 = vadd.f32 %v1452_v53, %v4510_v5 }
 0x37e   : > { %v1531_v58 = vadd.f32 %v1530_v63, %v1514_v43  ;;  %v1433_v19 = vadd.f32 %v1432_v41, %v1379_v7 }
 0x37f   : > { %v1552_v16 = vadd.f32 %v1551_v62, %v1515_v61  ;;  %v1454_v32 = vadd.f32 %v1453_v25, %v1380_v24 }
 0x380   : > { %v1434_v6 = vrot.slane %v1433_v19, 4  ;;  %v1532_v13 = vadd.f32 %v1531_v58, %v1516_v12 }
 0x381   : > { %v1455_v59 = vrot.slane %v1454_v32, 4  ;;  %v1553_v17 = vadd.f32 %v1552_v16, %v1517_v27 }
 0x382   : > { %v1435_v23 = vadd.f32 %v1434_v6, %v1433_v19  ;;  %v1533_v28 = vrot.slane %v1532_v13, 4 }
 0x383   : > { %v1456_v33 = vadd.f32 %v1455_v59, %v1454_v32  ;;  %v1554_v51 = vrot.slane %v1553_v17, 4 }
 0x384   : > { %v1436_v60 = vrot.slane %v1435_v23, 2  ;;  %v1534_v29 = vadd.f32 %v1533_v28, %v1532_v13 }
 0x385   : > { %v1457_v11 = vrot.slane %v1456_v33, 2  ;;  %v1555_v5 = vadd.f32 %v1554_v51, %v1553_v17 }
 0x386   : > { %v1437_v45 = vadd.f32 %v1436_v60, %v1435_v23  ;;  %v1535_v55 = vrot.slane %v1534_v29, 2 }
 0x387   : > { %v1458_v7 = vadd.f32 %v1457_v11, %v1456_v33  ;;  %v1556_v14 = vrot.slane %v1555_v5, 2 }
 0x388   : > { %v1438_v24 = vrot.slane %v1437_v45, 1  ;;  %v1536_v3 = vadd.f32 %v1535_v55, %v1534_v29 }
 0x389   : > { %v1459_v40 = vrot.slane %v1458_v7, 1  ;;  %v1557_v50 = vadd.f32 %v1556_v14, %v1555_v5 }
 0x38a   : > { %v1439_v42 = vadd.f32 %v1438_v24, %v1437_v45  ;;  %v1537_v36 = vrot.slane %v1536_v3, 1 }
 0x38b   : > { %v1460_v22 = vadd.f32 %v1459_v40, %v1458_v7  ;;  %v1558_v38 = vrot.slane %v1557_v50, 1 }
 0x38c   : > { %v1538_v20 = vadd.f32 %v1537_v36, %v1536_v3 }
 0x38d   : > { %v1463_v44 = vcombine.low %v1439_v42, %v1460_v22  ;;  %v1559_v56 = vadd.f32 %v1558_v38, %v1557_v50 }
 0x38f   : > { %v1470_v21 = vrot.slane %v1463_v44, %v1469_v10  ;;  %v1562_v31 = vcombine.low %v1538_v20, %v1559_v56 }
 0x391   : > { %v1477_v39 = vrot.slane %v1470_v21, %v1469_v10  ;;  %v1569_v47 = vrot.slane %v1562_v31, %v1469_v10 }
 0x393   : > { %v1479_v48 = vadd.f32 %v1477_v39, %v1418_v15  ;;  %v1576_v26 = vrot.slane %v1569_v47, %v1469_v10 }
 0x395   : > { %1484 = vst.msk [vmem:[#allocation4] sm:$0x3] %vm1482_vm1, %v1479_v48  ;;  %v1578_v8 = vadd.f32 %v1576_v26, %v1485_v4 }
 0x397   : > { %1579 = vst.msk [vmem:[#allocation5] sm:$0x3] %vm1482_vm1, %v1578_v8 }
 0x398 PF: > { %s5254_s7 = sld [smem:[#allocation24_spill]] }
 0x39e   : > { %p2966_p10 = scmp.ne.s32.totalorder %s5254_s7, 1 }
 0x39f   : > { %s5255_s4 = sld [smem:[#allocation23_spill]] (!%p2966_p10) }
 0x3a0   : > { %1583 = sbr.rel (%p2966_p10) target bundleno = 1056 (0x420), region = 68 }
 0x3a5   : > { %p2967_p8 = scmp.ne.s32.totalorder (!%p2966_p10), %s5255_s4, 0 }
 0x3a7   : > { %1586 = sbr.rel (%p2967_p8) target bundleno = 974 (0x3ce), region = 72  ;;  %v1587_v35 = vld [vmem:[#allocation4] sm:$0x3] (!%p2967_p8)  ;;  %v1589_v46 = vld [vmem:[#allocation5] sm:$0x3] (!%p2967_p8)  ;;  %v1602_v49 = vlaneseq (!%p2967_p8)  ;;  %v3799_v61 = vmov (!%p2967_p8), 0.0   ;;  %v1598_v41 = vcombine.low (!%p2967_p8), %v4203_v0, %v4205_v1 }
 0x3a8   : > { %v1588_v30 = vmul.f32 (!%p2967_p8), 0.00390625, %v1587_v35  ;;  %v1590_v2 = vmul.f32 (!%p2967_p8), 0.00390625, %v1589_v46  ;;  %v3798_v37 = vmov (!%p2967_p8), 1966171168  }
 0x3a9   : > { %v1600_v34 = vunpack.c.l.s4 (!%p2967_p8), %v3798_v37  ;;  %v1603_v43 = vshrl.u32 (!%p2967_p8), %v1602_v49, 7  ;;  %vm4572_vm2 = vcmp.lt.s32.totalorder (!%p2967_p8), %v1602_v49, 256 }
 0x3aa   : > { %v1591_v53 = vmul.f32 (!%p2967_p8), %v1588_v30, %v1588_v30  ;;  %1655 = vst.msk [vmem:[#allocation4] sm:$0x3] (!%p2967_p8), %vm4572_vm2, %v3799_v61  ;;  %1656 = vst.msk [vmem:[#allocation5] sm:$0x3] (!%p2967_p8), %vm4572_vm2, %v3799_v61 }
 0x3ab   : > { %v1601_v52 = vunpack.c.0.s8 (!%p2967_p8), %v1600_v34  ;;  %v1625_v6 = vsub.s32 (!%p2967_p8), 0, %v1603_v43  ;;  %v1629_v13 = vsub.s32 (!%p2967_p8), 1, %v1603_v43 }
 0x3ac   : > { %v1592_v63 = vsub.f32 (!%p2967_p8), %v1590_v2, %v1591_v53 }
 0x3ad   : > { %v1604_v62 = vsub.s32 (!%p2967_p8), %v1601_v52, %v1603_v43 }
 0x3ae   : > { %v1593_v25 = vmax.f32 %v1592_v63, 0.0 }
 0x3af   : > { %v1605_v19 = vrot.slane %v1598_v41, %v1604_v62 }
 0x3b0   : > { %v1594_v58 = vadd.f32 1e-05, %v1593_v25 }
 0x3b1   : > { %v1606_v12 = vcombine.high %v1605_v19, %v1605_v19 }
 0x3b2   : > { %3446 = vrsqrt.f32 %v1594_v58 }
 0x3b3   : > { %v1613_v16 = vrot.slane %v1606_v12, %v1604_v62 }
 0x3bc   : > { %v3447_v32 = vpop.eup %3446 }
 0x3bd   : > { %v1615_v27 = vmul.f32 %v3447_v32, %v1613_v16 }
 0x3bf   : > { %1620 = vst.msk [vmem:[#allocation6] sm:$0x3] %vm4572_vm2, %v1615_v27  ;;  %v1621_v59 = vmul.f32 %v1615_v27, %v1588_v30 }
 0x3c1   : > { %v1626_v17 = vrot.slane %v1621_v59, %v1625_v6  ;;  %v1630_v23 = vrot.slane %v1621_v59, %v1629_v13 }
 0x3c3   : > { %v1633_v28 = vsub.f32 %v4203_v0, %v1626_v17  ;;  %v1634_v33 = vsub.f32 %v4205_v1, %v1630_v23 }
 0x3c5   : > { %v1637_v9 = vcombine.low %v1633_v28, %v1634_v33 }
 0x3c7   : > { %v1644_v18 = vrot.slane %v1637_v9, %v1604_v62 }
 0x3c9   : > { %v1651_v51 = vrot.slane %v1644_v18, %v1604_v62 }
 0x3cb   : > { %v1652_v60 = vcombine.high %v1651_v51, %v1651_v51 }
 0x3cd   : > { %1654 = vst.msk [vmem:[#allocation7] sm:$0x3] %vm4572_vm2, %v1652_v60 }
 0x3ce PF: > { %s1657_s27 = sshra.s32 %s4198_s0, 3  ;;  %v1696_v29 = vlaneseq  ;;  %v1694_v5 = vld [vmem:[#allocation6] sm:$0x3] }
 0x3cf   : > { %s3037_s3 = sshll.u32 %s1657_s27, 4 }
 0x3d0   : > { %v4590_v11 = vshrl.u32 %v1696_v29, 7  ;;  %s4592_s15 = scalar_lea.vmem [#allocation3], %s3037_s3  ;;  %vm1910_vm3 = vcmp.lt.s32.totalorder %v1696_v29, 256 }
 0x3d1   : > { %v1662_v55 = vld [vmem:[%s4592_s15] sm:$0xff]  ;;  %v1663_v54 = vld [vmem:[%s4592_s15 + $0x8] sm:$0xff]  ;;  %v1664_v24 = vld [vmem:[%s4592_s15 + $0x10] sm:$0xff] }
 0x3d2   : > { %v1698_v7 = vsub.s32 0, %v4590_v11  ;;  %v1702_v14 = vsub.s32 1, %v4590_v11  ;;  %v1665_v3 = vld [vmem:[%s4592_s15 + $0x18] sm:$0xff]  ;;  %v1666_v40 = vld [vmem:[%s4592_s15 + $0x20] sm:$0xff]  ;;  %v1667_v10 = vld [vmem:[%s4592_s15 + $0x28] sm:$0xff] }
 0x3d3   : > { %v1668_v38 = vld [vmem:[%s4592_s15 + $0x30] sm:$0xff]  ;;  %v1669_v20 = vld [vmem:[%s4592_s15 + $0x38] sm:$0xff]  ;;  %v1670_v19 = vld [vmem:[%s4592_s15 + $0x40] sm:$0xff] }
 0x3d4   : > { %v1738_v45 = vld [vmem:[#allocation7] sm:$0x3]  ;;  %v4601_v50 = vrot.slane %v1694_v5, %v1698_v7  ;;  %v4605_v36 = vrot.slane %v1694_v5, %v1702_v14  ;;  %v1671_v12 = vld [vmem:[%s4592_s15 + $0x48] sm:$0xff]  ;;  %v1672_v13 = vld [vmem:[%s4592_s15 + $0x50] sm:$0xff] }
 0x3d5   : > { %v4603_v42 = vrot.slane %v1738_v45, %v1698_v7  ;;  %v4607_v22 = vrot.slane %v1738_v45, %v1702_v14  ;;  %v1673_v59 = vld [vmem:[%s4592_s15 + $0x58] sm:$0xff]  ;;  %v1674_v5 = vld [vmem:[%s4592_s15 + $0x60] sm:$0xff]  ;;  %v1675_v14 = vld [vmem:[%s4592_s15 + $0x68] sm:$0xff] }
 0x3d6   : > { %v1706_v44 = vmul.f32 %v4601_v50, %v1662_v55  ;;  %v1707_v56 = vmul.f32 %v4605_v36, %v1663_v54  ;;  %v1708_v21 = vmul.f32 %v4601_v50, %v1664_v24  ;;  %v1709_v31 = vmul.f32 %v4605_v36, %v1665_v3 }
 0x3d7   : > { %v1710_v15 = vmul.f32 %v4601_v50, %v1666_v40  ;;  %v1711_v39 = vmul.f32 %v4605_v36, %v1667_v10  ;;  %v1712_v47 = vmul.f32 %v4601_v50, %v1668_v38  ;;  %v1713_v4 = vmul.f32 %v4605_v36, %v1669_v20  ;;  %v1676_v38 = vld [vmem:[%s4592_s15 + $0x70] sm:$0xff] }
 0x3d8   : > { %v1750_v48 = vadd.f32 %v4603_v42, %v1706_v44  ;;  %v1751_v26 = vadd.f32 %v4607_v22, %v1707_v56  ;;  %v1752_v8 = vadd.f32 %v4603_v42, %v1708_v21  ;;  %v1753_v35 = vadd.f32 %v4607_v22, %v1709_v31 }
 0x3d9   : > { %v1754_v46 = vadd.f32 %v4603_v42, %v1710_v15  ;;  %v1755_v49 = vadd.f32 %v4607_v22, %v1711_v39  ;;  %v1756_v30 = vadd.f32 %v4603_v42, %v1712_v47  ;;  %v1757_v2 = vadd.f32 %v4607_v22, %v1713_v4 }
 0x3da   : > { %v1782_v37 = vmax.f32 %v1750_v48, 0.0  ;;  %v1783_v34 = vmax.f32 %v1751_v26, 0.0  ;;  %v1784_v43 = vmax.f32 %v1752_v8, 0.0  ;;  %v1785_v57 = vmax.f32 %v1753_v35, 0.0 }
 0x3db   : > { %v1786_v53 = vmax.f32 %v1754_v46, 0.0  ;;  %v1787_v52 = vmax.f32 %v1755_v49, 0.0  ;;  %v1788_v61 = vmax.f32 %v1756_v30, 0.0  ;;  %v1789_v63 = vmax.f32 %v1757_v2, 0.0  ;;  %v1677_v2 = vld [vmem:[%s4592_s15 + $0x78] sm:$0xff] }
 0x3dc   : > { %1814 = vst [vmem:[%s4592_s15] sm:$0xff] %v1782_v37  ;;  %v1914_v41 = vmul.f32 %v1782_v37, %v1782_v37  ;;  %1815 = vst [vmem:[%s4592_s15 + $0x8] sm:$0xff] %v1783_v34  ;;  %v1915_v62 = vmul.f32 %v1783_v34, %v1783_v34  ;;  %v1847_v25 = vadd.f32 %v1784_v43, %v1782_v37 }
 0x3dd   : > { %1816 = vst [vmem:[%s4592_s15 + $0x10] sm:$0xff] %v1784_v43  ;;  %v1916_v58 = vmul.f32 %v1784_v43, %v1784_v43  ;;  %1817 = vst [vmem:[%s4592_s15 + $0x18] sm:$0xff] %v1785_v57  ;;  %v1868_v16 = vadd.f32 %v1785_v57, %v1783_v34  ;;  %v1917_v32 = vmul.f32 %v1785_v57, %v1785_v57 }
 0x3de   : > { %1818 = vst [vmem:[%s4592_s15 + $0x20] sm:$0xff] %v1786_v53  ;;  %v1918_v27 = vmul.f32 %v1786_v53, %v1786_v53  ;;  %1819 = vst [vmem:[%s4592_s15 + $0x28] sm:$0xff] %v1787_v52  ;;  %v1919_v6 = vmul.f32 %v1787_v52, %v1787_v52  ;;  %v1848_v23 = vadd.f32 %v1847_v25, %v1786_v53  ;;  %v1678_v53 = vld [vmem:[%s4592_s15 + $0x80] sm:$0xff] }
 0x3df   : > { %1820 = vst [vmem:[%s4592_s15 + $0x30] sm:$0xff] %v1788_v61  ;;  %1821 = vst [vmem:[%s4592_s15 + $0x38] sm:$0xff] %v1789_v63  ;;  %v1946_v17 = vadd.f32 %v1916_v58, %v1914_v41  ;;  %v1920_v28 = vmul.f32 %v1788_v61, %v1788_v61  ;;  %v1921_v33 = vmul.f32 %v1789_v63, %v1789_v63 }
 0x3e0   : > { %v1967_v9 = vadd.f32 %v1917_v32, %v1915_v62  ;;  %v1869_v18 = vadd.f32 %v1868_v16, %v1787_v52  ;;  %v1714_v51 = vmul.f32 %v4601_v50, %v1670_v19  ;;  %v1715_v60 = vmul.f32 %v4605_v36, %v1671_v12  ;;  %v1679_v12 = vld [vmem:[%s4592_s15 + $0x88] sm:$0xff]  ;;  %v1680_v16 = vld [vmem:[%s4592_s15 + $0x90] sm:$0xff] }
 0x3e1   : > { %v1947_v45 = vadd.f32 %v1946_v17, %v1918_v27  ;;  %v1849_v55 = vadd.f32 %v1848_v23, %v1788_v61  ;;  %v1716_v7 = vmul.f32 %v4601_v50, %v1672_v13  ;;  %v1717_v54 = vmul.f32 %v4605_v36, %v1673_v59 }
 0x3e2   : > { %v1968_v24 = vadd.f32 %v1967_v9, %v1919_v6  ;;  %v1870_v3 = vadd.f32 %v1869_v18, %v1789_v63  ;;  %v1758_v40 = vadd.f32 %v4603_v42, %v1714_v51  ;;  %v1759_v10 = vadd.f32 %v4607_v22, %v1715_v60 }
 0x3e3   : > { %v1948_v20 = vadd.f32 %v1947_v45, %v1920_v28  ;;  %v1760_v44 = vadd.f32 %v4603_v42, %v1716_v7  ;;  %v1761_v56 = vadd.f32 %v4607_v22, %v1717_v54  ;;  %v1718_v21 = vmul.f32 %v4601_v50, %v1674_v5  ;;  %v1682_v5 = vld [vmem:[%s4592_s15 + $0xa0] sm:$0xff] }
 0x3e4   : > { %v1969_v31 = vadd.f32 %v1968_v24, %v1921_v33  ;;  %v1790_v15 = vmax.f32 %v1758_v40, 0.0  ;;  %v1791_v39 = vmax.f32 %v1759_v10, 0.0  ;;  %v1719_v47 = vmul.f32 %v4605_v36, %v1675_v14  ;;  %v1681_v33 = vld [vmem:[%s4592_s15 + $0x98] sm:$0xff]  ;;  %v1683_v10 = vld [vmem:[%s4592_s15 + $0xa8] sm:$0xff] }
 0x3e5   : > { %v1792_v4 = vmax.f32 %v1760_v44, 0.0  ;;  %v1793_v48 = vmax.f32 %v1761_v56, 0.0  ;;  %v1762_v26 = vadd.f32 %v4603_v42, %v1718_v21  ;;  %v1720_v8 = vmul.f32 %v4601_v50, %v1676_v38 }
 0x3e6   : > { %1822 = vst [vmem:[%s4592_s15 + $0x40] sm:$0xff] %v1790_v15  ;;  %v1850_v35 = vadd.f32 %v1849_v55, %v1790_v15  ;;  %v1922_v46 = vmul.f32 %v1790_v15, %v1790_v15  ;;  %1823 = vst [vmem:[%s4592_s15 + $0x48] sm:$0xff] %v1791_v39  ;;  %v1871_v49 = vadd.f32 %v1870_v3, %v1791_v39 }
 0x3e7   : > { %v1923_v30 = vmul.f32 %v1791_v39, %v1791_v39  ;;  %1824 = vst [vmem:[%s4592_s15 + $0x50] sm:$0xff] %v1792_v4  ;;  %v1924_v37 = vmul.f32 %v1792_v4, %v1792_v4  ;;  %1825 = vst [vmem:[%s4592_s15 + $0x58] sm:$0xff] %v1793_v48  ;;  %v1925_v34 = vmul.f32 %v1793_v48, %v1793_v48  ;;  %v1794_v43 = vmax.f32 %v1762_v26, 0.0 }
 0x3e8   : > { %v1763_v57 = vadd.f32 %v4607_v22, %v1719_v47  ;;  %v1949_v52 = vadd.f32 %v1948_v20, %v1922_v46  ;;  %v1851_v63 = vadd.f32 %v1850_v35, %v1792_v4  ;;  %v1872_v41 = vadd.f32 %v1871_v49, %v1793_v48  ;;  %v1685_v35 = vld [vmem:[%s4592_s15 + $0xb8] sm:$0xff]  ;;  %v1686_v46 = vld [vmem:[%s4592_s15 + $0xc0] sm:$0xff] }
 0x3e9   : > { %v1970_v61 = vadd.f32 %v1969_v31, %v1923_v30  ;;  %1826 = vst [vmem:[%s4592_s15 + $0x60] sm:$0xff] %v1794_v43  ;;  %v1926_v62 = vmul.f32 %v1794_v43, %v1794_v43  ;;  %v1764_v58 = vadd.f32 %v4603_v42, %v1720_v8  ;;  %v1721_v19 = vmul.f32 %v4605_v36, %v1677_v2  ;;  %v1684_v8 = vld [vmem:[%s4592_s15 + $0xb0] sm:$0xff] }
 0x3ea   : > { %v1795_v25 = vmax.f32 %v1763_v57, 0.0  ;;  %v1950_v32 = vadd.f32 %v1949_v52, %v1924_v37  ;;  %v1852_v6 = vadd.f32 %v1851_v63, %v1794_v43  ;;  %v1722_v13 = vmul.f32 %v4601_v50, %v1678_v53 }
 0x3eb   : > { %v1971_v27 = vadd.f32 %v1970_v61, %v1925_v34  ;;  %v1796_v23 = vmax.f32 %v1764_v58, 0.0  ;;  %v1765_v28 = vadd.f32 %v4607_v22, %v1721_v19  ;;  %v1723_v51 = vmul.f32 %v4605_v36, %v1679_v12 }
 0x3ec   : > { %1827 = vst [vmem:[%s4592_s15 + $0x68] sm:$0xff] %v1795_v25  ;;  %v1873_v59 = vadd.f32 %v1872_v41, %v1795_v25  ;;  %v1927_v17 = vmul.f32 %v1795_v25, %v1795_v25  ;;  %v1951_v9 = vadd.f32 %v1950_v32, %v1926_v62  ;;  %v1766_v18 = vadd.f32 %v4603_v42, %v1722_v13  ;;  %v1687_v62 = vld [vmem:[%s4592_s15 + $0xc8] sm:$0xff]  ;;  %v1688_v25 = vld [vmem:[%s4592_s15 + $0xd0] sm:$0xff] }
 0x3ed   : > { %v1724_v60 = vmul.f32 %v4601_v50, %v1680_v16  ;;  %1828 = vst [vmem:[%s4592_s15 + $0x70] sm:$0xff] %v1796_v23  ;;  %v1853_v55 = vadd.f32 %v1852_v6, %v1796_v23  ;;  %v1928_v7 = vmul.f32 %v1796_v23, %v1796_v23  ;;  %v1797_v54 = vmax.f32 %v1765_v28, 0.0 }
 0x3ee   : > { %v1972_v45 = vadd.f32 %v1971_v27, %v1927_v17  ;;  %v1798_v14 = vmax.f32 %v1766_v18, 0.0  ;;  %v1767_v24 = vadd.f32 %v4607_v22, %v1723_v51  ;;  %v1725_v40 = vmul.f32 %v4605_v36, %v1681_v33  ;;  %v1689_v33 = vld [vmem:[%s4592_s15 + $0xd8] sm:$0xff] }
 0x3ef   : > { %v1768_v3 = vadd.f32 %v4603_v42, %v1724_v60  ;;  %v1952_v38 = vadd.f32 %v1951_v9, %v1928_v7  ;;  %1829 = vst [vmem:[%s4592_s15 + $0x78] sm:$0xff] %v1797_v54  ;;  %v1874_v20 = vadd.f32 %v1873_v59, %v1797_v54  ;;  %v1929_v44 = vmul.f32 %v1797_v54, %v1797_v54 }
 0x3f0   : > { %v1726_v56 = vmul.f32 %v4601_v50, %v1682_v5  ;;  %1830 = vst [vmem:[%s4592_s15 + $0x80] sm:$0xff] %v1798_v14  ;;  %v1854_v21 = vadd.f32 %v1853_v55, %v1798_v14  ;;  %v1930_v31 = vmul.f32 %v1798_v14, %v1798_v14  ;;  %v1799_v15 = vmax.f32 %v1767_v24, 0.0 }
 0x3f1   : > { %v1800_v39 = vmax.f32 %v1768_v3, 0.0  ;;  %v1973_v47 = vadd.f32 %v1972_v45, %v1929_v44  ;;  %v1769_v4 = vadd.f32 %v4607_v22, %v1725_v40  ;;  %v1727_v26 = vmul.f32 %v4605_v36, %v1683_v10  ;;  %v1690_v40 = vld [vmem:[%s4592_s15 + $0xe0] sm:$0xff] }
 0x3f2   : > { %v1770_v48 = vadd.f32 %v4603_v42, %v1726_v56  ;;  %v1953_v49 = vadd.f32 %v1952_v38, %v1930_v31  ;;  %1831 = vst [vmem:[%s4592_s15 + $0x88] sm:$0xff] %v1799_v15  ;;  %v1875_v30 = vadd.f32 %v1874_v20, %v1799_v15  ;;  %v1931_v2 = vmul.f32 %v1799_v15, %v1799_v15 }
 0x3f3   : > { %1832 = vst [vmem:[%s4592_s15 + $0x90] sm:$0xff] %v1800_v39  ;;  %v1855_v37 = vadd.f32 %v1854_v21, %v1800_v39  ;;  %v1932_v34 = vmul.f32 %v1800_v39, %v1800_v39  ;;  %v1801_v43 = vmax.f32 %v1769_v4, 0.0  ;;  %v1771_v53 = vadd.f32 %v4607_v22, %v1727_v26  ;;  %v1691_v39 = vld [vmem:[%s4592_s15 + $0xe8] sm:$0xff] }
 0x3f4   : > { %v1802_v57 = vmax.f32 %v1770_v48, 0.0  ;;  %v1974_v52 = vadd.f32 %v1973_v47, %v1931_v2  ;;  %v1728_v61 = vmul.f32 %v4601_v50, %v1684_v8  ;;  %v1729_v63 = vmul.f32 %v4605_v36, %v1685_v35  ;;  %v1692_v47 = vld [vmem:[%s4592_s15 + $0xf0] sm:$0xff]  ;;  %v1693_v35 = vld [vmem:[%s4592_s15 + $0xf8] sm:$0xff] }
 0x3f5   : > { %v1730_v41 = vmul.f32 %v4601_v50, %v1686_v46  ;;  %v1954_v58 = vadd.f32 %v1953_v49, %v1932_v34  ;;  %1833 = vst [vmem:[%s4592_s15 + $0x98] sm:$0xff] %v1801_v43  ;;  %v1876_v19 = vadd.f32 %v1875_v30, %v1801_v43  ;;  %v1933_v12 = vmul.f32 %v1801_v43, %v1801_v43 }
 0x3f6   : > { %1834 = vst [vmem:[%s4592_s15 + $0xa0] sm:$0xff] %v1802_v57  ;;  %v1856_v16 = vadd.f32 %v1855_v37, %v1802_v57  ;;  %v1934_v32 = vmul.f32 %v1802_v57, %v1802_v57  ;;  %v1803_v27 = vmax.f32 %v1771_v53, 0.0  ;;  %v1772_v6 = vadd.f32 %v4603_v42, %v1728_v61 }
 0x3f7   : > { %v1773_v13 = vadd.f32 %v4607_v22, %v1729_v63  ;;  %v1975_v59 = vadd.f32 %v1974_v52, %v1933_v12  ;;  %v1774_v17 = vadd.f32 %v4603_v42, %v1730_v41  ;;  %v1731_v23 = vmul.f32 %v4605_v36, %v1687_v62 }
 0x3f8   : > { %v1732_v28 = vmul.f32 %v4601_v50, %v1688_v25  ;;  %v1955_v9 = vadd.f32 %v1954_v58, %v1934_v32  ;;  %1835 = vst [vmem:[%s4592_s15 + $0xa8] sm:$0xff] %v1803_v27  ;;  %v1877_v18 = vadd.f32 %v1876_v19, %v1803_v27  ;;  %v1935_v51 = vmul.f32 %v1803_v27, %v1803_v27 }
 0x3f9   : > { %v1804_v60 = vmax.f32 %v1772_v6, 0.0  ;;  %v1805_v5 = vmax.f32 %v1773_v13, 0.0  ;;  %v1806_v45 = vmax.f32 %v1774_v17, 0.0  ;;  %v1775_v55 = vadd.f32 %v4607_v22, %v1731_v23 }
 0x3fa   : > { %v1776_v7 = vadd.f32 %v4603_v42, %v1732_v28  ;;  %v1976_v54 = vadd.f32 %v1975_v59, %v1935_v51  ;;  %v1733_v3 = vmul.f32 %v4605_v36, %v1689_v33  ;;  %v1734_v8 = vmul.f32 %v4601_v50, %v1690_v40 }
 0x3fb   : > { %1836 = vst [vmem:[%s4592_s15 + $0xb0] sm:$0xff] %v1804_v60  ;;  %v1857_v14 = vadd.f32 %v1856_v16, %v1804_v60  ;;  %v1936_v24 = vmul.f32 %v1804_v60, %v1804_v60  ;;  %1837 = vst [vmem:[%s4592_s15 + $0xb8] sm:$0xff] %v1805_v5  ;;  %v1878_v10 = vadd.f32 %v1877_v18, %v1805_v5  ;;  %v1807_v44 = vmax.f32 %v1775_v55, 0.0 }
 0x3fc   : > { %v1937_v38 = vmul.f32 %v1805_v5, %v1805_v5  ;;  %1838 = vst [vmem:[%s4592_s15 + $0xc0] sm:$0xff] %v1806_v45  ;;  %v1938_v20 = vmul.f32 %v1806_v45, %v1806_v45  ;;  %v1808_v31 = vmax.f32 %v1776_v7, 0.0  ;;  %v1777_v15 = vadd.f32 %v4607_v22, %v1733_v3 }
 0x3fd   : > { %v1956_v56 = vadd.f32 %v1955_v9, %v1936_v24  ;;  %v1858_v21 = vadd.f32 %v1857_v14, %v1806_v45  ;;  %1839 = vst [vmem:[%s4592_s15 + $0xc8] sm:$0xff] %v1807_v44  ;;  %v1879_v48 = vadd.f32 %v1878_v10, %v1807_v44  ;;  %v1939_v26 = vmul.f32 %v1807_v44, %v1807_v44 }
 0x3fe   : > { %v1977_v4 = vadd.f32 %v1976_v54, %v1937_v38  ;;  %1840 = vst [vmem:[%s4592_s15 + $0xd0] sm:$0xff] %v1808_v31  ;;  %v1940_v30 = vmul.f32 %v1808_v31, %v1808_v31  ;;  %v1809_v2 = vmax.f32 %v1777_v15, 0.0  ;;  %v1778_v34 = vadd.f32 %v4603_v42, %v1734_v8 }
 0x3ff   : > { %v1957_v46 = vadd.f32 %v1956_v56, %v1938_v20  ;;  %v1859_v49 = vadd.f32 %v1858_v21, %v1808_v31  ;;  %v1735_v43 = vmul.f32 %v4605_v36, %v1691_v39  ;;  %v1736_v57 = vmul.f32 %v4601_v50, %v1692_v47 }
 0x400   : > { %v1978_v37 = vadd.f32 %v1977_v4, %v1939_v26  ;;  %1841 = vst [vmem:[%s4592_s15 + $0xd8] sm:$0xff] %v1809_v2  ;;  %v1941_v52 = vmul.f32 %v1809_v2, %v1809_v2  ;;  %v1737_v61 = vmul.f32 %v4605_v36, %v1693_v35  ;;  %v1880_v63 = vadd.f32 %v1879_v48, %v1809_v2  ;;  %v1846_v2 = vld [vmem:[#allocation4] sm:$0x3] }
 0x401   : > { %v1958_v53 = vadd.f32 %v1957_v46, %v1940_v30  ;;  %v1810_v41 = vmax.f32 %v1778_v34, 0.0  ;;  %v1779_v62 = vadd.f32 %v4607_v22, %v1735_v43  ;;  %v1780_v25 = vadd.f32 %v4603_v42, %v1736_v57  ;;  %v1913_v43 = vld [vmem:[#allocation5] sm:$0x3] }
 0x402   : > { %v1979_v58 = vadd.f32 %v1978_v37, %v1941_v52  ;;  %v1781_v19 = vadd.f32 %v4607_v22, %v1737_v61  ;;  %v3800_v7 = vmov 1966171168  }
 0x403   : > { %1842 = vst [vmem:[%s4592_s15 + $0xe0] sm:$0xff] %v1810_v41  ;;  %v1860_v12 = vadd.f32 %v1859_v49, %v1810_v41  ;;  %v1942_v50 = vmul.f32 %v1810_v41, %v1810_v41  ;;  %v1811_v16 = vmax.f32 %v1779_v62, 0.0  ;;  %v1812_v32 = vmax.f32 %v1780_v25, 0.0 }
 0x404   : > { %v1813_v27 = vmax.f32 %v1781_v19, 0.0  ;;  %v1893_v54 = vunpack.c.l.s4 %v3800_v7 }
 0x405   : > { %v1959_v6 = vadd.f32 %v1958_v53, %v1942_v50  ;;  %1843 = vst [vmem:[%s4592_s15 + $0xe8] sm:$0xff] %v1811_v16  ;;  %v1881_v36 = vadd.f32 %v1880_v63, %v1811_v16  ;;  %v1943_v13 = vmul.f32 %v1811_v16, %v1811_v16  ;;  %1844 = vst [vmem:[%s4592_s15 + $0xf0] sm:$0xff] %v1812_v32 }
 0x406   : > { %v1861_v59 = vadd.f32 %v1860_v12, %v1812_v32  ;;  %v1944_v17 = vmul.f32 %v1812_v32, %v1812_v32  ;;  %1845 = vst [vmem:[%s4592_s15 + $0xf8] sm:$0xff] %v1813_v27  ;;  %v1945_v23 = vmul.f32 %v1813_v27, %v1813_v27  ;;  %v1894_v56 = vunpack.c.0.s8 %v1893_v54 }
 0x407   : > { %v1980_v42 = vadd.f32 %v1979_v58, %v1943_v13  ;;  %v1882_v33 = vadd.f32 %v1881_v36, %v1813_v27 }
 0x408   : > { %v1862_v28 = vrot.slane %v1861_v59, 4  ;;  %v1960_v9 = vadd.f32 %v1959_v6, %v1944_v17  ;;  %v1897_v48 = vsub.s32 %v1894_v56, %v4590_v11 }
 0x409   : > { %v1883_v18 = vrot.slane %v1882_v33, 4  ;;  %v1981_v51 = vadd.f32 %v1980_v42, %v1945_v23 }
 0x40a   : > { %v1863_v22 = vadd.f32 %v1862_v28, %v1861_v59  ;;  %v1961_v60 = vrot.slane %v1960_v9, 4 }
 0x40b   : > { %v1884_v45 = vadd.f32 %v1883_v18, %v1882_v33  ;;  %v1982_v55 = vrot.slane %v1981_v51, 4 }
 0x40c   : > { %v1864_v5 = vrot.slane %v1863_v22, 2  ;;  %v1962_v14 = vadd.f32 %v1961_v60, %v1960_v9 }
 0x40d   : > { %v1885_v3 = vrot.slane %v1884_v45, 2  ;;  %v1983_v40 = vadd.f32 %v1982_v55, %v1981_v51 }
 0x40e   : > { %v1865_v24 = vadd.f32 %v1864_v5, %v1863_v22  ;;  %v1963_v10 = vrot.slane %v1962_v14, 2 }
 0x40f   : > { %v1886_v38 = vadd.f32 %v1885_v3, %v1884_v45  ;;  %v1984_v20 = vrot.slane %v1983_v40, 2 }
 0x410   : > { %v1866_v44 = vrot.slane %v1865_v24, 1  ;;  %v1964_v21 = vadd.f32 %v1963_v10, %v1962_v14 }
 0x411   : > { %v1887_v15 = vrot.slane %v1886_v38, 1  ;;  %v1985_v39 = vadd.f32 %v1984_v20, %v1983_v40 }
 0x412   : > { %v1867_v31 = vadd.f32 %v1866_v44, %v1865_v24  ;;  %v1965_v47 = vrot.slane %v1964_v21, 1 }
 0x413   : > { %v1888_v4 = vadd.f32 %v1887_v15, %v1886_v38  ;;  %v1986_v26 = vrot.slane %v1985_v39, 1 }
 0x414   : > { %v1966_v8 = vadd.f32 %v1965_v47, %v1964_v21 }
 0x415   : > { %v1891_v35 = vcombine.low %v1867_v31, %v1888_v4  ;;  %v1987_v46 = vadd.f32 %v1986_v26, %v1985_v39 }
 0x417   : > { %v1898_v49 = vrot.slane %v1891_v35, %v1897_v48  ;;  %v1990_v30 = vcombine.low %v1966_v8, %v1987_v46 }
 0x419   : > { %v1905_v37 = vrot.slane %v1898_v49, %v1897_v48  ;;  %v1997_v34 = vrot.slane %v1990_v30, %v1897_v48 }
 0x41b   : > { %v1907_v57 = vadd.f32 %v1905_v37, %v1846_v2  ;;  %v2004_v53 = vrot.slane %v1997_v34, %v1897_v48 }
 0x41d   : > { %1912 = vst.msk [vmem:[#allocation4] sm:$0x3] %vm1910_vm3, %v1907_v57  ;;  %v2006_v52 = vadd.f32 %v2004_v53, %v1913_v43 }
 0x41f   : > { %2007 = vst.msk [vmem:[#allocation5] sm:$0x3] %vm1910_vm3, %v2006_v52 }
 0x420 PF: > { %s5258_s18 = sld [smem:[#allocation24_spill]] }
 0x426   : > { %p2970_p7 = scmp.ne.s32.totalorder %s5258_s18, 2 }
 0x427   : > { %s5259_s24 = sld [smem:[#allocation23_spill]] (!%p2970_p7) }
 0x428   : > { %2011 = sbr.rel (%p2970_p7) target bundleno = 1451 (0x5ab), region = 76 }
 0x42d   : > { %p2971_p9 = scmp.ne.s32.totalorder (!%p2970_p7), %s5259_s24, 0 }
 0x42f   : > { %2014 = sbr.rel (%p2971_p9) target bundleno = 1108 (0x454), region = 80  ;;  %v2015_v11 = vld [vmem:[#allocation4] sm:$0x3] (!%p2971_p9)  ;;  %v2017_v61 = vld [vmem:[#allocation5] sm:$0x3] (!%p2971_p9)  ;;  %v2030_v63 = vlaneseq (!%p2971_p9)  ;;  %v2026_v12 = vcombine.low (!%p2971_p9), %v4203_v0, %v4205_v1 }
 0x430   : > { %v2016_v41 = vmul.f32 (!%p2971_p9), 0.00390625, %v2015_v11  ;;  %v2018_v62 = vmul.f32 (!%p2971_p9), 0.00390625, %v2017_v61  ;;  %v3801_v25 = vmov (!%p2971_p9), 1966171168  }
 0x431   : > { %v2028_v29 = vunpack.c.l.s4 (!%p2971_p9), %v3801_v25  ;;  %v2031_v58 = vshrl.u32 (!%p2971_p9), %v2030_v63, 7  ;;  %vm2047_vm4 = vcmp.lt.s32.totalorder (!%p2971_p9), %v2030_v63, 256 }
 0x432   : > { %v2019_v19 = vmul.f32 (!%p2971_p9), %v2016_v41, %v2016_v41 }
 0x433   : > { %v2029_v50 = vunpack.c.0.s8 (!%p2971_p9), %v2028_v29  ;;  %v2054_v28 = vsub.s32 (!%p2971_p9), 0, %v2031_v58  ;;  %v2058_v33 = vsub.s32 (!%p2971_p9), 1, %v2031_v58 }
 0x434   : > { %v2020_v16 = vsub.f32 (!%p2971_p9), %v2018_v62, %v2019_v19 }
 0x435   : > { %v2032_v32 = vsub.s32 (!%p2971_p9), %v2029_v50, %v2031_v58 }
 0x436   : > { %v2021_v27 = vmax.f32 %v2020_v16, 0.0 }
 0x437   : > { %v2033_v6 = vrot.slane %v2026_v12, %v2032_v32 }
 0x438   : > { %v2022_v36 = vadd.f32 1e-05, %v2021_v27 }
 0x439   : > { %v2034_v13 = vcombine.high %v2033_v6, %v2033_v6 }
 0x43a   : > { %3448 = vrsqrt.f32 %v2022_v36 }
 0x43b   : > { %v2041_v59 = vrot.slane %v2034_v13, %v2032_v32 }
 0x43d   : > { %v2042_v17 = vcombine.high %v2041_v59, %v2041_v59 }
 0x444   : > { %v3449_v23 = vpop.eup %3448 }
 0x445   : > { %v2044_v42 = vmul.f32 %v3449_v23, %v2042_v17 }
 0x447   : > { %2049 = vst.msk [vmem:[#allocation6] sm:$0x3] %vm2047_vm4, %v2044_v42  ;;  %v2050_v9 = vmul.f32 %v2044_v42, %v2016_v41 }
 0x449   : > { %v2055_v22 = vrot.slane %v2050_v9, %v2054_v28  ;;  %v2059_v18 = vrot.slane %v2050_v9, %v2058_v33 }
 0x44b   : > { %v2062_v51 = vsub.f32 %v4203_v0, %v2055_v22  ;;  %v2063_v60 = vsub.f32 %v4205_v1, %v2059_v18 }
 0x44d   : > { %v2066_v5 = vcombine.high %v2062_v51, %v2063_v60 }
 0x44f   : > { %v2073_v45 = vrot.slane %v2066_v5, %v2032_v32 }
 0x451   : > { %v2080_v55 = vrot.slane %v2073_v45, %v2032_v32 }
 0x453   : > { %2082 = vst.msk [vmem:[#allocation7] sm:$0x3] %vm2047_vm4, %v2080_v55 }
 0x454 PF: > { %s5260_s13 = sld [smem:[#allocation25_spill]]  ;;  %s2083_s9 = sshra.s32 %s4198_s0, 3  ;;  %v2122_v7 = vlaneseq  ;;  %v2120_v54 = vld [vmem:[#allocation6] sm:$0x3] }
 0x455   : > { %s3038_s14 = sshll.u32 %s2083_s9, 4 }
 0x456   : > { %v2123_v14 = vshrl.u32 %v2122_v7, 7  ;;  %s4742_s26 = scalar_lea.vmem [#allocation3], %s3038_s14 }
 0x457   : > { %v2088_v0 = vld [vmem:[%s4742_s26] sm:$0xff]  ;;  %v2089_v1 = vld [vmem:[%s4742_s26 + $0x8] sm:$0xff]  ;;  %v2090_v3 = vld [vmem:[%s4742_s26 + $0x10] sm:$0xff] }
 0x458   : > { %v2091_v40 = vld [vmem:[%s4742_s26 + $0x18] sm:$0xff]  ;;  %v2092_v10 = vld [vmem:[%s4742_s26 + $0x20] sm:$0xff]  ;;  %v2093_v38 = vld [vmem:[%s4742_s26 + $0x28] sm:$0xff]  ;;  %v2124_v20 = vsub.s32 0, %v2123_v14  ;;  %v2128_v44 = vsub.s32 1, %v2123_v14 }
 0x459   : > { %v2094_v56 = vld [vmem:[%s4742_s26 + $0x30] sm:$0xff]  ;;  %v2095_v21 = vld [vmem:[%s4742_s26 + $0x38] sm:$0xff]  ;;  %v2096_v31 = vld [vmem:[%s4742_s26 + $0x40] sm:$0xff] }
 0x45a   : > { %s2240_s10 = sadd.s32 1, %s5260_s13  ;;  %v2164_v24 = vld [vmem:[#allocation7] sm:$0x3]  ;;  %v2097_v15 = vld [vmem:[%s4742_s26 + $0x48] sm:$0xff]  ;;  %v2098_v39 = vld [vmem:[%s4742_s26 + $0x50] sm:$0xff]  ;;  %v2125_v4 = vrot.slane %v2120_v54, %v2124_v20  ;;  %v2129_v48 = vrot.slane %v2120_v54, %v2128_v44 }
 0x45b   : > { %v2099_v47 = vld [vmem:[%s4742_s26 + $0x58] sm:$0xff]  ;;  %v2100_v26 = vld [vmem:[%s4742_s26 + $0x60] sm:$0xff]  ;;  %v2101_v8 = vld [vmem:[%s4742_s26 + $0x68] sm:$0xff]  ;;  %v4759_v46 = vrot.slane %v2164_v24, %v2124_v20  ;;  %v4761_v49 = vrot.slane %v2164_v24, %v2128_v44  ;;  %p2974_p3 = scmp.ge.s32.totalorder %s2240_s10, 3 }
 0x45c   : > { %v2102_v35 = vld [vmem:[%s4742_s26 + $0x70] sm:$0xff]  ;;  %v2103_v30 = vld [vmem:[%s4742_s26 + $0x78] sm:$0xff]  ;;  %v2104_v2 = vld [vmem:[%s4742_s26 + $0x80] sm:$0xff]  ;;  %v2132_v34 = vmul.f32 %v2125_v4, %v2088_v0  ;;  %v2133_v43 = vmul.f32 %v2129_v48, %v2089_v1  ;;  %v2134_v57 = vmul.f32 %v2125_v4, %v2090_v3  ;;  %v2135_v53 = vmul.f32 %v2129_v48, %v2091_v40 }
 0x45d   : > { %v2105_v37 = vld [vmem:[%s4742_s26 + $0x88] sm:$0xff]  ;;  %v2106_v52 = vld [vmem:[%s4742_s26 + $0x90] sm:$0xff]  ;;  %v2107_v11 = vld [vmem:[%s4742_s26 + $0x98] sm:$0xff]  ;;  %v2136_v63 = vmul.f32 %v2125_v4, %v2092_v10  ;;  %v2137_v41 = vmul.f32 %v2129_v48, %v2093_v38  ;;  %v2138_v62 = vmul.f32 %v2125_v4, %v2094_v56  ;;  %v2139_v25 = vmul.f32 %v2129_v48, %v2095_v21 }
 0x45e   : > { %v2108_v61 = vld [vmem:[%s4742_s26 + $0xa0] sm:$0xff]  ;;  %v2109_v29 = vld [vmem:[%s4742_s26 + $0xa8] sm:$0xff]  ;;  %v2110_v58 = vld [vmem:[%s4742_s26 + $0xb0] sm:$0xff]  ;;  %v2140_v12 = vmul.f32 %v2125_v4, %v2096_v31  ;;  %v2141_v50 = vmul.f32 %v2129_v48, %v2097_v15  ;;  %v2142_v16 = vmul.f32 %v2125_v4, %v2098_v39  ;;  %v2143_v32 = vmul.f32 %v2129_v48, %v2099_v47 }
 0x45f   : > { %v2111_v19 = vld [vmem:[%s4742_s26 + $0xb8] sm:$0xff]  ;;  %v2112_v27 = vld [vmem:[%s4742_s26 + $0xc0] sm:$0xff]  ;;  %v2113_v6 = vld [vmem:[%s4742_s26 + $0xc8] sm:$0xff]  ;;  %v2144_v13 = vmul.f32 %v2125_v4, %v2100_v26  ;;  %v2145_v59 = vmul.f32 %v2129_v48, %v2101_v8  ;;  %v2146_v17 = vmul.f32 %v2125_v4, %v2102_v35  ;;  %v2147_v23 = vmul.f32 %v2129_v48, %v2103_v30 }
 0x460   : > { %v2114_v36 = vld [vmem:[%s4742_s26 + $0xd0] sm:$0xff]  ;;  %v2115_v42 = vld [vmem:[%s4742_s26 + $0xd8] sm:$0xff]  ;;  %v2116_v28 = vld [vmem:[%s4742_s26 + $0xe0] sm:$0xff]  ;;  %v2148_v9 = vmul.f32 %v2125_v4, %v2104_v2  ;;  %v2149_v22 = vmul.f32 %v2129_v48, %v2105_v37  ;;  %v2150_v18 = vmul.f32 %v2125_v4, %v2106_v52  ;;  %v2151_v51 = vmul.f32 %v2129_v48, %v2107_v11 }
 0x461   : > { %v2117_v33 = vld [vmem:[%s4742_s26 + $0xe8] sm:$0xff]  ;;  %v2118_v60 = vld [vmem:[%s4742_s26 + $0xf0] sm:$0xff]  ;;  %v2119_v5 = vld [vmem:[%s4742_s26 + $0xf8] sm:$0xff]  ;;  %v2152_v45 = vmul.f32 %v2125_v4, %v2108_v61  ;;  %v2153_v55 = vmul.f32 %v2129_v48, %v2109_v29  ;;  %v2154_v7 = vmul.f32 %v2125_v4, %v2110_v58  ;;  %v2155_v54 = vmul.f32 %v2129_v48, %v2111_v19 }
 0x462   : > { %v2156_v14 = vmul.f32 %v2125_v4, %v2112_v27  ;;  %v2157_v24 = vmul.f32 %v2129_v48, %v2113_v6  ;;  %v2158_v0 = vmul.f32 %v2125_v4, %v2114_v36  ;;  %v2159_v1 = vmul.f32 %v2129_v48, %v2115_v42 }
 0x463   : > { %v2160_v3 = vmul.f32 %v2125_v4, %v2116_v28  ;;  %v2161_v40 = vmul.f32 %v2129_v48, %v2117_v33  ;;  %v2162_v10 = vmul.f32 %v2125_v4, %v2118_v60  ;;  %v2163_v38 = vmul.f32 %v2129_v48, %v2119_v5  ;;  %v3452_v28 = vld [vmem:[%s4186_s6] ss:$8 sps:$4 sm:$0xff] (!%p2974_p3)  }
 0x464   : > { %v4781_v20 = vadd.f32 %v4759_v46, %v2132_v34  ;;  %v4784_v44 = vadd.f32 %v4761_v49, %v2133_v43  ;;  %v4787_v56 = vadd.f32 %v4759_v46, %v2134_v57  ;;  %v4790_v21 = vadd.f32 %v4761_v49, %v2135_v53 }
 0x465   : > { %v4793_v31 = vadd.f32 %v4759_v46, %v2136_v63  ;;  %v4796_v15 = vadd.f32 %v4761_v49, %v2137_v41  ;;  %v4799_v39 = vadd.f32 %v4759_v46, %v2138_v62  ;;  %v4802_v47 = vadd.f32 %v4761_v49, %v2139_v25 }
 0x466   : > { %v4805_v4 = vadd.f32 %v4759_v46, %v2140_v12  ;;  %v4808_v48 = vadd.f32 %v4761_v49, %v2141_v50  ;;  %v4811_v26 = vadd.f32 %v4759_v46, %v2142_v16  ;;  %v4814_v8 = vadd.f32 %v4761_v49, %v2143_v32 }
 0x467   : > { %v4817_v35 = vadd.f32 %v4759_v46, %v2144_v13  ;;  %v4820_v30 = vadd.f32 %v4761_v49, %v2145_v59  ;;  %v4823_v2 = vadd.f32 %v4759_v46, %v2146_v17  ;;  %v4826_v37 = vadd.f32 %v4761_v49, %v2147_v23 }
 0x468   : > { %v4829_v34 = vadd.f32 %v4759_v46, %v2148_v9  ;;  %v4832_v43 = vadd.f32 %v4761_v49, %v2149_v22  ;;  %v4835_v57 = vadd.f32 %v4759_v46, %v2150_v18  ;;  %v4838_v53 = vadd.f32 %v4761_v49, %v2151_v51  ;;  %v3450_v9 = vld [vmem:[%s4186_s6 + $0x4] ss:$8 sps:$4 sm:$0xff] (!%p2974_p3)  }
 0x469   : > { %v4841_v52 = vadd.f32 %v4759_v46, %v2152_v45  ;;  %v4844_v11 = vadd.f32 %v4761_v49, %v2153_v55  ;;  %v4847_v61 = vadd.f32 %v4759_v46, %v2154_v7  ;;  %v4850_v63 = vadd.f32 %v4761_v49, %v2155_v54  ;;  %2453 = vmatprep.subr.bf16.mxu0 (!%p2974_p3), %v3450_v9  ;;  %v3456_v22 = vld [vmem:[%s4186_s6 + $0x24] ss:$8 sps:$4 sm:$0xff] (!%p2974_p3)  }
 0x46a   : > { %v4853_v41 = vadd.f32 %v4759_v46, %v2156_v14  ;;  %v4856_v62 = vadd.f32 %v4761_v49, %v2157_v24  ;;  %v4859_v25 = vadd.f32 %v4759_v46, %v2158_v0  ;;  %v4862_v29 = vadd.f32 %v4761_v49, %v2159_v1  ;;  %3121 = vmatprep.subr.bf16.mxu1 (!%p2974_p3), %v3450_v9  ;;  %v3459_v9 = vld [vmem:[%s4186_s6 + $0x34] ss:$8 sps:$4 sm:$0xff] (!%p2974_p3)  }
 0x46b   : > { %v4865_v58 = vadd.f32 %v4759_v46, %v2160_v3  ;;  %v4868_v19 = vadd.f32 %v4761_v49, %v2161_v40  ;;  %v4871_v12 = vadd.f32 %v4759_v46, %v2162_v10  ;;  %v4874_v50 = vadd.f32 %v4761_v49, %v2163_v38  ;;  %v3453_v38 = vld [vmem:[%s4186_s6 + $0x14] ss:$8 sps:$4 sm:$0xff] (!%p2974_p3)   ;;  %2454 = vmatpush1.bf16.msra.mxu0 (!%p2974_p3), %v3452_v28  ;;  %v3455_v40 = vld [vmem:[%s4186_s6 + $0x10] ss:$8 sps:$4 sm:$0xff] (!%p2974_p3)  }
 0x46c   : > { %v2208_v16 = vmax.f32 %v4781_v20, 0.0  ;;  %v2209_v32 = vmax.f32 %v4784_v44, 0.0  ;;  %v2210_v27 = vmax.f32 %v4787_v56, 0.0  ;;  %v5193_v6 = vmax.f32 %v4790_v21, 0.0  ;;  %2244 = sbr.rel (%p2974_p3) target bundleno = 1438 (0x59e), region = 84  ;;  %3137 = vmatpush1.bf16.msra.mxu1 (!%p2974_p3), %v3452_v28  ;;  %2455 = vmatprep.subr.bf16.mxu0 (!%p2974_p3), %v3453_v38 }
 0x46d   : > { %v2212_v36 = vmax.f32 %v4793_v31, 0.0  ;;  %v2213_v13 = vmax.f32 %v4796_v15, 0.0  ;;  %v2214_v59 = vmax.f32 %v4799_v39, 0.0  ;;  %v2215_v46 = vmax.f32 %v4802_v47, 0.0  ;;  %3122 = vmatprep.subr.bf16.mxu1 (!%p2974_p3), %v3453_v38  ;;  %v3461_v28 = vld [vmem:[%s4186_s6 + $0x30] ss:$8 sps:$4 sm:$0xff] (!%p2974_p3)  }
 0x46e   : > { %v2216_v17 = vmax.f32 %v4805_v4, 0.0  ;;  %v2217_v49 = vmax.f32 %v4808_v48, 0.0  ;;  %v2218_v23 = vmax.f32 %v4811_v26, 0.0  ;;  %v2219_v42 = vmax.f32 %v4814_v8, 0.0  ;;  %v3462_v38 = vld [vmem:[%s4186_s6 + $0x44] ss:$8 sps:$4 sm:$0xff] (!%p2974_p3)  }
 0x46f   : > { %v2221_v33 = vmax.f32 %v4820_v30, 0.0  ;;  %v2224_v18 = vmax.f32 %v4829_v34, 0.0  ;;  %v2225_v51 = vmax.f32 %v4832_v43, 0.0  ;;  %v5203_v60 = vmax.f32 %v4835_v57, 0.0  ;;  %2456 = vmatpush1.bf16.msra.mxu0 (!%p2974_p3), %v3455_v40 }
 0x470   : > { %v5202_v5 = vmax.f32 %v4838_v53, 0.0  ;;  %v5201_v45 = vmax.f32 %v4841_v52, 0.0  ;;  %v5200_v55 = vmax.f32 %v4844_v11, 0.0  ;;  %v5199_v7 = vmax.f32 %v4847_v61, 0.0  ;;  %3138 = vmatpush1.bf16.msra.mxu1 (!%p2974_p3), %v3455_v40  ;;  %2457 = vmatprep.subr.bf16.mxu0 (!%p2974_p3), %v3456_v22  ;;  %v3465_v40 = vld [vmem:[%s4186_s6 + $0x54] ss:$8 sps:$4 sm:$0xff] (!%p2974_p3)  }
 0x471   : > { %v5198_v54 = vmax.f32 %v4850_v63, 0.0  ;;  %v5197_v14 = vmax.f32 %v4853_v41, 0.0  ;;  %v5195_v24 = vmax.f32 %v4856_v62, 0.0  ;;  %v5196_v0 = vmax.f32 %v4859_v25, 0.0  ;;  %3123 = vmatprep.subr.bf16.mxu1 (!%p2974_p3), %v3456_v22  ;;  %v3467_v22 = vld [vmem:[%s4186_s6 + $0x50] ss:$8 sps:$4 sm:$0xff] (!%p2974_p3)  }
 0x472   : > { %v5194_v1 = vmax.f32 %v4862_v29, 0.0  ;;  %v2246_v3 = vpack.c.bf16 (!%p2974_p3), %v5193_v6, %v2209_v32  ;;  %v2254_v10 = vpack.c.bf16 (!%p2974_p3), %v5202_v5, %v2225_v51  ;;  %v3458_v6 = vld [vmem:[%s4186_s6 + $0x20] ss:$8 sps:$4 sm:$0xff] (!%p2974_p3)  }
 0x473   : > { %2458 = vmatpush1.bf16.msra.mxu0 %v3458_v6 }
 0x474   : > { %2485 = vmatprep.mubr.bf16.mxu0 %v2246_v3  ;;  %2525 = vmatprep.mubr.bf16.mxu1 %v2254_v10  ;;  %v3464_v3 = vld [vmem:[%s4186_s6 + $0x40] ss:$8 sps:$4 sm:$0xff]  }
 0x475   : > { %3139 = vmatpush1.bf16.msra.mxu1 %v3458_v6  ;;  %2459 = vmatprep.subr.bf16.mxu0 %v3459_v9  ;;  %v3468_v6 = vld [vmem:[%s4186_s6 + $0x64] ss:$8 sps:$4 sm:$0xff]   ;;  %v3470_v10 = vld [vmem:[%s4186_s6 + $0x60] ss:$8 sps:$4 sm:$0xff]  }
 0x476   : > { %3124 = vmatprep.subr.bf16.mxu1 %v3459_v9  ;;  %v3471_v9 = vld [vmem:[%s4186_s6 + $0x74] ss:$8 sps:$4 sm:$0xff]  }
 0x477   : > { %2460 = vmatpush1.bf16.msra.mxu0 %v3461_v28 }
 0x478   : > { %2461 = vmatprep.subr.bf16.mxu0 %v3462_v38 }
 0x479   : > { %3140 = vmatpush1.bf16.msra.mxu1 %v3461_v28  ;;  %v3473_v28 = vld [vmem:[%s4186_s6 + $0x70] ss:$8 sps:$4 sm:$0xff]  }
 0x47a   : > { %3125 = vmatprep.subr.bf16.mxu1 %v3462_v38  ;;  %v3474_v38 = vld [vmem:[%s4186_s6 + $0x84] ss:$8 sps:$4 sm:$0xff]  }
 0x47b   : > { %2462 = vmatpush1.bf16.msra.mxu0 %v3464_v3 }
 0x47c   : > { %2463 = vmatprep.subr.bf16.mxu0 %v3465_v40 }
 0x47d   : > { %3141 = vmatpush1.bf16.msra.mxu1 %v3464_v3  ;;  %v3476_v3 = vld [vmem:[%s4186_s6 + $0x80] ss:$8 sps:$4 sm:$0xff]  }
 0x47e   : > { %3126 = vmatprep.subr.bf16.mxu1 %v3465_v40  ;;  %v3477_v40 = vld [vmem:[%s4186_s6 + $0x94] ss:$8 sps:$4 sm:$0xff]  }
 0x47f   : > { %2464 = vmatpush1.bf16.msra.mxu0 %v3467_v22 }
 0x480   : > { %2465 = vmatprep.subr.bf16.mxu0 %v3468_v6 }
 0x481   : > { %3142 = vmatpush1.bf16.msra.mxu1 %v3467_v22  ;;  %v3479_v22 = vld [vmem:[%s4186_s6 + $0x90] ss:$8 sps:$4 sm:$0xff]  }
 0x482   : > { %3127 = vmatprep.subr.bf16.mxu1 %v3468_v6  ;;  %v3480_v6 = vld [vmem:[%s4186_s6 + $0xa4] ss:$8 sps:$4 sm:$0xff]  }
 0x483   : > { %2466 = vmatpush1.bf16.msra.mxu0 %v3470_v10 }
 0x484   : > { %2467 = vmatprep.subr.bf16.mxu0 %v3471_v9 }
 0x485   : > { %3143 = vmatpush1.bf16.msra.mxu1 %v3470_v10  ;;  %v3482_v10 = vld [vmem:[%s4186_s6 + $0xa0] ss:$8 sps:$4 sm:$0xff]  }
 0x486   : > { %3128 = vmatprep.subr.bf16.mxu1 %v3471_v9  ;;  %v3483_v9 = vld [vmem:[%s4186_s6 + $0xb4] ss:$8 sps:$4 sm:$0xff]  }
 0x487   : > { %2468 = vmatpush1.bf16.msra.mxu0 %v3473_v28 }
 0x488   : > { %2469 = vmatprep.subr.bf16.mxu0 %v3474_v38 }
 0x489   : > { %3144 = vmatpush1.bf16.msra.mxu1 %v3473_v28  ;;  %v3485_v28 = vld [vmem:[%s4186_s6 + $0xb0] ss:$8 sps:$4 sm:$0xff]  }
 0x48a   : > { %3129 = vmatprep.subr.bf16.mxu1 %v3474_v38  ;;  %v3486_v38 = vld [vmem:[%s4186_s6 + $0xc4] ss:$8 sps:$4 sm:$0xff]  }
 0x48b   : > { %2470 = vmatpush1.bf16.msra.mxu0 %v3476_v3 }
 0x48c   : > { %2471 = vmatprep.subr.bf16.mxu0 %v3477_v40 }
 0x48d   : > { %3145 = vmatpush1.bf16.msra.mxu1 %v3476_v3  ;;  %v3488_v3 = vld [vmem:[%s4186_s6 + $0xc0] ss:$8 sps:$4 sm:$0xff]  }
 0x48e   : > { %3130 = vmatprep.subr.bf16.mxu1 %v3477_v40  ;;  %v3489_v40 = vld [vmem:[%s4186_s6 + $0xd4] ss:$8 sps:$4 sm:$0xff]  }
 0x48f   : > { %2472 = vmatpush1.bf16.msra.mxu0 %v3479_v22 }
 0x490   : > { %2473 = vmatprep.subr.bf16.mxu0 %v3480_v6 }
 0x491   : > { %3146 = vmatpush1.bf16.msra.mxu1 %v3479_v22  ;;  %v3491_v22 = vld [vmem:[%s4186_s6 + $0xd0] ss:$8 sps:$4 sm:$0xff]  }
 0x492   : > { %3131 = vmatprep.subr.bf16.mxu1 %v3480_v6  ;;  %v3492_v6 = vld [vmem:[%s4186_s6 + $0xe4] ss:$8 sps:$4 sm:$0xff]  }
 0x493   : > { %2474 = vmatpush1.bf16.msra.mxu0 %v3482_v10 }
 0x494   : > { %2475 = vmatprep.subr.bf16.mxu0 %v3483_v9 }
 0x495   : > { %3147 = vmatpush1.bf16.msra.mxu1 %v3482_v10  ;;  %v3494_v10 = vld [vmem:[%s4186_s6 + $0xe0] ss:$8 sps:$4 sm:$0xff]  }
 0x496   : > { %3132 = vmatprep.subr.bf16.mxu1 %v3483_v9  ;;  %v3495_v9 = vld [vmem:[%s4186_s6 + $0xf4] ss:$8 sps:$4 sm:$0xff]  }
 0x497   : > { %2476 = vmatpush1.bf16.msra.mxu0 %v3485_v28 }
 0x498   : > { %2477 = vmatprep.subr.bf16.mxu0 %v3486_v38 }
 0x499   : > { %3148 = vmatpush1.bf16.msra.mxu1 %v3485_v28  ;;  %v3497_v28 = vld [vmem:[%s4186_s6 + $0xf0] ss:$8 sps:$4 sm:$0xff]   ;;  %s5007_s6 = scalar_lea.vmem [#allocation2], %s4198_s0 }
 0x49a   : > { %3133 = vmatprep.subr.bf16.mxu1 %v3486_v38  ;;  %v2245_v38 = vpack.c.bf16 %v2210_v27, %v2208_v16 }
 0x49b   : > { %2478 = vmatpush1.bf16.msra.mxu0 %v3488_v3 }
 0x49c   : > { %2479 = vmatprep.subr.bf16.mxu0 %v3489_v40 }
 0x49d   : > { %3149 = vmatpush1.bf16.msra.mxu1 %v3488_v3  ;;  %v2253_v3 = vpack.c.bf16 %v5203_v60, %v2224_v18 }
 0x49e   : > { %3134 = vmatprep.subr.bf16.mxu1 %v3489_v40  ;;  %v2248_v40 = vpack.c.bf16 %v2215_v46, %v2213_v13 }
 0x49f   : > { %2480 = vmatpush1.bf16.msra.mxu0 %v3491_v22 }
 0x4a0   : > { %2481 = vmatprep.subr.bf16.mxu0 %v3492_v6 }
 0x4a1   : > { %3150 = vmatpush1.bf16.msra.mxu1 %v3491_v22  ;;  %v2256_v22 = vpack.c.bf16 %v5198_v54, %v5200_v55 }
 0x4a2   : > { %3135 = vmatprep.subr.bf16.mxu1 %v3492_v6  ;;  %v2247_v6 = vpack.c.bf16 %v2214_v59, %v2212_v36 }
 0x4a3   : > { %2482 = vmatpush1.bf16.msra.mxu0 %v3494_v10 }
 0x4a4   : > { %2483 = vmatprep.subr.bf16.mxu0 %v3495_v9 }
 0x4a5   : > { %3151 = vmatpush1.bf16.msra.mxu1 %v3494_v10  ;;  %v2255_v10 = vpack.c.bf16 %v5199_v7, %v5201_v45 }
 0x4a6   : > { %3136 = vmatprep.subr.bf16.mxu1 %v3495_v9  ;;  %v2250_v9 = vpack.c.bf16 %v2219_v42, %v2217_v49 }
 0x4a7   : > { %2484 = vmatpush1.bf16.msra.mxu0 %v3497_v28 }
 0x4a9   : > { %3152 = vmatpush1.bf16.msra.mxu1 %v3497_v28  ;;  %v2258_v28 = vpack.c.bf16 %v5194_v1, %v5195_v24  ;;  %v5265_v1 = vmax.f32 %v4823_v2, 0.0 }
 0x4aa   : > { %2486 = vmatmul.mubr.bf16.vlgmr.msra.gmra.mrb[0].mxu0 %v2245_v38  ;;  %v2249_v38 = vpack.c.bf16 %v2218_v23, %v2216_v17 }
 0x4ab   : > { %2495 = vmatprep.mubr.bf16.mxu0 %v2248_v40  ;;  %v5261_v40 = vmax.f32 %v4826_v37, 0.0 }
 0x4ac   : > { %2526 = vmatmul.mubr.bf16.vlgmr.msra.gmra.mrb[0].mxu1 %v2253_v3  ;;  %v2257_v3 = vpack.c.bf16 %v5196_v0, %v5197_v14  ;;  %v5266_v0 = vmax.f32 %v4865_v58, 0.0  ;;  %v5267_v14 = vmax.f32 %v4871_v12, 0.0 }
 0x4ad   : > { %2535 = vmatprep.mubr.bf16.mxu1 %v2256_v22  ;;  %v2252_v22 = vpack.c.bf16 %v5261_v40, %v2221_v33 }
 0x4ae   : > { %v2259_v40 = vpack.c.bf16 %v5267_v14, %v5266_v0 }
 0x4b2   : > { %2496 = vmatmul.mubr.bf16.gmra.mrb[4].mxu0 %v2247_v6  ;;  %v5262_v6 = vmax.f32 %v4868_v19, 0.0 }
 0x4b3   : > { %2505 = vmatprep.mubr.bf16.mxu0 %v2250_v9 }
 0x4b4   : > { %2536 = vmatmul.mubr.bf16.gmra.mrb[4].mxu1 %v2255_v10  ;;  %v5263_v10 = vmax.f32 %v4874_v50, 0.0 }
 0x4b5   : > { %2545 = vmatprep.mubr.bf16.mxu1 %v2258_v28  ;;  %v5264_v28 = vmax.f32 %v4817_v35, 0.0 }
 0x4b6   : > { %v2260_v9 = vpack.c.bf16 %v5263_v10, %v5262_v6 }
 0x4b7   : > { %v2251_v24 = vpack.c.bf16 %v5265_v1, %v5264_v28 }
 0x4ba   : > { %2506 = vmatmul.mubr.bf16.gmra.mrb[8].mxu0 %v2249_v38 }
 0x4bb   : > { %2515 = vmatprep.mubr.bf16.mxu0 %v2252_v22 }
 0x4bc   : > { %2546 = vmatmul.mubr.bf16.gmra.mrb[8].mxu1 %v2257_v3 }
 0x4bd   : > { %2555 = vmatprep.mubr.bf16.mxu1 %v2260_v9 }
 0x4c2   : > { %2516 = vmatmul.mubr.bf16.gmra.mrb[12].mxu0 %v2251_v24 }
 0x4c4   : > { %2556 = vmatmul.mubr.bf16.gmra.mrb[12].mxu1 %v2259_v40 }
 0x57d   : > { %v2487_v54 = vpop.f32.mrb[0].mxu0 }
 0x57e   : > { %v2489_v6 = vpop.f32.mrb[1].mxu0 }
 0x57f   : > { %v2527_v7 = vpop.f32.mrb[0].mxu1  ;;  %v2491_v3 = vpop.f32.mrb[2].mxu0 }
 0x580   : > { %v2529_v38 = vpop.f32.mrb[1].mxu1  ;;  %v2566_v10 = vpack.c.bf16 %v2491_v3, %v2487_v54  ;;  %v2493_v55 = vpop.f32.mrb[3].mxu0 }
 0x581   : > { %v2531_v22 = vpop.f32.mrb[2].mxu1  ;;  %v2567_v5 = vpack.c.bf16 %v2493_v55, %v2489_v6 }
 0x582   : > { %v2574_v9 = vpack.c.bf16 %v2531_v22, %v2527_v7  ;;  %v2533_v45 = vpop.f32.mrb[3].mxu1  ;;  %2587 = vst [vmem:[%s5007_s6] sm:$0xff] %v2566_v10 }
 0x583   : > { %v2575_v1 = vpack.c.bf16 %v2533_v45, %v2529_v38  ;;  %2588 = vst [vmem:[%s5007_s6 + $0x8] sm:$0xff] %v2567_v5 }
 0x584   : > { %2595 = vst [vmem:[%s5007_s6 + $0x40] sm:$0xff] %v2574_v9 }
 0x585   : > { %2596 = vst [vmem:[%s5007_s6 + $0x48] sm:$0xff] %v2575_v1  ;;  %v2497_v54 = vpop.f32.mrb[4].mxu0 }
 0x586   : > { %v2499_v14 = vpop.f32.mrb[5].mxu0 }
 0x587   : > { %v2537_v7 = vpop.f32.mrb[4].mxu1  ;;  %v2501_v55 = vpop.f32.mrb[6].mxu0 }
 0x588   : > { %v2539_v24 = vpop.f32.mrb[5].mxu1  ;;  %v2568_v0 = vpack.c.bf16 %v2501_v55, %v2497_v54  ;;  %v2503_v40 = vpop.f32.mrb[7].mxu0 }
 0x589   : > { %v2541_v45 = vpop.f32.mrb[6].mxu1  ;;  %v2569_v38 = vpack.c.bf16 %v2503_v40, %v2499_v14 }
 0x58a   : > { %v2576_v28 = vpack.c.bf16 %v2541_v45, %v2537_v7  ;;  %v2543_v6 = vpop.f32.mrb[7].mxu1  ;;  %2589 = vst [vmem:[%s5007_s6 + $0x10] sm:$0xff] %v2568_v0 }
 0x58b   : > { %v2577_v3 = vpack.c.bf16 %v2543_v6, %v2539_v24  ;;  %2590 = vst [vmem:[%s5007_s6 + $0x18] sm:$0xff] %v2569_v38 }
 0x58c   : > { %2597 = vst [vmem:[%s5007_s6 + $0x50] sm:$0xff] %v2576_v28 }
 0x58d   : > { %2598 = vst [vmem:[%s5007_s6 + $0x58] sm:$0xff] %v2577_v3  ;;  %v2507_v5 = vpop.f32.mrb[8].mxu0 }
 0x58e   : > { %v2509_v10 = vpop.f32.mrb[9].mxu0 }
 0x58f   : > { %v2547_v22 = vpop.f32.mrb[8].mxu1  ;;  %v2511_v1 = vpop.f32.mrb[10].mxu0 }
 0x590   : > { %v2549_v9 = vpop.f32.mrb[9].mxu1  ;;  %v2570_v54 = vpack.c.bf16 %v2511_v1, %v2507_v5  ;;  %v2513_v55 = vpop.f32.mrb[11].mxu0 }
 0x591   : > { %v2551_v60 = vpop.f32.mrb[10].mxu1  ;;  %v2571_v14 = vpack.c.bf16 %v2513_v55, %v2509_v10 }
 0x592   : > { %v2578_v7 = vpack.c.bf16 %v2551_v60, %v2547_v22  ;;  %v2553_v45 = vpop.f32.mrb[11].mxu1  ;;  %2591 = vst [vmem:[%s5007_s6 + $0x20] sm:$0xff] %v2570_v54 }
 0x593   : > { %v2579_v24 = vpack.c.bf16 %v2553_v45, %v2549_v9  ;;  %2592 = vst [vmem:[%s5007_s6 + $0x28] sm:$0xff] %v2571_v14 }
 0x594   : > { %2599 = vst [vmem:[%s5007_s6 + $0x60] sm:$0xff] %v2578_v7 }
 0x595   : > { %2600 = vst [vmem:[%s5007_s6 + $0x68] sm:$0xff] %v2579_v24  ;;  %v2517_v0 = vpop.f32.mrb[12].mxu0 }
 0x596   : > { %v2519_v40 = vpop.f32.mrb[13].mxu0 }
 0x597   : > { %v2557_v28 = vpop.f32.mrb[12].mxu1  ;;  %v2521_v38 = vpop.f32.mrb[14].mxu0 }
 0x598   : > { %v2559_v6 = vpop.f32.mrb[13].mxu1  ;;  %v2572_v5 = vpack.c.bf16 %v2521_v38, %v2517_v0  ;;  %v2523_v22 = vpop.f32.mrb[15].mxu0 }
 0x599   : > { %v2561_v3 = vpop.f32.mrb[14].mxu1  ;;  %v2573_v10 = vpack.c.bf16 %v2523_v22, %v2519_v40 }
 0x59a   : > { %v2580_v60 = vpack.c.bf16 %v2561_v3, %v2557_v28  ;;  %v2563_v1 = vpop.f32.mrb[15].mxu1  ;;  %2593 = vst [vmem:[%s5007_s6 + $0x30] sm:$0xff] %v2572_v5 }
 0x59b   : > { %v2581_v9 = vpack.c.bf16 %v2563_v1, %v2559_v6  ;;  %2594 = vst [vmem:[%s5007_s6 + $0x38] sm:$0xff] %v2573_v10 }
 0x59c   : > { %2601 = vst [vmem:[%s5007_s6 + $0x70] sm:$0xff] %v2580_v60 }
 0x59d   : > { %2602 = vst [vmem:[%s5007_s6 + $0x78] sm:$0xff] %v2581_v9 }
 0x59e PF: > { %p3009_p12 = scmp.ne.s32.totalorder %s2240_s10, 3 }
 0x59f   : > { %v3040_v54 = vpack.c.bf16 (!%p3009_p12), %v2209_v32, %v2208_v16  ;;  %v5269_v7 = vmax.f32 (!%p3009_p12), %v4790_v21, 0.0  ;;  %v3042_v45 = vpack.c.bf16 (!%p3009_p12), %v2213_v13, %v2212_v36  ;;  %v3043_v14 = vpack.c.bf16 (!%p3009_p12), %v2215_v46, %v2214_v59  ;;  %s2704_s21 = scalar_lea.vmem (!%p3009_p12), [#allocation15], %s4198_s0 }
 0x5a0   : > { %2606 = sbr.rel (%p3009_p12) target bundleno = 1451 (0x5ab), region = 88  ;;  %v3044_v20 = vpack.c.bf16 (!%p3009_p12), %v2217_v49, %v2216_v17  ;;  %v3045_v44 = vpack.c.bf16 (!%p3009_p12), %v2219_v42, %v2218_v23  ;;  %v5270_v56 = vmax.f32 (!%p3009_p12), %v4817_v35, 0.0  ;;  %v5271_v31 = vmax.f32 (!%p3009_p12), %v4823_v2, 0.0 }
 0x5a1   : > { %v3041_v55 = vpack.c.bf16 (!%p3009_p12), %v5269_v7, %v2210_v27  ;;  %v5272_v15 = vmax.f32 (!%p3009_p12), %v4826_v37, 0.0  ;;  %2705 = vst [vmem:[%s2704_s21] sm:$0xff] (!%p3009_p12), %v3040_v54  ;;  %2707 = vst [vmem:[%s2704_s21 + $0x10] sm:$0xff] (!%p3009_p12), %v3042_v45  ;;  %v3048_v47 = vpack.c.bf16 (!%p3009_p12), %v2225_v51, %v2224_v18  ;;  %v5273_v4 = vmax.f32 (!%p3009_p12), %v4835_v57, 0.0 }
 0x5a2   : > { %v3046_v21 = vpack.c.bf16 (!%p3009_p12), %v2221_v33, %v5270_v56  ;;  %2708 = vst [vmem:[%s2704_s21 + $0x18] sm:$0xff] (!%p3009_p12), %v3043_v14  ;;  %v5274_v48 = vmax.f32 (!%p3009_p12), %v4838_v53, 0.0  ;;  %v5275_v8 = vmax.f32 (!%p3009_p12), %v4841_v52, 0.0  ;;  %v5276_v35 = vmax.f32 (!%p3009_p12), %v4844_v11, 0.0  ;;  %2709 = vst [vmem:[%s2704_s21 + $0x20] sm:$0xff] (!%p3009_p12), %v3044_v20 }
 0x5a3   : > { %v3047_v39 = vpack.c.bf16 (!%p3009_p12), %v5272_v15, %v5271_v31  ;;  %2706 = vst [vmem:[%s2704_s21 + $0x8] sm:$0xff] (!%p3009_p12), %v3041_v55  ;;  %v5277_v2 = vmax.f32 (!%p3009_p12), %v4847_v61, 0.0  ;;  %v5278_v37 = vmax.f32 (!%p3009_p12), %v4850_v63, 0.0  ;;  %2710 = vst [vmem:[%s2704_s21 + $0x28] sm:$0xff] (!%p3009_p12), %v3045_v44  ;;  %v5279_v34 = vmax.f32 (!%p3009_p12), %v4853_v41, 0.0 }
 0x5a4   : > { %v3049_v26 = vpack.c.bf16 (!%p3009_p12), %v5274_v48, %v5273_v4  ;;  %v3050_v30 = vpack.c.bf16 (!%p3009_p12), %v5276_v35, %v5275_v8  ;;  %2711 = vst [vmem:[%s2704_s21 + $0x30] sm:$0xff] (!%p3009_p12), %v3046_v21  ;;  %v5280_v43 = vmax.f32 (!%p3009_p12), %v4856_v62, 0.0  ;;  %v5281_v53 = vmax.f32 (!%p3009_p12), %v4859_v25, 0.0  ;;  %2713 = vst [vmem:[%s2704_s21 + $0x40] sm:$0xff] (!%p3009_p12), %v3048_v47 }
 0x5a5   : > { %v3051_v16 = vpack.c.bf16 (!%p3009_p12), %v5278_v37, %v5277_v2  ;;  %2712 = vst [vmem:[%s2704_s21 + $0x38] sm:$0xff] (!%p3009_p12), %v3047_v39  ;;  %v5282_v52 = vmax.f32 (!%p3009_p12), %v4862_v29, 0.0  ;;  %v5283_v32 = vmax.f32 (!%p3009_p12), %v4865_v58, 0.0  ;;  %v5284_v61 = vmax.f32 (!%p3009_p12), %v4868_v19, 0.0 }
 0x5a6   : > { %v3052_v57 = vpack.c.bf16 (!%p3009_p12), %v5280_v43, %v5279_v34  ;;  %v5285_v27 = vmax.f32 (!%p3009_p12), %v4871_v12, 0.0  ;;  %v5286_v36 = vmax.f32 (!%p3009_p12), %v4874_v50, 0.0  ;;  %2714 = vst [vmem:[%s2704_s21 + $0x48] sm:$0xff] (!%p3009_p12), %v3049_v26  ;;  %2715 = vst [vmem:[%s2704_s21 + $0x50] sm:$0xff] (!%p3009_p12), %v3050_v30 }
 0x5a7   : > { %v3053_v11 = vpack.c.bf16 %v5282_v52, %v5281_v53  ;;  %v3054_v63 = vpack.c.bf16 %v5284_v61, %v5283_v32  ;;  %2716 = vst [vmem:[%s2704_s21 + $0x58] sm:$0xff] %v3051_v16 }
 0x5a8   : > { %v3055_v13 = vpack.c.bf16 %v5286_v36, %v5285_v27  ;;  %2717 = vst [vmem:[%s2704_s21 + $0x60] sm:$0xff] %v3052_v57 }
 0x5a9   : > { %2718 = vst [vmem:[%s2704_s21 + $0x68] sm:$0xff] %v3053_v11  ;;  %2719 = vst [vmem:[%s2704_s21 + $0x70] sm:$0xff] %v3054_v63 }
 0x5aa   : > { %2720 = vst [vmem:[%s2704_s21 + $0x78] sm:$0xff] %v3055_v13 }
 0x5ab PF: > { %p3184_p2 = scmp.eq.s32.totalorder %s4058_s16, 17  ;;  %s3802_s0 = smov [#allocation15]  }
 0x5ac   : > { %s2727_s12 = sshll.u32 %s3802_s0, 4  ;;  %s2728_s12 = int_to_ptr.vmem [resolvable:$true] %s2727_s12 }
 0x5ad   : > { %s3616_s7 = scalar_lea.vmem %s2728_s12, 4096  ;;  %p3623_p13 = scmp.lt.s32.totalorder %s2728_s12, %s2728_s12 }
 0x5ae   : > { %p3617_p11 = scmp.ne.s32.totalorder %s2728_s12, %s3616_s7  ;;  %p3624_p1 = scmp.lt.s32.totalorder %s3616_s7, %s3616_s7 }
 0x5b0   : > { %p3618_p4 = pnand %p3617_p11, %p3184_p2  ;;  %p3625_p0 = por %p3624_p1, %p3623_p13 }
 0x5b2   : > { %p3619_p6 = pneg %p3618_p4 }
 0x5b4   : > { %p3626_p5 = pnand %p3625_p0, %p3619_p6 }
 0x5b6   : > { %3629 = shalt.err (!%p3626_p5)
}
 0x5b7   : > { %s5287_s3 = sld [smem:[#allocation33_spill]] }
 0x5bd   : > { %s3630_s15 = scalar_lea.hbm %s5287_s3, 4096 }
 0x5be   : > { %p3631_p10 = scmp.ne.s32.totalorder %s5287_s3, %s3630_s15  ;;  %p3636_p9 = scmp.lt.u32.totalorder %s3630_s15, %s5287_s3 }
 0x5c0   : > { %p3632_p8 = pnand %p3631_p10, %p3184_p2 }
 0x5c2   : > { %p3633_p7 = pneg %p3632_p8 }
 0x5c4   : > { %p3638_p3 = pnand %p3636_p9, %p3633_p7 }
 0x5c6   : > { %3641 = shalt.err (!%p3638_p3)
}
 0x5c7   : > { %s3803_s10 = smov 128   ;;  %s3804_s14 = smov 8  }
 0x5c8   : > { %3164 = dma.vmem_to_hbm [thread:$0]  (%p3184_p2), %s2728_s12, 4096, %s5287_s3, [#allocation10], %s3803_s10, %s3803_s10, %s3804_s14  }
 0x5c9   : > { %3723 = dma.done.wait (%p3184_p2), [#allocation10], 4096  }
 0x5ca   : > { %3725 = vsyncadd (%p3184_p2), [#allocation10], 4294963200 }
 0x5cb PF: > { %s19_s30 = sadd.s32 1, %s3788_s30   ;;  %s5289_s15 = sld [smem:[#allocation22_spill]] }
 0x5cc   : > { %p5116_p12 = scmp.ge.s32.totalorder %s19_s30, 20   ;;  %s5290_s24 = sld [smem:[#allocation26_spill]] }
 0x5cd   : > { %s5291_s27 = sld [smem:[#allocation27_spill]]  ;;  %s5292_s0 = sld [smem:[#allocation28_spill]] }
 0x5ce   : > { %s5293_s12 = sld [smem:[#allocation29_spill]]  ;;  %s5294_s16 = smov %s3736_s17 }
 0x5cf   : > { %s5295_s17 = smov %s4124_s11  ;;  %s5296_s18 = smov %s3744_s19 }
 0x5d0   : > { %s5297_s19 = smov %s3748_s20  ;;  %s5298_s20 = smov %s4026_s8 }
 0x5d1   : > { %s5299_s21 = smov %s3756_s22  ;;  %s5300_s22 = smov %s3760_s23 }
 0x5d2   : > { %s5301_s23 = smov %s3944_s25  ;;  %s5302_s25 = smov %s3780_s28 }
 0x5d3   : > { %s5303_s26 = smov %s3784_s29  ;;  %s5304_s28 = smov %s5292_s0 }
 0x5d4   : > { %s5305_s29 = smov %s5293_s12  ;;  %18 = sbr.rel (!%p5116_p12) target bundleno = 16 (0x10), region = 141 }
 0x5db   :  { %2743 = vsyncpa [#allocation9], 1 }
 0x5dc   :  { %2745 = vsyncpa [#allocation9 + $0x1], 1 }
 0x5dd   :  { %2746 = vsyncpa [#allocation12], 1 }
 0x5de   :  { %2747 = vsyncpa [#allocation10], 1 }
 0x5df   :  { %2749 = vsyncpa [#allocation10 + $0x1], 1 }

</bundles_post_ra>
